<compile_context>
chip_gen: v6e
topology: v6e:2x2x1
jax: 0.10.0
libtpu: 0.0.40
codegen_flags: <defaults>
</compile_context>

<pallas_src>
import functools

import jax
import jax.numpy as jnp
from jax.experimental import pallas as pl
from jax.experimental.pallas import tpu as pltpu


# ----------------------------------------------------------------------------
# Kernel 1: backbone stub — conv (im2col matmul) + ReLU + global-avg-pool.
# Grid = (N, cf_splits, HW_tiles); HW is the reduction ("arbitrary") axis.
# ----------------------------------------------------------------------------
def conv_gap_kernel(p_ref, w_ref, b_ref, o_ref, acc_ref, *,
                    inv_hw, hw_valid, mask_rows):
    hw_id = pl.program_id(2)

    @pl.when(hw_id == 0)
    def _():
        acc_ref[...] = jnp.zeros_like(acc_ref)

    # (T_HW, Kp) bf16 @ (Kp, Cf_blk) bf16 -> f32 on the MXU.
    conv = jnp.dot(p_ref[0], w_ref[...], preferred_element_type=jnp.float32)
    conv = jnp.maximum(conv + b_ref[...], 0.0)            # bias + ReLU (f32)

    t_hw, cf = conv.shape
    if mask_rows:
        # Zero out rows that belong to HW padding (relu(b_conv) != 0 there).
        row = hw_id * t_hw + jax.lax.broadcasted_iota(jnp.int32, (t_hw, 1), 0)
        conv = jnp.where(row < hw_valid, conv, 0.0)

    # GAP partial sum on the VPU: fold T_HW into groups of 8 sublanes and add
    # vreg-wise into the (8, Cf_blk) f32 accumulator (no per-step XLU reduce).
    acc_ref[...] += jnp.sum(conv.reshape(t_hw // 8, 8, cf), axis=0)

    @pl.when(hw_id == pl.num_programs(2) - 1)
    def _():
        # Single cross-sublane reduce + mean scaling, once per (n, cf_block).
        o_ref[0] = jnp.sum(acc_ref[...], axis=0, keepdims=True) * inv_hw


def _hw_tiling(hw, cap):
    """Return (tile, padded_hw): tile is a multiple of 8 <= cap; hw is padded
    up to a multiple of tile when no exact multiple-of-8 divisor exists."""
    cap = max(8, (cap // 8) * 8)
    if hw <= cap:
        t = ((hw + 7) // 8) * 8
        return t, t
    for t in range(cap, 7, -8):                 # exact divisor -> no padding
        if hw % t == 0:
            return t, hw
    hw_pad = ((hw + cap - 1) // cap) * cap      # pad + mask path
    return cap, hw_pad


def backbone_features(patches, w_conv, b_conv, *, t_hw=1024, cf_splits=None,
                      vmem_limit_bytes=32 * 1024 * 1024):
    """patches: (N, HW, K) bf16; w_conv: (K, Cf) f32; b_conv: (1, Cf) f32.
    Returns (N, Cf) f32 global-average-pooled ReLU(conv) features."""
    N, HW, K = patches.shape
    Cf = w_conv.shape[1]

    # Pad K (=C*9=27) up to 32 so patch rows aren't 54-byte DMA slivers.
    Kp = ((K + 31) // 32) * 32

    # Spatial tiling (VMEM-bounded, image-size independent).
    T_HW, HW_pad = _hw_tiling(HW, t_hw)
    num_hw = HW_pad // T_HW
    mask_rows = HW_pad != HW

    if (Kp != K) or mask_rows:
        patches = jnp.pad(patches, ((0, 0), (0, HW_pad - HW), (0, Kp - K)))
    if Kp != K:
        w_conv = jnp.pad(w_conv, ((0, Kp - K), (0, 0)))

    # On v7x (2 TCs) a batch of 1 leaves a core idle: split Cf across cores.
    if cf_splits is None:
        cf_splits = 2 if (N == 1 and Cf % 256 == 0) else 1
    cf_blk = Cf // cf_splits

    kernel = functools.partial(conv_gap_kernel, inv_hw=1.0 / HW,
                               hw_valid=HW, mask_rows=mask_rows)
    out = pl.pallas_call(
        kernel,
        out_shape=jax.ShapeDtypeStruct((N, 1, Cf), jnp.float32),
        grid=(N, cf_splits, num_hw),
        in_specs=[
            pl.BlockSpec((1, T_HW, Kp), lambda n, c, h: (n, h, 0)),
            pl.BlockSpec((Kp, cf_blk), lambda n, c, h: (0, c)),
            pl.BlockSpec((1, cf_blk), lambda n, c, h: (0, c)),
        ],
        out_specs=pl.BlockSpec((1, 1, cf_blk), lambda n, c, h: (n, 0, c)),
        scratch_shapes=[pltpu.VMEM((8, cf_blk), jnp.float32)],
        compiler_params=pltpu.CompilerParams(
            dimension_semantics=("parallel", "parallel", "arbitrary"),
            vmem_limit_bytes=vmem_limit_bytes),
    )(patches, w_conv.astype(jnp.bfloat16), b_conv)
    return out.reshape(N, Cf)


# ----------------------------------------------------------------------------
# Kernel 2: embedding head — Linear + ReLU + (BN folded) Linear + L2 normalize.
# ----------------------------------------------------------------------------
def head_kernel(x_ref, w1_ref, b1_ref, w2_ref, b2_ref, o_ref):
    h = jnp.dot(x_ref[...], w1_ref[...], preferred_element_type=jnp.float32)
    h = jnp.maximum(h + b1_ref[...], 0.0)                 # Linear1 + ReLU (f32)
    e = jnp.dot(h.astype(jnp.bfloat16), w2_ref[...],
                preferred_element_type=jnp.float32)
    e = e + b2_ref[...]                                   # BN-folded Linear2
    # F.normalize(e, p=2, dim=1) == e / max(||e||_2, 1e-12); rsqrt on EUP.
    sumsq = jnp.sum(e * e, axis=1, keepdims=True)
    o_ref[...] = e * jax.lax.rsqrt(jnp.maximum(sumsq, 1e-24))


def fold_batchnorm_into_linear(gamma, beta, run_mean, run_var, w2, b2,
                               eps=1e-5):
    """BN(eval) after ReLU is a per-feature affine -> fold into next Linear."""
    s = gamma * jax.lax.rsqrt(run_var + eps)              # (1, H1)
    w2_f = w2 * s.reshape(-1, 1)                          # scale rows of w2
    b2_f = (beta - run_mean * s) @ w2 + b2                # (1, D)
    return w2_f, b2_f


def embedding_head(features, w1, b1, gamma, beta, run_mean, run_var, w2, b2,
                   *, row_tile=256):
    w2_f, b2_f = fold_batchnorm_into_linear(
        gamma, beta, run_mean, run_var, w2, b2)
    N, K1 = features.shape
    H1 = w1.shape[1]
    D = w2.shape[1]
    x = features.astype(jnp.bfloat16)
    w1b = w1.astype(jnp.bfloat16)
    w2b = w2_f.astype(jnp.bfloat16)

    if N <= row_tile:
        # Grid-less call: whole (small) operands single-buffered in VMEM.
        return pl.pallas_call(
            head_kernel,
            out_shape=jax.ShapeDtypeStruct((N, D), jnp.float32),
        )(x, w1b, b1, w2b, b2_f)

    # Large batch: tile over rows (parallel -> both v7x TCs share the batch).
    Np = ((N + row_tile - 1) // row_tile) * row_tile
    if Np != N:
        x = jnp.pad(x, ((0, Np - N), (0, 0)))
    out = pl.pallas_call(
        head_kernel,
        out_shape=jax.ShapeDtypeStruct((Np, D), jnp.float32),
        grid=(Np // row_tile,),
        in_specs=[
            pl.BlockSpec((row_tile, K1), lambda i: (i, 0)),
            pl.BlockSpec((K1, H1), lambda i: (0, 0)),
            pl.BlockSpec((1, H1), lambda i: (0, 0)),
            pl.BlockSpec((H1, D), lambda i: (0, 0)),
            pl.BlockSpec((1, D), lambda i: (0, 0)),
        ],
        out_specs=pl.BlockSpec((row_tile, D), lambda i: (i, 0)),
        compiler_params=pltpu.CompilerParams(
            dimension_semantics=("parallel",)),
    )(x, w1b, b1, w2b, b2_f)
    return out[:N]


# ----------------------------------------------------------------------------
# JAX glue: im2col (3x3, stride 1, padding 1) in NCHW -> (N, H*W, C*9)
# ----------------------------------------------------------------------------
def im2col_3x3(x_nchw):
    N, C, H, W = x_nchw.shape
    xp = jnp.pad(x_nchw, ((0, 0), (0, 0), (1, 1), (1, 1)))
    cols = []
    for i in range(3):
        for j in range(3):
            cols.append(xp[:, :, i:i + H, j:j + W])                 # (N,C,H,W)
    patches = jnp.stack(cols, axis=2)                               # (N,C,9,H,W)
    patches = patches.transpose(0, 3, 4, 1, 2).reshape(N, H * W, C * 9)
    return patches


def siamese_backbone_forward(x_nchw, params, *, t_hw=1024):
    # bf16 before im2col: the 9x-inflated patch array hits HBM once, in bf16.
    patches = im2col_3x3(x_nchw.astype(jnp.bfloat16))
    feats = backbone_features(patches, params["w_conv"], params["b_conv"],
                              t_hw=t_hw)
    emb = embedding_head(
        feats,
        params["w1"], params["b1"],
        params["gamma"], params["beta"],
        params["run_mean"], params["run_var"],
        params["w2"], params["b2"],
    )
    return emb


# ----------------------------------------------------------------------------
# Pure-JAX f32 reference (same math, no folding / bf16) for a sanity check.
# ----------------------------------------------------------------------------
def reference_forward(x_nchw, params):
    patches = im2col_3x3(x_nchw)
    conv = jnp.maximum(patches @ params["w_conv"] + params["b_conv"], 0.0)
    feats = conv.mean(axis=1)
    h = jnp.maximum(feats @ params["w1"] + params["b1"], 0.0)
    inv = jax.lax.rsqrt(params["run_var"] + 1e-5)
    h = (h - params["run_mean"]) * inv * params["gamma"] + params["beta"]
    e = h @ params["w2"] + params["b2"]
    n = jnp.maximum(jnp.linalg.norm(e, axis=1, keepdims=True), 1e-12)
    return e / n


# ----------------------------------------------------------------------------
# Deterministic parameter init (synthetic; shapes follow the module)
# ----------------------------------------------------------------------------
def init_params(key, in_channels=3, in_features=2048, hidden=512,
                embedding_dim=128):
    ks = jax.random.split(key, 8)
    k_patch = in_channels * 9
    w_conv = jax.random.normal(ks[0], (k_patch, in_features), jnp.float32)
    w_conv = w_conv * (1.0 / jnp.sqrt(k_patch))
    b_conv = 0.01 * jax.random.normal(ks[1], (1, in_features), jnp.float32)

    w1 = jax.random.normal(ks[2], (in_features, hidden), jnp.float32)
    w1 = w1 * (1.0 / jnp.sqrt(in_features))
    b1 = 0.01 * jax.random.normal(ks[3], (1, hidden), jnp.float32)

    gamma = 1.0 + 0.1 * jax.random.normal(ks[4], (1, hidden), jnp.float32)
    beta = 0.1 * jax.random.normal(ks[5], (1, hidden), jnp.float32)
    run_mean = 0.05 * jax.random.normal(ks[6], (1, hidden), jnp.float32)
    run_var = jnp.ones((1, hidden), jnp.float32) * 0.9

    w2 = jax.random.normal(ks[7], (hidden, embedding_dim), jnp.float32)
    w2 = w2 * (1.0 / jnp.sqrt(hidden))
    b2 = jnp.zeros((1, embedding_dim), jnp.float32)

    return dict(w_conv=w_conv, b_conv=b_conv, w1=w1, b1=b1, gamma=gamma,
                beta=beta, run_mean=run_mean, run_var=run_var, w2=w2, b2=b2)


if __name__ == "__main__":
    key = jax.random.PRNGKey(0)
    k_x, k_p, k_x2 = jax.random.split(key, 3)

    params = init_params(k_p)

    # Case 1: siamese pair, 16x16 — exercises the HW-tiled accumulator path
    # (HW=256, t_hw=128 -> 2 spatial tiles, no padding/mask).
    N, C, H, W = 2, 3, 16, 16
    x = jax.random.normal(k_x, (N, C, H, W), jnp.float32)
    fwd = jax.jit(lambda xx, pp: siamese_backbone_forward(xx, pp, t_hw=128))
    emb = jax.block_until_ready(fwd(x, params))

    assert emb.shape == (N, 128), emb.shape
    norms = jnp.linalg.norm(emb, axis=1)
    assert bool(jnp.all(jnp.abs(norms - 1.0) < 1e-4)), norms
    ref = reference_forward(x, params)
    cos = jnp.sum(emb * ref, axis=1)
    assert bool(jnp.all(cos > 0.98)), cos

    # Case 2: single image, 14x14 — exercises the HW-padding + row-mask path
    # (HW=196 -> padded to 256) and the Cf split (cf_splits=2 when N==1).
    x2 = jax.random.normal(k_x2, (1, C, 14, 14), jnp.float32)
    emb2 = jax.block_until_ready(fwd(x2, params))
    assert emb2.shape == (1, 128), emb2.shape
    ref2 = reference_forward(x2, params)
    cos2 = jnp.sum(emb2 * ref2, axis=1)
    assert bool(jnp.all(cos2 > 0.98)), cos2
    norms2 = jnp.linalg.norm(emb2, axis=1)
    assert bool(jnp.all(jnp.abs(norms2 - 1.0) < 1e-4)), norms2

    print("KERNEL_OK")
</pallas_src>

<mosaic_0001>
module attributes {stable_mosaic.version = 11 : i64} {
  func.func @conv_gap_kernel(%arg0: i32, %arg1: i32, %arg2: i32, %arg3: memref<1x128x32xbf16, #tpu.memory_space<vmem>>, %arg4: memref<32x2048xbf16, #tpu.memory_space<vmem>>, %arg5: memref<1x2048xf32, #tpu.memory_space<vmem>>, %arg6: memref<1x1x2048xf32, #tpu.memory_space<vmem>>, %arg7: memref<8x2048xf32, #tpu.memory_space<vmem>>) attributes {dimension_semantics = [#tpu.dimension_semantics<parallel>, #tpu.dimension_semantics<parallel>, #tpu.dimension_semantics<arbitrary>], iteration_bounds = array<i64: 2, 1, 2>, scalar_prefetch = 0 : i64, scratch_operands = 1 : i64, tpu.core_type = #tpu.core_type<tc>, window_params = [{transform_indices = @transform_0, window_bounds = array<i64: 1, 128, 32>}, {transform_indices = @transform_1, window_bounds = array<i64: 32, 2048>}, {transform_indices = @transform_2, window_bounds = array<i64: 1, 2048>}, {transform_indices = @transform_3, window_bounds = array<i64: 1, 1, 2048>}]} {
    %c0_i32 = arith.constant 0 : i32
    %0 = arith.cmpi eq, %arg2, %c0_i32 : i32
    %1 = arith.extui %0 : i1 to i32
    %c0_i32_0 = arith.constant 0 : i32
    %2 = arith.cmpi ne, %1, %c0_i32_0 : i32
    scf.if %2 {
      %cst_14 = arith.constant 0.000000e+00 : f32
      %20 = vector.broadcast %cst_14 : f32 to vector<8x2048xf32>
      %c0_15 = arith.constant 0 : index
      %c0_16 = arith.constant 0 : index
      %21 = vector.load %arg7[%c0_15, %c0_16] : memref<8x2048xf32, #tpu.memory_space<vmem>>, vector<8x2048xf32>
      tpu.vector_store %arg7[%c0_15, %c0_16], %20 {strides = array<i32>} : memref<8x2048xf32, #tpu.memory_space<vmem>>, vector<8x2048xf32>,
    } else {
    }
    %c0 = arith.constant 0 : index
    %c0_1 = arith.constant 0 : index
    %c0_2 = arith.constant 0 : index
    %3 = vector.load %arg3[%c0, %c0_1, %c0_2] : memref<1x128x32xbf16, #tpu.memory_space<vmem>>, vector<1x128x32xbf16>
    %4 = vector.shape_cast %3 : vector<1x128x32xbf16> to vector<128x32xbf16>
    %c0_3 = arith.constant 0 : index
    %c0_4 = arith.constant 0 : index
    %5 = vector.load %arg4[%c0_3, %c0_4] : memref<32x2048xbf16, #tpu.memory_space<vmem>>, vector<32x2048xbf16>
    %cst = arith.constant dense<0.000000e+00> : vector<128x2048xf32>
    %6 = tpu.matmul %4, %5, %cst {dimension_numbers = #tpu.dot_dimension_numbers<[1], [0], [0], [1], [0, 0, 1, 1], [], []>} : vector<128x32xbf16>, vector<32x2048xbf16>, vector<128x2048xf32> -> vector<128x2048xf32>
    %c0_5 = arith.constant 0 : index
    %c0_6 = arith.constant 0 : index
    %7 = vector.load %arg5[%c0_5, %c0_6] : memref<1x2048xf32, #tpu.memory_space<vmem>>, vector<1x2048xf32>
    %8 = vector.broadcast %7 : vector<1x2048xf32> to vector<128x2048xf32>
    %9 = arith.addf %6, %8 : vector<128x2048xf32>
    %cst_7 = arith.constant 0.000000e+00 : f32
    %10 = vector.broadcast %cst_7 : f32 to vector<128x2048xf32>
    %11 = arith.maximumf %9, %10 : vector<128x2048xf32>
    %c0_8 = arith.constant 0 : index
    %c0_9 = arith.constant 0 : index
    %12 = vector.load %arg7[%c0_8, %c0_9] : memref<8x2048xf32, #tpu.memory_space<vmem>>, vector<8x2048xf32>
    %13 = vector.shape_cast %11 : vector<128x2048xf32> to vector<16x8x2048xf32>
    %cst_10 = arith.constant dense<0.000000e+00> : vector<8x2048xf32>
    %14 = vector.multi_reduction <add>, %13, %cst_10 [0] : vector<16x8x2048xf32> to vector<8x2048xf32>
    %15 = arith.addf %12, %14 : vector<8x2048xf32>
    %c0_11 = arith.constant 0 : index
    %c0_12 = arith.constant 0 : index
    %16 = vector.load %arg7[%c0_11, %c0_12] : memref<8x2048xf32, #tpu.memory_space<vmem>>, vector<8x2048xf32>
    tpu.vector_store %arg7[%c0_11, %c0_12], %15 {strides = array<i32>} : memref<8x2048xf32, #tpu.memory_space<vmem>>, vector<8x2048xf32>,
    %c1_i32 = arith.constant 1 : i32
    %17 = arith.cmpi eq, %arg2, %c1_i32 : i32
    %18 = arith.extui %17 : i1 to i32
    %c0_i32_13 = arith.constant 0 : i32
    %19 = arith.cmpi ne, %18, %c0_i32_13 : i32
    scf.if %19 {
      %c0_14 = arith.constant 0 : index
      %c0_15 = arith.constant 0 : index
      %20 = vector.load %arg7[%c0_14, %c0_15] : memref<8x2048xf32, #tpu.memory_space<vmem>>, vector<8x2048xf32>
      %cst_16 = arith.constant dense<0.000000e+00> : vector<2048xf32>
      %21 = vector.multi_reduction <add>, %20, %cst_16 [0] : vector<8x2048xf32> to vector<2048xf32>
      %22 = vector.shape_cast %21 : vector<2048xf32> to vector<1x2048xf32>
      %cst_17 = arith.constant 3.906250e-03 : f32
      %23 = vector.broadcast %cst_17 : f32 to vector<1x2048xf32>
      %24 = arith.mulf %22, %23 : vector<1x2048xf32>
      %c0_18 = arith.constant 0 : index
      %c0_19 = arith.constant 0 : index
      %c0_20 = arith.constant 0 : index
      %25 = vector.load %arg6[%c0_18, %c0_19, %c0_20] : memref<1x1x2048xf32, #tpu.memory_space<vmem>>, vector<1x1x2048xf32>
      %26 = vector.shape_cast %25 : vector<1x1x2048xf32> to vector<1x2048xf32>
      %27 = vector.shape_cast %24 : vector<1x2048xf32> to vector<1x1x2048xf32>
      tpu.vector_store %arg6[%c0_18, %c0_19, %c0_20], %27 {strides = array<i32>} : memref<1x1x2048xf32, #tpu.memory_space<vmem>>, vector<1x1x2048xf32>,
    } else {
    }
    return
  }
  func.func @transform_0(%arg0: i32, %arg1: i32, %arg2: i32) -> (i32, i32, i32) {
    %c0_i32 = arith.constant 0 : i32
    %c0_i32_0 = arith.constant 0 : i32
    return %arg0, %arg2, %c0_i32 : i32, i32, i32
  }
  func.func @transform_1(%arg0: i32, %arg1: i32, %arg2: i32) -> (i32, i32) {
    %c0_i32 = arith.constant 0 : i32
    %c0_i32_0 = arith.constant 0 : i32
    return %c0_i32, %arg1 : i32, i32
  }
  func.func @transform_2(%arg0: i32, %arg1: i32, %arg2: i32) -> (i32, i32) {
    %c0_i32 = arith.constant 0 : i32
    %c0_i32_0 = arith.constant 0 : i32
    return %c0_i32, %arg1 : i32, i32
  }
  func.func @transform_3(%arg0: i32, %arg1: i32, %arg2: i32) -> (i32, i32, i32) {
    %c0_i32 = arith.constant 0 : i32
    %c0_i32_0 = arith.constant 0 : i32
    return %arg0, %c0_i32, %arg1 : i32, i32, i32
  }
}

module attributes {stable_mosaic.version = 11 : i64} {
  func.func @head_kernel(%arg0: memref<2x2048xbf16, #tpu.memory_space<vmem>>, %arg1: memref<2048x512xbf16, #tpu.memory_space<vmem>>, %arg2: memref<1x512xf32, #tpu.memory_space<vmem>>, %arg3: memref<512x128xbf16, #tpu.memory_space<vmem>>, %arg4: memref<1x128xf32, #tpu.memory_space<vmem>>, %arg5: memref<2x128xf32, #tpu.memory_space<vmem>>) attributes {dimension_semantics = [], scalar_prefetch = 0 : i64, scratch_operands = 0 : i64, tpu.core_type = #tpu.core_type<tc>} {
    %c0 = arith.constant 0 : index
    %c0_0 = arith.constant 0 : index
    %0 = vector.load %arg0[%c0, %c0_0] : memref<2x2048xbf16, #tpu.memory_space<vmem>>, vector<2x2048xbf16>
    %c0_1 = arith.constant 0 : index
    %c0_2 = arith.constant 0 : index
    %1 = vector.load %arg1[%c0_1, %c0_2] : memref<2048x512xbf16, #tpu.memory_space<vmem>>, vector<2048x512xbf16>
    %cst = arith.constant dense<0.000000e+00> : vector<2x512xf32>
    %2 = tpu.matmul %0, %1, %cst {dimension_numbers = #tpu.dot_dimension_numbers<[1], [0], [0], [1], [0, 0, 1, 1], [], []>} : vector<2x2048xbf16>, vector<2048x512xbf16>, vector<2x512xf32> -> vector<2x512xf32>
    %c0_3 = arith.constant 0 : index
    %c0_4 = arith.constant 0 : index
    %3 = vector.load %arg2[%c0_3, %c0_4] : memref<1x512xf32, #tpu.memory_space<vmem>>, vector<1x512xf32>
    %4 = vector.broadcast %3 : vector<1x512xf32> to vector<2x512xf32>
    %5 = arith.addf %2, %4 : vector<2x512xf32>
    %cst_5 = arith.constant 0.000000e+00 : f32
    %6 = vector.broadcast %cst_5 : f32 to vector<2x512xf32>
    %7 = arith.maximumf %5, %6 : vector<2x512xf32>
    %8 = arith.truncf %7 : vector<2x512xf32> to vector<2x512xbf16>
    %c0_6 = arith.constant 0 : index
    %c0_7 = arith.constant 0 : index
    %9 = vector.load %arg3[%c0_6, %c0_7] : memref<512x128xbf16, #tpu.memory_space<vmem>>, vector<512x128xbf16>
    %cst_8 = arith.constant dense<0.000000e+00> : vector<2x128xf32>
    %10 = tpu.matmul %8, %9, %cst_8 {dimension_numbers = #tpu.dot_dimension_numbers<[1], [0], [0], [1], [0, 0, 1, 1], [], []>} : vector<2x512xbf16>, vector<512x128xbf16>, vector<2x128xf32> -> vector<2x128xf32>
    %c0_9 = arith.constant 0 : index
    %c0_10 = arith.constant 0 : index
    %11 = vector.load %arg4[%c0_9, %c0_10] : memref<1x128xf32, #tpu.memory_space<vmem>>, vector<1x128xf32>
    %12 = vector.broadcast %11 : vector<1x128xf32> to vector<2x128xf32>
    %13 = arith.addf %10, %12 : vector<2x128xf32>
    %14 = arith.mulf %13, %13 : vector<2x128xf32>
    %cst_11 = arith.constant dense<0.000000e+00> : vector<2xf32>
    %15 = vector.multi_reduction <add>, %14, %cst_11 [1] : vector<2x128xf32> to vector<2xf32>
    %16 = vector.shape_cast %15 : vector<2xf32> to vector<2x1xf32>
    %cst_12 = arith.constant 1.000000e-24 : f32
    %17 = vector.broadcast %cst_12 : f32 to vector<2x1xf32>
    %18 = arith.maximumf %16, %17 : vector<2x1xf32>
    %19 = math.rsqrt %18 : vector<2x1xf32>
    %20 = vector.broadcast %19 : vector<2x1xf32> to vector<2x128xf32>
    %21 = arith.mulf %13, %20 : vector<2x128xf32>
    %c0_13 = arith.constant 0 : index
    %c0_14 = arith.constant 0 : index
    %22 = vector.load %arg5[%c0_13, %c0_14] : memref<2x128xf32, #tpu.memory_space<vmem>>, vector<2x128xf32>
    tpu.vector_store %arg5[%c0_13, %c0_14], %21 {strides = array<i32>} : memref<2x128xf32, #tpu.memory_space<vmem>>, vector<2x128xf32>,
    return
  }
}

</mosaic_0001>

<bundles_post_ra>
// kernel: _lambda_.2
= control target key start
LH: loop header
LB: loop body
LE: loop exit
PB: predicated region body
PF: predicated region fallthrough
CT: control target
= control target key end

     0   :  { %8 = vsyncpa [#allocation4], 0  ;;  %s2727_s12 = smov 0   ;;  %s2729_s13 = smov 0   ;;  %s3481_s0 = inlined_call_operand.vmem [shape: bf16[2,256,32], index: 0, kind: input, shape index: {}]   ;;  %s3482_s1 = inlined_call_operand.vmem [shape: bf16[32,2048], index: 1, kind: input, shape index: {}]   ;;  %s3483_s2 = inlined_call_operand.hbm [shape: f32[1,2048], index: 2, kind: input, shape index: {}]   ;;  %s3484_s3 = inlined_call_operand.vmem [shape: f32[2,1,2048], index: 3, kind: output, shape index: {}]  }
   0x1   :  { %s2731_s14 = smov 0   ;;  %s2733_s15 = smov 0  }
   0x2   :  { %s2735_s16 = smov 0  }
   0x3 LB: > { %s2451_s17 = sadd.s32 4294967295, %s2701_s16   ;;  %s26_s18 = sadd.s32 1, %s2693_s14  ;;  %s2701_s16 = sphi %s2735_s16, %s14_s16   ;;  %s2697_s15 = sphi %s2733_s15, %s3490_s15   ;;  %s2693_s14 = sphi %s2731_s14, %s3489_s14   ;;  %s2689_s13 = sphi %s2729_s13, %s3488_s13   ;;  %s2685_s12 = sphi %s2727_s12, %s3487_s12  }
   0x4   : > { %p27_p0 = scmp.ge.s32.totalorder %s26_s18, 2  ;;  %s33_s19 = sadd.s32 1, %s2697_s15 }
   0x5   : > { %p2453_p1 = scmp.ge.s32.totalorder %s2701_s16, 1  ;;  %p146_p2 = scmp.lt.s32.totalorder %s2701_s16, 5 }
   0x6   : > { %s3492_s18 = smov (%p27_p0, %s26_s18), 0  ;;  %s3494_s19 = smov (!%p27_p0, %s33_s19), %s2697_s15 }
   0x7   : > { %p2760_p3 = pnand %p2453_p1, %p146_p2  ;;  %p35_p4 = scmp.ge.s32.totalorder %s3494_s19, 2 }
   0x8   : > { %p2764_p5 = scmp.eq.s32.totalorder %s2451_s17, 0  ;;  %s2703_s22 = smov [#allocation3]  }
   0x9   : > { %p2575_p6 = pneg %p2760_p3  ;;  %s3496_s19 = smov (%p35_p4, %s3494_s19), 0 }
   0xa   : > { %s171_s23 = sshll.u32 %s2703_s22, 4  ;;  %s172_s23 = int_to_ptr.vmem [resolvable:$true] %s171_s23 }
   0xb   : > { %p2576_p7 = pnand %p2764_p5, %p2575_p6  ;;  %s2644_s24 = scalar_lea.vmem %s172_s23, 256 }
   0xc   : > { %p2645_p9 = scmp.ne.s32.totalorder %s172_s23, %s2644_s24  ;;  %p2652_p12 = scmp.lt.s32.totalorder %s172_s23, %s172_s23 }
   0xd   : > { %p2635_p8 = pneg %p2576_p7  ;;  %p2653_p13 = scmp.lt.s32.totalorder %s2644_s24, %s2644_s24 }
   0xf   : > { %p2647_p10 = pnand %p2645_p9, %p2635_p8  ;;  %p2654_p0 = por %p2653_p13, %p2652_p12 }
  0x11   : > { %p2648_p11 = pneg %p2647_p10 }
  0x13   : > { %p2655_p1 = pnand %p2654_p0, %p2648_p11 }
  0x15   : > { %2658 = shalt.err (!%p2655_p1)
}
  0x16   : > { %2578 = dma.hbm_to_vmem [thread:$0]  (!%p2576_p7), %s3483_s2, 256, %s172_s23, [#allocation4]  }
  0x17   : > { %197 = sbr.rel (%p2760_p3) target bundleno = 561 (0x231), region = 32 }
  0x1c   : > { %2680 = dma.done.wait (%p2764_p5), [#allocation4], 256  }
  0x1d   : > { %2682 = vsyncadd (%p2764_p5), [#allocation4], 4294967040  ;;  %s2459_s27 = sshll.u32 %s2685_s12, 4  ;;  %p234_p2 = scmp.lt.s32.totalorder %s2689_s13, 1 }
  0x1e   : > { %p236_p4 = scmp.lt.s32.totalorder %s2459_s27, 31  ;;  %p2463_p3 = scmp.ne.s32.totalorder %s2685_s12, 0 }
  0x1f   : > { %s3498_s13 = smov (!%p234_p2, %s2689_s13), 1 }
  0x20   : > { %s3500_s27 = smov (!%p236_p4, %s2459_s27), 31  ;;  %s2460_s28 = sshll.u32 %s3498_s13, 5 }
  0x21   : > { %s2462_s29 = sshll.u32 %s3498_s13, 4  ;;  %s239_s30 = sadd.s32 %s2460_s28, %s3500_s27 }
  0x22   : > { %s2789_s6 = scalar_lea.vmem %s3484_s3, %s2462_s29  ;;  %s2461_s7 = sshll.u32 %s239_s30, 2 }
  0x23   : > { %s2794_s10 = scalar_lea.vmem %s3481_s0, %s2461_s7  ;;  %263 = sbr.rel (%p2463_p3) target bundleno = 49 (0x31), region = 40 }
  0x28   : > { %v2704_v0 = vmov 0.0  }
  0x29   : > { %264 = vst [vmem:[#allocation2 + $0x30] sm:$0xff] %v2704_v0  ;;  %265 = vst [vmem:[#allocation2] sm:$0xff] %v2704_v0 }
  0x2a   : > { %266 = vst [vmem:[#allocation2 + $0x58] sm:$0xff] %v2704_v0  ;;  %267 = vst [vmem:[#allocation2 + $0x18] sm:$0xff] %v2704_v0 }
  0x2b   : > { %268 = vst [vmem:[#allocation2 + $0x50] sm:$0xff] %v2704_v0  ;;  %269 = vst [vmem:[#allocation2 + $0x68] sm:$0xff] %v2704_v0 }
  0x2c   : > { %270 = vst [vmem:[#allocation2 + $0x8] sm:$0xff] %v2704_v0  ;;  %271 = vst [vmem:[#allocation2 + $0x48] sm:$0xff] %v2704_v0 }
  0x2d   : > { %272 = vst [vmem:[#allocation2 + $0x40] sm:$0xff] %v2704_v0  ;;  %273 = vst [vmem:[#allocation2 + $0x20] sm:$0xff] %v2704_v0 }
  0x2e   : > { %274 = vst [vmem:[#allocation2 + $0x10] sm:$0xff] %v2704_v0  ;;  %275 = vst [vmem:[#allocation2 + $0x38] sm:$0xff] %v2704_v0 }
  0x2f   : > { %276 = vst [vmem:[#allocation2 + $0x60] sm:$0xff] %v2704_v0  ;;  %277 = vst [vmem:[#allocation2 + $0x70] sm:$0xff] %v2704_v0 }
  0x30   : > { %278 = vst [vmem:[#allocation2 + $0x78] sm:$0xff] %v2704_v0  ;;  %279 = vst [vmem:[#allocation2 + $0x28] sm:$0xff] %v2704_v0 }
  0x31 PF: > { %v312_v1 = vld [vmem:[%s3482_s1 + $0x80] sm:$0xff]  ;;  %v313_v3 = vld [vmem:[%s3482_s1 + $0x88] sm:$0xff]  ;;  %v2705_v9 = vmov 0   ;;  %v314_v16 = vld [vmem:[%s3482_s1 + $0x90] sm:$0xff]  ;;  %vm612_vm0 = vcmask 261120   ;;  %p2568_p5 = scmp.ne.s32.totalorder %s2685_s12, 1 }
  0x32   : > { %v320_v2 = vld [vmem:[%s3482_s1 + $0xc0] sm:$0xff]  ;;  %v321_v5 = vld [vmem:[%s3482_s1 + $0xc8] sm:$0xff]  ;;  %669 = vmatprep.mubr.bf16.mxu0 %v2705_v9  ;;  %782 = vmatprep.mubr.bf16.mxu1 %v2705_v9  ;;  %v322_v18 = vld [vmem:[%s3482_s1 + $0xd0] sm:$0xff] }
  0x33   : > { %v2489_v4 = vcombine.high %v312_v1, %v320_v2  ;;  %v2488_v6 = vcombine.low %v312_v1, %v320_v2  ;;  %v296_v7 = vld [vmem:[%s3482_s1] sm:$0xff]  ;;  %v2491_v10 = vcombine.high %v313_v3, %v321_v5  ;;  %v2490_v11 = vcombine.low %v313_v3, %v321_v5  ;;  %v297_v13 = vld [vmem:[%s3482_s1 + $0x8] sm:$0xff]  ;;  %v315_v19 = vld [vmem:[%s3482_s1 + $0x98] sm:$0xff] }
  0x34   : > { %v304_v8 = vld [vmem:[%s3482_s1 + $0x40] sm:$0xff]  ;;  %v305_v14 = vld [vmem:[%s3482_s1 + $0x48] sm:$0xff]  ;;  %v323_v20 = vld [vmem:[%s3482_s1 + $0xd8] sm:$0xff]  ;;  %v2493_v22 = vcombine.high %v314_v16, %v322_v18  ;;  %v2492_v25 = vcombine.low %v314_v16, %v322_v18 }
  0x35   : > { %v2473_v12 = vcombine.high %v296_v7, %v304_v8  ;;  %649 = vmatprep.subr.bf16.mxu0 %v2489_v4  ;;  %v2475_v15 = vcombine.high %v297_v13, %v305_v14  ;;  %762 = vmatprep.subr.bf16.mxu1 %v2491_v10  ;;  %v2472_v17 = vcombine.low %v296_v7, %v304_v8  ;;  %v2836_v24 = vld [vmem:[%s2794_s10] sm:$0xff]   ;;  %v298_v27 = vld [vmem:[%s3482_s1 + $0x10] sm:$0xff]  ;;  %v299_v29 = vld [vmem:[%s3482_s1 + $0x18] sm:$0xff] }
  0x36   : > { %650 = vmatpush1.bf16.msra.mxu0 %v2488_v6  ;;  %763 = vmatpush1.bf16.msra.mxu1 %v2490_v11  ;;  %v2474_v21 = vcombine.low %v297_v13, %v305_v14  ;;  %v2495_v23 = vcombine.high %v315_v19, %v323_v20  ;;  %v2494_v26 = vcombine.low %v315_v19, %v323_v20  ;;  %v306_v28 = vld [vmem:[%s3482_s1 + $0x50] sm:$0xff]  ;;  %v307_v31 = vld [vmem:[%s3482_s1 + $0x58] sm:$0xff]  ;;  %v316_v35 = vld [vmem:[%s3482_s1 + $0xa0] sm:$0xff]  ;;  %v332_v14 = vlaneseq }
  0x37   : > { %651 = vmatprep.subr.bf16.mxu0 %v2473_v12  ;;  %764 = vmatprep.subr.bf16.mxu1 %v2475_v15  ;;  %v2477_v30 = vcombine.high %v298_v27, %v306_v28  ;;  %v2479_v32 = vcombine.high %v299_v29, %v307_v31  ;;  %v2476_v33 = vcombine.low %v298_v27, %v306_v28  ;;  %v324_v36 = vld [vmem:[%s3482_s1 + $0xe0] sm:$0xff]  ;;  %v317_v38 = vld [vmem:[%s3482_s1 + $0xa8] sm:$0xff]  ;;  %v2878_v42 = vld [vmem:[%s2794_s10 + $0x10] sm:$0xff]  }
  0x38   : > { %v2478_v34 = vcombine.low %v299_v29, %v307_v31  ;;  %v2497_v37 = vcombine.high %v316_v35, %v324_v36  ;;  %v325_v39 = vld [vmem:[%s3482_s1 + $0xe8] sm:$0xff]  ;;  %v2887_v43 = vld [vmem:[%s2794_s10 + $0x18] sm:$0xff]   ;;  %v2896_v44 = vld [vmem:[%s2794_s10 + $0x20] sm:$0xff]   ;;  %v2496_v50 = vcombine.low %v316_v35, %v324_v36  ;;  %v3069_v19 = vshrl.u32 %v332_v14, 7 }
  0x39   : > { %v2869_v40 = vld [vmem:[%s2794_s10 + $0x8] sm:$0xff]   ;;  %v2499_v41 = vcombine.high %v317_v38, %v325_v39  ;;  %v2914_v46 = vld [vmem:[%s2794_s10 + $0x30] sm:$0xff]   ;;  %v2923_v47 = vld [vmem:[%s2794_s10 + $0x38] sm:$0xff]   ;;  %v2498_v53 = vcombine.low %v317_v38, %v325_v39 }
  0x3a   : > { %652 = vmatpush1.bf16.msra.mxu0 %v2472_v17  ;;  %765 = vmatpush1.bf16.msra.mxu1 %v2474_v21  ;;  %v2905_v45 = vld [vmem:[%s2794_s10 + $0x28] sm:$0xff]   ;;  %v300_v48 = vld [vmem:[%s3482_s1 + $0x20] sm:$0xff]  ;;  %v318_v55 = vld [vmem:[%s3482_s1 + $0xb0] sm:$0xff]  ;;  %v342_v27 = vsub.s32 2, %v3069_v19  ;;  %v338_v29 = vsub.s32 1, %v3069_v19 }
  0x3b   : > { %875 = vmatprep.subr.bf16.mxu0 %v2493_v22  ;;  %988 = vmatprep.subr.bf16.mxu1 %v2495_v23  ;;  %v308_v49 = vld [vmem:[%s3482_s1 + $0x60] sm:$0xff]  ;;  %v301_v51 = vld [vmem:[%s3482_s1 + $0x28] sm:$0xff]  ;;  %v326_v56 = vld [vmem:[%s3482_s1 + $0xf0] sm:$0xff] }
  0x3c   : > { %v309_v52 = vld [vmem:[%s3482_s1 + $0x68] sm:$0xff]  ;;  %v2481_v54 = vcombine.high %v300_v48, %v308_v49  ;;  %v319_v58 = vld [vmem:[%s3482_s1 + $0xb8] sm:$0xff]  ;;  %v2480_v60 = vcombine.low %v300_v48, %v308_v49  ;;  %v2501_v62 = vcombine.high %v318_v55, %v326_v56  ;;  %v302_v0 = vld [vmem:[%s3482_s1 + $0x30] sm:$0xff]  ;;  %v2500_v2 = vcombine.low %v318_v55, %v326_v56 }
  0x3d   : > { %2504 = vmatmul.mubr.msk.bf16.vlgmr.msra.gmra.mxu0 %vm612_vm0, %v2836_v24  ;;  %2512 = vmatmul.mubr.msk.bf16.vlgmr.msra.gmra.mxu1 %vm612_vm0, %v2836_v24  ;;  %v2483_v57 = vcombine.high %v301_v51, %v309_v52  ;;  %v327_v59 = vld [vmem:[%s3482_s1 + $0xf8] sm:$0xff]  ;;  %v2482_v61 = vcombine.low %v301_v51, %v309_v52  ;;  %v310_v1 = vld [vmem:[%s3482_s1 + $0x70] sm:$0xff] }
  0x3e   : > { %876 = vmatpush1.bf16.msra.mxu0 %v2492_v25  ;;  %989 = vmatpush1.bf16.msra.mxu1 %v2494_v26  ;;  %v2503_v63 = vcombine.high %v319_v58, %v327_v59  ;;  %v303_v3 = vld [vmem:[%s3482_s1 + $0x38] sm:$0xff]  ;;  %v2502_v5 = vcombine.low %v319_v58, %v327_v59  ;;  %v2485_v6 = vcombine.high %v302_v0, %v310_v1  ;;  %v3078_v26 = vld [vmem:[#allocation3] sm:$0xff] }
  0x3f   : > { %679 = vmatprep.mubr.bf16.mxu0 %v2705_v9  ;;  %792 = vmatprep.mubr.bf16.mxu1 %v2705_v9  ;;  %v311_v4 = vld [vmem:[%s3482_s1 + $0x78] sm:$0xff]  ;;  %v2484_v8 = vcombine.low %v302_v0, %v310_v1  ;;  %v3091_v35 = vrot.slane %v3078_v26, %v342_v27 }
  0x40   : > { %877 = vmatprep.subr.bf16.mxu0 %v2477_v30  ;;  %990 = vmatprep.subr.bf16.mxu1 %v2479_v32  ;;  %v2487_v7 = vcombine.high %v303_v3, %v311_v4  ;;  %v2486_v10 = vcombine.low %v303_v3, %v311_v4  ;;  %v346_v30 = vsub.s32 3, %v3069_v19 }
  0x42   : > { %878 = vmatpush1.bf16.msra.mxu0 %v2476_v33  ;;  %991 = vmatpush1.bf16.msra.mxu1 %v2478_v34  ;;  %v3103_v38 = vrot.slane %v3078_v26, %v346_v30 }
  0x43   : > { %1101 = vmatprep.subr.bf16.mxu0 %v2497_v37  ;;  %1214 = vmatprep.subr.bf16.mxu1 %v2499_v41  ;;  %v3098_v37 = vrot.slane %v3078_v26, %v338_v29 }
  0x45   : > { %2505 = vmatmul.mubr.msk.bf16.gmra.mxu0 %vm612_vm0, %v2869_v40  ;;  %2513 = vmatmul.mubr.msk.bf16.gmra.mxu1 %vm612_vm0, %v2869_v40 }
  0x46   : > { %689 = vmatprep.mubr.bf16.mxu0 %v2705_v9  ;;  %802 = vmatprep.mubr.bf16.mxu1 %v2705_v9 }
  0x4d   : > { %2506 = vmatmul.mubr.msk.bf16.gmra.mxu0 %vm612_vm0, %v2878_v42  ;;  %2514 = vmatmul.mubr.msk.bf16.gmra.mxu1 %vm612_vm0, %v2878_v42 }
  0x4e   : > { %699 = vmatprep.mubr.bf16.mxu0 %v2705_v9  ;;  %812 = vmatprep.mubr.bf16.mxu1 %v2705_v9 }
  0x55   : > { %2507 = vmatmul.mubr.msk.bf16.gmra.mxu0 %vm612_vm0, %v2887_v43  ;;  %2515 = vmatmul.mubr.msk.bf16.gmra.mxu1 %vm612_vm0, %v2887_v43 }
  0x56   : > { %709 = vmatprep.mubr.bf16.mxu0 %v2705_v9  ;;  %822 = vmatprep.mubr.bf16.mxu1 %v2705_v9 }
  0x5d   : > { %2508 = vmatmul.mubr.msk.bf16.gmra.mxu0 %vm612_vm0, %v2896_v44  ;;  %2516 = vmatmul.mubr.msk.bf16.gmra.mxu1 %vm612_vm0, %v2896_v44 }
  0x5e   : > { %719 = vmatprep.mubr.bf16.mxu0 %v2705_v9  ;;  %832 = vmatprep.mubr.bf16.mxu1 %v2705_v9 }
  0x65   : > { %2509 = vmatmul.mubr.msk.bf16.gmra.mxu0 %vm612_vm0, %v2905_v45  ;;  %2517 = vmatmul.mubr.msk.bf16.gmra.mxu1 %vm612_vm0, %v2905_v45 }
  0x66   : > { %729 = vmatprep.mubr.bf16.mxu0 %v2705_v9  ;;  %842 = vmatprep.mubr.bf16.mxu1 %v2705_v9 }
  0x6d   : > { %2510 = vmatmul.mubr.msk.bf16.gmra.mxu0 %vm612_vm0, %v2914_v46  ;;  %2518 = vmatmul.mubr.msk.bf16.gmra.mxu1 %vm612_vm0, %v2914_v46 }
  0x6e   : > { %739 = vmatprep.mubr.bf16.mxu0 %v2705_v9  ;;  %852 = vmatprep.mubr.bf16.mxu1 %v2705_v9 }
  0x75   : > { %2511 = vmatmul.mubr.msk.bf16.gmra.mxu0 %vm612_vm0, %v2923_v47  ;;  %2519 = vmatmul.mubr.msk.bf16.gmra.mxu1 %vm612_vm0, %v2923_v47 }
  0x76   : > { %895 = vmatprep.mubr.bf16.mxu0 %v2705_v9  ;;  %1008 = vmatprep.mubr.bf16.mxu1 %v2705_v9 }
  0x7d   : > { %2520 = vmatmul.mubr.msk.bf16.vlgmr.msra.gmra.mxu0 %vm612_vm0, %v2836_v24  ;;  %2528 = vmatmul.mubr.msk.bf16.vlgmr.msra.gmra.mxu1 %vm612_vm0, %v2836_v24 }
  0x7e   : > { %1102 = vmatpush1.bf16.msra.mxu0 %v2496_v50  ;;  %1215 = vmatpush1.bf16.msra.mxu1 %v2498_v53 }
  0x7f   : > { %905 = vmatprep.mubr.bf16.mxu0 %v2705_v9  ;;  %1018 = vmatprep.mubr.bf16.mxu1 %v2705_v9 }
  0x80   : > { %1103 = vmatprep.subr.bf16.mxu0 %v2481_v54  ;;  %1216 = vmatprep.subr.bf16.mxu1 %v2483_v57 }
  0x82   : > { %1104 = vmatpush1.bf16.msra.mxu0 %v2480_v60  ;;  %1217 = vmatpush1.bf16.msra.mxu1 %v2482_v61 }
  0x83   : > { %1327 = vmatprep.subr.bf16.mxu0 %v2501_v62  ;;  %1440 = vmatprep.subr.bf16.mxu1 %v2503_v63 }
  0x85   : > { %2521 = vmatmul.mubr.msk.bf16.gmra.mxu0 %vm612_vm0, %v2869_v40  ;;  %2529 = vmatmul.mubr.msk.bf16.gmra.mxu1 %vm612_vm0, %v2869_v40 }
  0x86   : > { %915 = vmatprep.mubr.bf16.mxu0 %v2705_v9  ;;  %1028 = vmatprep.mubr.bf16.mxu1 %v2705_v9 }
  0x8d   : > { %2522 = vmatmul.mubr.msk.bf16.gmra.mxu0 %vm612_vm0, %v2878_v42  ;;  %2530 = vmatmul.mubr.msk.bf16.gmra.mxu1 %vm612_vm0, %v2878_v42 }
  0x8e   : > { %925 = vmatprep.mubr.bf16.mxu0 %v2705_v9  ;;  %1038 = vmatprep.mubr.bf16.mxu1 %v2705_v9 }
  0x95   : > { %2523 = vmatmul.mubr.msk.bf16.gmra.mxu0 %vm612_vm0, %v2887_v43  ;;  %2531 = vmatmul.mubr.msk.bf16.gmra.mxu1 %vm612_vm0, %v2887_v43 }
  0x96   : > { %935 = vmatprep.mubr.bf16.mxu0 %v2705_v9  ;;  %1048 = vmatprep.mubr.bf16.mxu1 %v2705_v9 }
  0x9d   : > { %2524 = vmatmul.mubr.msk.bf16.gmra.mxu0 %vm612_vm0, %v2896_v44  ;;  %2532 = vmatmul.mubr.msk.bf16.gmra.mxu1 %vm612_vm0, %v2896_v44 }
  0x9e   : > { %945 = vmatprep.mubr.bf16.mxu0 %v2705_v9  ;;  %1058 = vmatprep.mubr.bf16.mxu1 %v2705_v9 }
  0xa5   : > { %2525 = vmatmul.mubr.msk.bf16.gmra.mxu0 %vm612_vm0, %v2905_v45  ;;  %2533 = vmatmul.mubr.msk.bf16.gmra.mxu1 %vm612_vm0, %v2905_v45 }
  0xa6   : > { %955 = vmatprep.mubr.bf16.mxu0 %v2705_v9  ;;  %1068 = vmatprep.mubr.bf16.mxu1 %v2705_v9 }
  0xad   : > { %2526 = vmatmul.mubr.msk.bf16.gmra.mxu0 %vm612_vm0, %v2914_v46  ;;  %2534 = vmatmul.mubr.msk.bf16.gmra.mxu1 %vm612_vm0, %v2914_v46 }
  0xae   : > { %965 = vmatprep.mubr.bf16.mxu0 %v2705_v9  ;;  %1078 = vmatprep.mubr.bf16.mxu1 %v2705_v9 }
  0xb5   : > { %2527 = vmatmul.mubr.msk.bf16.gmra.mxu0 %vm612_vm0, %v2923_v47  ;;  %2535 = vmatmul.mubr.msk.bf16.gmra.mxu1 %vm612_vm0, %v2923_v47 }
  0xb6   : > { %1121 = vmatprep.mubr.bf16.mxu0 %v2705_v9  ;;  %1234 = vmatprep.mubr.bf16.mxu1 %v2705_v9 }
  0xbd   : > { %2536 = vmatmul.mubr.msk.bf16.vlgmr.msra.gmra.mxu0 %vm612_vm0, %v2836_v24  ;;  %2544 = vmatmul.mubr.msk.bf16.vlgmr.msra.gmra.mxu1 %vm612_vm0, %v2836_v24 }
  0xbe   : > { %1328 = vmatpush1.bf16.msra.mxu0 %v2500_v2  ;;  %1441 = vmatpush1.bf16.msra.mxu1 %v2502_v5 }
  0xbf   : > { %1131 = vmatprep.mubr.bf16.mxu0 %v2705_v9  ;;  %1244 = vmatprep.mubr.bf16.mxu1 %v2705_v9 }
  0xc0   : > { %1329 = vmatprep.subr.bf16.mxu0 %v2485_v6  ;;  %1442 = vmatprep.subr.bf16.mxu1 %v2487_v7 }
  0xc2   : > { %1330 = vmatpush1.bf16.msra.mxu0 %v2484_v8  ;;  %1443 = vmatpush1.bf16.msra.mxu1 %v2486_v10 }
  0xc5   : > { %2537 = vmatmul.mubr.msk.bf16.gmra.mxu0 %vm612_vm0, %v2869_v40  ;;  %2545 = vmatmul.mubr.msk.bf16.gmra.mxu1 %vm612_vm0, %v2869_v40 }
  0xc6   : > { %1141 = vmatprep.mubr.bf16.mxu0 %v2705_v9  ;;  %1254 = vmatprep.mubr.bf16.mxu1 %v2705_v9 }
  0xcd   : > { %2538 = vmatmul.mubr.msk.bf16.gmra.mxu0 %vm612_vm0, %v2878_v42  ;;  %2546 = vmatmul.mubr.msk.bf16.gmra.mxu1 %vm612_vm0, %v2878_v42 }
  0xce   : > { %1151 = vmatprep.mubr.bf16.mxu0 %v2705_v9  ;;  %1264 = vmatprep.mubr.bf16.mxu1 %v2705_v9 }
  0xd5   : > { %2539 = vmatmul.mubr.msk.bf16.gmra.mxu0 %vm612_vm0, %v2887_v43  ;;  %2547 = vmatmul.mubr.msk.bf16.gmra.mxu1 %vm612_vm0, %v2887_v43 }
  0xd6   : > { %1161 = vmatprep.mubr.bf16.mxu0 %v2705_v9  ;;  %1274 = vmatprep.mubr.bf16.mxu1 %v2705_v9 }
  0xdd   : > { %2540 = vmatmul.mubr.msk.bf16.gmra.mxu0 %vm612_vm0, %v2896_v44  ;;  %2548 = vmatmul.mubr.msk.bf16.gmra.mxu1 %vm612_vm0, %v2896_v44 }
  0xde   : > { %1171 = vmatprep.mubr.bf16.mxu0 %v2705_v9  ;;  %1284 = vmatprep.mubr.bf16.mxu1 %v2705_v9 }
  0xe5   : > { %2541 = vmatmul.mubr.msk.bf16.gmra.mxu0 %vm612_vm0, %v2905_v45  ;;  %2549 = vmatmul.mubr.msk.bf16.gmra.mxu1 %vm612_vm0, %v2905_v45 }
  0xe6   : > { %1181 = vmatprep.mubr.bf16.mxu0 %v2705_v9  ;;  %1294 = vmatprep.mubr.bf16.mxu1 %v2705_v9 }
  0xed   : > { %2542 = vmatmul.mubr.msk.bf16.gmra.mxu0 %vm612_vm0, %v2914_v46  ;;  %2550 = vmatmul.mubr.msk.bf16.gmra.mxu1 %vm612_vm0, %v2914_v46 }
  0xee   : > { %1191 = vmatprep.mubr.bf16.mxu0 %v2705_v9  ;;  %1304 = vmatprep.mubr.bf16.mxu1 %v2705_v9 }
  0xf5   : > { %2543 = vmatmul.mubr.msk.bf16.gmra.mxu0 %vm612_vm0, %v2923_v47  ;;  %2551 = vmatmul.mubr.msk.bf16.gmra.mxu1 %vm612_vm0, %v2923_v47 }
  0xf6   : > { %1347 = vmatprep.mubr.bf16.mxu0 %v2705_v9  ;;  %1460 = vmatprep.mubr.bf16.mxu1 %v2705_v9 }
  0xfd   : > { %v671_v11 = vpop.f32.mrf.mxu0  ;;  %2552 = vmatmul.mubr.msk.bf16.vlgmr.msra.gmra.mxu0 %vm612_vm0, %v2836_v24  ;;  %v784_v12 = vpop.f32.mrf.mxu1  ;;  %2560 = vmatmul.mubr.msk.bf16.vlgmr.msra.gmra.mxu1 %vm612_vm0, %v2836_v24  ;;  %v334_v24 = vsub.s32 0, %v3069_v19 }
  0xfe   : > { %1357 = vmatprep.mubr.bf16.mxu0 %v2705_v9  ;;  %1470 = vmatprep.mubr.bf16.mxu1 %v2705_v9  ;;  %v785_v52 = vadd.f32 %v784_v12, %v3091_v35 }
  0xff   : > { %v673_v13 = vpop.f32.mrf.mxu0  ;;  %v786_v15 = vpop.f32.mrf.mxu1  ;;  %v3086_v33 = vrot.slane %v3078_v26, %v334_v24 }
 0x100   : > { %v787_v55 = vadd.f32 %v786_v15, %v3103_v38  ;;  %v1543_v3 = vmax.f32 %v785_v52, 0.0 }
 0x101   : > { %v675_v16 = vpop.f32.mrf.mxu0  ;;  %v788_v17 = vpop.f32.mrf.mxu1  ;;  %v672_v49 = vadd.f32 %v671_v11, %v3086_v33 }
 0x102   : > { %v789_v41 = vadd.f32 %v788_v17, %v3091_v35  ;;  %v1544_v10 = vmax.f32 %v787_v55, 0.0 }
 0x103   : > { %v677_v18 = vpop.f32.mrf.mxu0  ;;  %v790_v20 = vpop.f32.mrf.mxu1  ;;  %v1541_v62 = vmax.f32 %v672_v49, 0.0 }
 0x104   : > { %v678_v50 = vadd.f32 %v677_v18, %v3098_v37  ;;  %v791_v53 = vadd.f32 %v790_v20, %v3103_v38  ;;  %v1559_v59 = vmax.f32 %v789_v41, 0.0 }
 0x105   : > { %v681_v21 = vpop.f32.mrf.mxu0  ;;  %2553 = vmatmul.mubr.msk.bf16.gmra.mxu0 %vm612_vm0, %v2869_v40  ;;  %v794_v22 = vpop.f32.mrf.mxu1  ;;  %2561 = vmatmul.mubr.msk.bf16.gmra.mxu1 %vm612_vm0, %v2869_v40  ;;  %v676_v40 = vadd.f32 %v675_v16, %v3086_v33 }
 0x106   : > { %1367 = vmatprep.mubr.bf16.mxu0 %v2705_v9  ;;  %1480 = vmatprep.mubr.bf16.mxu1 %v2705_v9  ;;  %v682_v56 = vadd.f32 %v681_v21, %v3086_v33  ;;  %v795_v60 = vadd.f32 %v794_v22, %v3091_v35  ;;  %v1558_v63 = vmax.f32 %v678_v50, 0.0  ;;  %v1560_v4 = vmax.f32 %v791_v53, 0.0 }
 0x107   : > { %v683_v23 = vpop.f32.mrf.mxu0  ;;  %v796_v25 = vpop.f32.mrf.mxu1  ;;  %v1557_v58 = vmax.f32 %v676_v40, 0.0  ;;  %v1843_v15 = vadd.f32 %v1559_v59, %v1543_v3 }
 0x108   : > { %v684_v0 = vadd.f32 %v683_v23, %v3098_v37  ;;  %v797_v1 = vadd.f32 %v796_v25, %v3103_v38  ;;  %v1573_v11 = vmax.f32 %v682_v56, 0.0  ;;  %v1575_v16 = vmax.f32 %v795_v60, 0.0 }
 0x109   : > { %v685_v28 = vpop.f32.mrf.mxu0  ;;  %v798_v31 = vpop.f32.mrf.mxu1  ;;  %v1813_v14 = vadd.f32 %v1557_v58, %v1541_v62 }
 0x10a   : > { %v686_v5 = vadd.f32 %v685_v28, %v3086_v33  ;;  %v799_v6 = vadd.f32 %v798_v31, %v3091_v35  ;;  %v1574_v21 = vmax.f32 %v684_v0, 0.0  ;;  %v1576_v22 = vmax.f32 %v797_v1, 0.0 }
 0x10b   : > { %v687_v32 = vpop.f32.mrf.mxu0  ;;  %v800_v34 = vpop.f32.mrf.mxu1  ;;  %v1858_v28 = vadd.f32 %v1560_v4, %v1544_v10  ;;  %v1814_v41 = vadd.f32 %v1813_v14, %v1573_v11  ;;  %v1844_v53 = vadd.f32 %v1843_v15, %v1575_v16 }
 0x10c   : > { %v688_v12 = vadd.f32 %v687_v32, %v3098_v37  ;;  %v801_v17 = vadd.f32 %v800_v34, %v3103_v38  ;;  %v1589_v31 = vmax.f32 %v686_v5, 0.0  ;;  %v1591_v32 = vmax.f32 %v799_v6, 0.0 }
 0x10d   : > { %v691_v36 = vpop.f32.mrf.mxu0  ;;  %2554 = vmatmul.mubr.msk.bf16.gmra.mxu0 %vm612_vm0, %v2878_v42  ;;  %v804_v39 = vpop.f32.mrf.mxu1  ;;  %2562 = vmatmul.mubr.msk.bf16.gmra.mxu1 %vm612_vm0, %v2878_v42  ;;  %v674_v42 = vadd.f32 %v673_v13, %v3098_v37  ;;  %v1859_v59 = vadd.f32 %v1858_v28, %v1576_v22 }
 0x10e   : > { %1377 = vmatprep.mubr.bf16.mxu0 %v2705_v9  ;;  %1490 = vmatprep.mubr.bf16.mxu1 %v2705_v9  ;;  %v692_v23 = vadd.f32 %v691_v36, %v3086_v33  ;;  %v1590_v49 = vmax.f32 %v688_v12, 0.0  ;;  %v1845_v0 = vadd.f32 %v1844_v53, %v1591_v32 }
 0x10f   : > { %v693_v48 = vpop.f32.mrf.mxu0  ;;  %v806_v51 = vpop.f32.mrf.mxu1  ;;  %v1542_v8 = vmax.f32 %v674_v42, 0.0  ;;  %v1592_v42 = vmax.f32 %v801_v17, 0.0 }
 0x110   : > { %v694_v50 = vadd.f32 %v693_v48, %v3098_v37  ;;  %v807_v34 = vadd.f32 %v806_v51, %v3103_v38  ;;  %v1605_v60 = vmax.f32 %v692_v23, 0.0 }
 0x111   : > { %v695_v54 = vpop.f32.mrf.mxu0  ;;  %v808_v57 = vpop.f32.mrf.mxu1  ;;  %v1828_v20 = vadd.f32 %v1558_v63, %v1542_v8  ;;  %v1815_v63 = vadd.f32 %v1814_v41, %v1589_v31 }
 0x112   : > { %v696_v55 = vadd.f32 %v695_v54, %v3086_v33  ;;  %v809_v36 = vadd.f32 %v808_v57, %v3091_v35  ;;  %v1606_v54 = vmax.f32 %v694_v50, 0.0  ;;  %v1608_v4 = vmax.f32 %v807_v34, 0.0 }
 0x113   : > { %v697_v61 = vpop.f32.mrf.mxu0  ;;  %v810_v2 = vpop.f32.mrf.mxu1  ;;  %v1829_v58 = vadd.f32 %v1828_v20, %v1574_v21  ;;  %v1816_v11 = vadd.f32 %v1815_v63, %v1605_v60 }
 0x114   : > { %v811_v48 = vadd.f32 %v810_v2, %v3103_v38  ;;  %v1621_v6 = vmax.f32 %v696_v55, 0.0  ;;  %v1623_v8 = vmax.f32 %v809_v36, 0.0 }
 0x115   : > { %v701_v7 = vpop.f32.mrf.mxu0  ;;  %2555 = vmatmul.mubr.msk.bf16.gmra.mxu0 %vm612_vm0, %v2887_v43  ;;  %v814_v13 = vpop.f32.mrf.mxu1  ;;  %2563 = vmatmul.mubr.msk.bf16.gmra.mxu1 %vm612_vm0, %v2887_v43  ;;  %v805_v43 = vadd.f32 %v804_v39, %v3091_v35  ;;  %v698_v39 = vadd.f32 %v697_v61, %v3098_v37  ;;  %v1830_v3 = vadd.f32 %v1829_v58, %v1590_v49 }
 0x116   : > { %1387 = vmatprep.mubr.bf16.mxu0 %v2705_v9  ;;  %1500 = vmatprep.mubr.bf16.mxu1 %v2705_v9  ;;  %v702_v57 = vadd.f32 %v701_v7, %v3086_v33  ;;  %v1860_v61 = vadd.f32 %v1859_v59, %v1592_v42  ;;  %v815_v2 = vadd.f32 %v814_v13, %v3091_v35  ;;  %v1624_v17 = vmax.f32 %v811_v48, 0.0 }
 0x117   : > { %v703_v18 = vpop.f32.mrf.mxu0  ;;  %v816_v25 = vpop.f32.mrf.mxu1  ;;  %v1607_v1 = vmax.f32 %v805_v43, 0.0  ;;  %v1622_v12 = vmax.f32 %v698_v39, 0.0  ;;  %v1831_v22 = vadd.f32 %v1830_v3, %v1606_v54  ;;  %v1817_v32 = vadd.f32 %v1816_v11, %v1621_v6 }
 0x118   : > { %v704_v14 = vadd.f32 %v703_v18, %v3098_v37  ;;  %v817_v7 = vadd.f32 %v816_v25, %v3103_v38  ;;  %v1861_v23 = vadd.f32 %v1860_v61, %v1608_v4  ;;  %v1637_v13 = vmax.f32 %v702_v57, 0.0 }
 0x119   : > { %v705_v40 = vpop.f32.mrf.mxu0  ;;  %v818_v52 = vpop.f32.mrf.mxu1  ;;  %v1846_v16 = vadd.f32 %v1845_v0, %v1607_v1  ;;  %v1639_v41 = vmax.f32 %v815_v2, 0.0  ;;  %v1832_v49 = vadd.f32 %v1831_v22, %v1622_v12 }
 0x11a   : > { %v819_v20 = vadd.f32 %v818_v52, %v3091_v35  ;;  %v1638_v50 = vmax.f32 %v704_v14, 0.0  ;;  %v1640_v34 = vmax.f32 %v817_v7, 0.0  ;;  %v1862_v52 = vadd.f32 %v1861_v23, %v1624_v17 }
 0x11b   : > { %v707_v56 = vpop.f32.mrf.mxu0  ;;  %v820_v62 = vpop.f32.mrf.mxu1  ;;  %v1847_v43 = vadd.f32 %v1846_v16, %v1623_v8 }
 0x11c   : > { %v708_v28 = vadd.f32 %v707_v56, %v3098_v37  ;;  %v821_v18 = vadd.f32 %v820_v62, %v3103_v38  ;;  %v1655_v55 = vmax.f32 %v819_v20, 0.0  ;;  %v1818_v56 = vadd.f32 %v1817_v32, %v1637_v13 }
 0x11d   : > { %v711_v51 = vpop.f32.mrf.mxu0  ;;  %2556 = vmatmul.mubr.msk.bf16.gmra.mxu0 %vm612_vm0, %v2896_v44  ;;  %v824_v5 = vpop.f32.mrf.mxu1  ;;  %2564 = vmatmul.mubr.msk.bf16.gmra.mxu1 %vm612_vm0, %v2896_v44  ;;  %v706_v44 = vadd.f32 %v705_v40, %v3086_v33  ;;  %v1848_v63 = vadd.f32 %v1847_v43, %v1639_v41  ;;  %v1833_v3 = vadd.f32 %v1832_v49, %v1638_v50 }
 0x11e   : > { %1397 = vmatprep.mubr.bf16.mxu0 %v2705_v9  ;;  %1510 = vmatprep.mubr.bf16.mxu1 %v2705_v9  ;;  %v712_v40 = vadd.f32 %v711_v51, %v3086_v33  ;;  %v825_v36 = vadd.f32 %v824_v5, %v3091_v35  ;;  %v1654_v59 = vmax.f32 %v708_v28, 0.0  ;;  %v1656_v0 = vmax.f32 %v821_v18, 0.0 }
 0x11f   : > { %v713_v10 = vpop.f32.mrf.mxu0  ;;  %v826_v15 = vpop.f32.mrf.mxu1  ;;  %v1653_v42 = vmax.f32 %v706_v44, 0.0  ;;  %v1863_v54 = vadd.f32 %v1862_v52, %v1640_v34  ;;  %v1849_v6 = vadd.f32 %v1848_v63, %v1655_v55 }
 0x120   : > { %v714_v60 = vadd.f32 %v713_v10, %v3098_v37  ;;  %v827_v39 = vadd.f32 %v826_v15, %v3103_v38  ;;  %v1669_v4 = vmax.f32 %v712_v40, 0.0  ;;  %v1834_v10 = vadd.f32 %v1833_v3, %v1654_v59 }
 0x121   : > { %v715_v21 = vpop.f32.mrf.mxu0  ;;  %v828_v31 = vpop.f32.mrf.mxu1  ;;  %v1819_v61 = vadd.f32 %v1818_v56, %v1653_v42  ;;  %v1864_v15 = vadd.f32 %v1863_v54, %v1656_v0 }
 0x122   : > { %v716_v1 = vadd.f32 %v715_v21, %v3086_v33  ;;  %v829_v48 = vadd.f32 %v828_v31, %v3091_v35  ;;  %v1670_v11 = vmax.f32 %v714_v60, 0.0  ;;  %v1672_v12 = vmax.f32 %v827_v39, 0.0 }
 0x123   : > { %v717_v25 = vpop.f32.mrf.mxu0  ;;  %v830_v53 = vpop.f32.mrf.mxu1  ;;  %v1820_v21 = vadd.f32 %v1819_v61, %v1669_v4 }
 0x124   : > { %v718_v57 = vadd.f32 %v717_v25, %v3098_v37  ;;  %v831_v8 = vadd.f32 %v830_v53, %v3103_v38  ;;  %v1685_v16 = vmax.f32 %v716_v1, 0.0  ;;  %v1687_v17 = vmax.f32 %v829_v48, 0.0 }
 0x125   : > { %v721_v58 = vpop.f32.mrf.mxu0  ;;  %2557 = vmatmul.mubr.msk.bf16.gmra.mxu0 %vm612_vm0, %v2905_v45  ;;  %v834_v62 = vpop.f32.mrf.mxu1  ;;  %2565 = vmatmul.mubr.msk.bf16.gmra.mxu1 %vm612_vm0, %v2905_v45  ;;  %v1671_v45 = vmax.f32 %v825_v36, 0.0  ;;  %v1835_v25 = vadd.f32 %v1834_v10, %v1670_v11  ;;  %v1865_v49 = vadd.f32 %v1864_v15, %v1672_v12 }
 0x126   : > { %1407 = vmatprep.mubr.bf16.mxu0 %v2705_v9  ;;  %1520 = vmatprep.mubr.bf16.mxu1 %v2705_v9  ;;  %v722_v14 = vadd.f32 %v721_v58, %v3086_v33  ;;  %v835_v44 = vadd.f32 %v834_v62, %v3091_v35  ;;  %v1686_v22 = vmax.f32 %v718_v57, 0.0  ;;  %v1688_v32 = vmax.f32 %v831_v8, 0.0 }
 0x127   : > { %v723_v51 = vpop.f32.mrf.mxu0  ;;  %v836_v5 = vpop.f32.mrf.mxu1  ;;  %v1850_v31 = vadd.f32 %v1849_v6, %v1671_v45  ;;  %v1821_v53 = vadd.f32 %v1820_v21, %v1685_v16 }
 0x128   : > { %v724_v23 = vadd.f32 %v723_v51, %v3098_v37  ;;  %v837_v13 = vadd.f32 %v836_v5, %v3103_v38  ;;  %v1701_v50 = vmax.f32 %v722_v14, 0.0  ;;  %v1703_v42 = vmax.f32 %v835_v44, 0.0 }
 0x129   : > { %v725_v2 = vpop.f32.mrf.mxu0  ;;  %v838_v7 = vpop.f32.mrf.mxu1  ;;  %v1851_v52 = vadd.f32 %v1850_v31, %v1687_v17  ;;  %v1836_v58 = vadd.f32 %v1835_v25, %v1686_v22  ;;  %v1866_v62 = vadd.f32 %v1865_v49, %v1688_v32 }
 0x12a   : > { %v726_v43 = vadd.f32 %v725_v2, %v3086_v33  ;;  %v839_v41 = vadd.f32 %v838_v7, %v3091_v35  ;;  %v1702_v56 = vmax.f32 %v724_v23, 0.0  ;;  %v1704_v59 = vmax.f32 %v837_v13, 0.0 }
 0x12b   : > { %v727_v20 = vpop.f32.mrf.mxu0  ;;  %v840_v28 = vpop.f32.mrf.mxu1  ;;  %v1822_v48 = vadd.f32 %v1821_v53, %v1701_v50 }
 0x12c   : > { %v728_v34 = vadd.f32 %v727_v20, %v3098_v37  ;;  %v841_v55 = vadd.f32 %v840_v28, %v3103_v38  ;;  %v1717_v63 = vmax.f32 %v726_v43, 0.0  ;;  %v1719_v0 = vmax.f32 %v839_v41, 0.0 }
 0x12d   : > { %v731_v18 = vpop.f32.mrf.mxu0  ;;  %2558 = vmatmul.mubr.msk.bf16.gmra.mxu0 %vm612_vm0, %v2914_v46  ;;  %v844_v40 = vpop.f32.mrf.mxu1  ;;  %2566 = vmatmul.mubr.msk.bf16.gmra.mxu1 %vm612_vm0, %v2914_v46  ;;  %v1837_v45 = vadd.f32 %v1836_v58, %v1702_v56  ;;  %v1867_v8 = vadd.f32 %v1866_v62, %v1704_v59 }
 0x12e   : > { %1417 = vmatprep.mubr.bf16.mxu0 %v2705_v9  ;;  %1530 = vmatprep.mubr.bf16.mxu1 %v2705_v9  ;;  %v732_v60 = vadd.f32 %v731_v18, %v3086_v33  ;;  %v845_v46 = vadd.f32 %v844_v40, %v3091_v35  ;;  %v1718_v51 = vmax.f32 %v728_v34, 0.0  ;;  %v1852_v9 = vadd.f32 %v1851_v52, %v1703_v42 }
 0x12f   : > { %v733_v36 = vpop.f32.mrf.mxu0  ;;  %v846_v39 = vpop.f32.mrf.mxu1  ;;  %v1720_v57 = vmax.f32 %v841_v55, 0.0  ;;  %v1823_v12 = vadd.f32 %v1822_v48, %v1717_v63 }
 0x130   : > { %v734_v3 = vadd.f32 %v733_v36, %v3098_v37  ;;  %v847_v5 = vadd.f32 %v846_v39, %v3103_v38  ;;  %v1733_v2 = vmax.f32 %v732_v60, 0.0  ;;  %v1853_v14 = vadd.f32 %v1852_v9, %v1719_v0 }
 0x131   : > { %v735_v1 = vpop.f32.mrf.mxu0  ;;  %v848_v4 = vpop.f32.mrf.mxu1  ;;  %v1735_v7 = vmax.f32 %v845_v46, 0.0  ;;  %v1838_v17 = vadd.f32 %v1837_v45, %v1718_v51  ;;  %v1868_v23 = vadd.f32 %v1867_v8, %v1720_v57 }
 0x132   : > { %v736_v54 = vadd.f32 %v735_v1, %v3086_v33  ;;  %v849_v61 = vadd.f32 %v848_v4, %v3091_v35  ;;  %v1734_v44 = vmax.f32 %v734_v3, 0.0  ;;  %v1736_v13 = vmax.f32 %v847_v5, 0.0 }
 0x133   : > { %v737_v6 = vpop.f32.mrf.mxu0  ;;  %v850_v11 = vpop.f32.mrf.mxu1  ;;  %v1824_v43 = vadd.f32 %v1823_v12, %v1733_v2  ;;  %v1854_v50 = vadd.f32 %v1853_v14, %v1735_v7  ;;  %v1798_v2 = vld [vmem:[#allocation2] sm:$0xff]  ;;  %v1800_v14 = vld [vmem:[#allocation2 + $0x18] sm:$0xff] }
 0x134   : > { %v738_v10 = vadd.f32 %v737_v6, %v3098_v37  ;;  %v851_v15 = vadd.f32 %v850_v11, %v3103_v38  ;;  %v1749_v20 = vmax.f32 %v736_v54, 0.0  ;;  %v1751_v28 = vmax.f32 %v849_v61, 0.0  ;;  %v1797_v54 = vld [vmem:[#allocation2 + $0x30] sm:$0xff]  ;;  %v1799_v61 = vld [vmem:[#allocation2 + $0x58] sm:$0xff] }
 0x135   : > { %v741_v16 = vpop.f32.mrf.mxu0  ;;  %2559 = vmatmul.mubr.msk.bf16.gmra.mxu0 %vm612_vm0, %v2923_v47  ;;  %v854_v22 = vpop.f32.mrf.mxu1  ;;  %2567 = vmatmul.mubr.msk.bf16.gmra.mxu1 %vm612_vm0, %v2923_v47  ;;  %v1839_v42 = vadd.f32 %v1838_v17, %v1734_v44  ;;  %v1869_v56 = vadd.f32 %v1868_v23, %v1736_v13 }
 0x136   : > { %v742_v21 = vadd.f32 %v741_v16, %v3086_v33  ;;  %v855_v31 = vadd.f32 %v854_v22, %v3091_v35  ;;  %v1750_v41 = vmax.f32 %v738_v10, 0.0  ;;  %v1752_v34 = vmax.f32 %v851_v15, 0.0 }
 0x137   : > { %v743_v32 = vpop.f32.mrf.mxu0  ;;  %v856_v49 = vpop.f32.mrf.mxu1  ;;  %v1825_v47 = vadd.f32 %v1824_v43, %v1749_v20  ;;  %v1855_v59 = vadd.f32 %v1854_v50, %v1751_v28  ;;  %v358_v43 = vsub.s32 6, %v3069_v19 }
 0x138   : > { %v1765_v18 = vmax.f32 %v742_v21, 0.0  ;;  %v744_v25 = vadd.f32 %v743_v32, %v3098_v37  ;;  %v1767_v40 = vmax.f32 %v855_v31, 0.0  ;;  %v857_v53 = vadd.f32 %v856_v49, %v3103_v38 }
 0x139   : > { %v745_v52 = vpop.f32.mrf.mxu0  ;;  %v858_v58 = vpop.f32.mrf.mxu1  ;;  %v1840_v63 = vadd.f32 %v1839_v42, %v1750_v41  ;;  %v1870_v51 = vadd.f32 %v1869_v56, %v1752_v34  ;;  %v350_v31 = vsub.s32 4, %v3069_v19 }
 0x13a   : > { %v1766_v55 = vmax.f32 %v744_v25, 0.0  ;;  %v746_v36 = vadd.f32 %v745_v52, %v3086_v33  ;;  %v1768_v60 = vmax.f32 %v857_v53, 0.0  ;;  %v859_v39 = vadd.f32 %v858_v58, %v3091_v35 }
 0x13b   : > { %v747_v62 = vpop.f32.mrf.mxu0  ;;  %v1826_v0 = vadd.f32 %v1825_v47, %v1765_v18  ;;  %v860_v48 = vpop.f32.mrf.mxu1  ;;  %v1856_v3 = vadd.f32 %v1855_v59, %v1767_v40  ;;  %v354_v18 = vsub.s32 5, %v3069_v19  ;;  %v362_v25 = vsub.s32 7, %v3069_v19 }
 0x13c   : > { %v1781_v46 = vmax.f32 %v746_v36, 0.0  ;;  %v748_v1 = vadd.f32 %v747_v62, %v3098_v37  ;;  %v1783_v4 = vmax.f32 %v859_v39, 0.0  ;;  %v861_v9 = vadd.f32 %v860_v48, %v3103_v38 }
 0x13d   : > { %v897_v33 = vpop.f32.mrf.mxu0  ;;  %v1841_v57 = vadd.f32 %v1840_v63, %v1766_v55  ;;  %v1010_v45 = vpop.f32.mrf.mxu1  ;;  %v1871_v35 = vadd.f32 %v1870_v51, %v1768_v60  ;;  %v3208_v34 = vrot.slane %v3078_v26, %v350_v31  ;;  %v3213_v53 = vrot.slane %v3078_v26, %v358_v43 }
 0x13e   : > { %v1827_v5 = vadd.f32 %v1826_v0, %v1781_v46  ;;  %v1782_v6 = vmax.f32 %v748_v1, 0.0  ;;  %v1857_v8 = vadd.f32 %v1856_v3, %v1783_v4  ;;  %v1784_v10 = vmax.f32 %v861_v9, 0.0 }
 0x13f   : > { %v899_v11 = vpop.f32.mrf.mxu0  ;;  %v1012_v7 = vpop.f32.mrf.mxu1  ;;  %v3218_v42 = vrot.slane %v3078_v26, %v354_v18  ;;  %v3223_v47 = vrot.slane %v3078_v26, %v362_v25  ;;  %v898_v59 = vadd.f32 %v897_v33, %v3208_v34  ;;  %v1011_v62 = vadd.f32 %v1010_v45, %v3213_v53 }
 0x140   : > { %v2053_v12 = vadd.f32 %v1827_v5, %v1797_v54  ;;  %v1842_v37 = vadd.f32 %v1841_v57, %v1782_v6  ;;  %v2055_v15 = vadd.f32 %v1857_v8, %v1799_v61  ;;  %v1872_v16 = vadd.f32 %v1871_v35, %v1784_v10 }
 0x141   : > { %v901_v17 = vpop.f32.mrf.mxu0  ;;  %v1014_v44 = vpop.f32.mrf.mxu1  ;;  %v900_v46 = vadd.f32 %v899_v11, %v3218_v42  ;;  %v1013_v26 = vadd.f32 %v1012_v7, %v3223_v47  ;;  %v1545_v9 = vmax.f32 %v898_v59, 0.0  ;;  %v1547_v6 = vmax.f32 %v1011_v62, 0.0 }
 0x142   : > { %2069 = vst [vmem:[#allocation2 + $0x30] sm:$0xff] %v2053_v12  ;;  %v2054_v38 = vadd.f32 %v1842_v37, %v1798_v2  ;;  %2071 = vst [vmem:[#allocation2 + $0x58] sm:$0xff] %v2055_v15  ;;  %v2056_v20 = vadd.f32 %v1872_v16, %v1800_v14  ;;  %v902_v36 = vadd.f32 %v901_v17, %v3208_v34 }
 0x143   : > { %v903_v21 = vpop.f32.mrf.mxu0  ;;  %v1016_v22 = vpop.f32.mrf.mxu1  ;;  %v1015_v58 = vadd.f32 %v1014_v44, %v3213_v53  ;;  %v1546_v10 = vmax.f32 %v900_v46, 0.0  ;;  %v1548_v11 = vmax.f32 %v1013_v26, 0.0 }
 0x144   : > { %2070 = vst [vmem:[#allocation2] sm:$0xff] %v2054_v38  ;;  %2072 = vst [vmem:[#allocation2 + $0x18] sm:$0xff] %v2056_v20  ;;  %v904_v60 = vadd.f32 %v903_v21, %v3218_v42  ;;  %v1017_v63 = vadd.f32 %v1016_v22, %v3223_v47  ;;  %v1561_v51 = vmax.f32 %v902_v36, 0.0 }
 0x145   : > { %v907_v23 = vpop.f32.mrf.mxu0  ;;  %v1020_v13 = vpop.f32.mrf.mxu1  ;;  %v1563_v3 = vmax.f32 %v1015_v58, 0.0 }
 0x146   : > { %v908_v1 = vadd.f32 %v907_v23, %v3208_v34  ;;  %v1021_v54 = vadd.f32 %v1020_v13, %v3213_v53  ;;  %v1562_v33 = vmax.f32 %v904_v60, 0.0  ;;  %v1564_v45 = vmax.f32 %v1017_v63, 0.0 }
 0x147   : > { %v909_v28 = vpop.f32.mrf.mxu0  ;;  %v1022_v32 = vpop.f32.mrf.mxu1  ;;  %v1873_v7 = vadd.f32 %v1561_v51, %v1545_v9  ;;  %v1903_v15 = vadd.f32 %v1563_v3, %v1547_v6 }
 0x148   : > { %v910_v57 = vadd.f32 %v909_v28, %v3218_v42  ;;  %v1023_v5 = vadd.f32 %v1022_v32, %v3223_v47  ;;  %v1577_v12 = vmax.f32 %v908_v1, 0.0  ;;  %v1579_v16 = vmax.f32 %v1021_v54, 0.0 }
 0x149   : > { %v911_v41 = vpop.f32.mrf.mxu0  ;;  %v1024_v49 = vpop.f32.mrf.mxu1  ;;  %v1888_v44 = vadd.f32 %v1562_v33, %v1546_v10  ;;  %v1918_v13 = vadd.f32 %v1564_v45, %v1548_v11 }
 0x14a   : > { %v912_v35 = vadd.f32 %v911_v41, %v3208_v34  ;;  %v1025_v8 = vadd.f32 %v1024_v49, %v3213_v53  ;;  %v1578_v20 = vmax.f32 %v910_v57, 0.0  ;;  %v1580_v21 = vmax.f32 %v1023_v5, 0.0 }
 0x14b   : > { %v913_v50 = vpop.f32.mrf.mxu0  ;;  %v1026_v40 = vpop.f32.mrf.mxu1  ;;  %v1904_v60 = vadd.f32 %v1903_v15, %v1579_v16 }
 0x14c   : > { %v914_v37 = vadd.f32 %v913_v50, %v3218_v42  ;;  %v1027_v17 = vadd.f32 %v1026_v40, %v3223_v47  ;;  %v1593_v28 = vmax.f32 %v912_v35, 0.0  ;;  %v1595_v32 = vmax.f32 %v1025_v8, 0.0 }
 0x14d   : > { %v917_v52 = vpop.f32.mrf.mxu0  ;;  %v1030_v55 = vpop.f32.mrf.mxu1  ;;  %v1874_v50 = vadd.f32 %v1873_v7, %v1577_v12  ;;  %v1889_v26 = vadd.f32 %v1888_v44, %v1578_v20  ;;  %v1919_v1 = vadd.f32 %v1918_v13, %v1580_v21 }
 0x14e   : > { %v918_v22 = vadd.f32 %v917_v52, %v3208_v34  ;;  %v1031_v41 = vadd.f32 %v1030_v55, %v3213_v53  ;;  %v1594_v36 = vmax.f32 %v914_v37, 0.0  ;;  %v1596_v62 = vmax.f32 %v1027_v17, 0.0 }
 0x14f   : > { %v919_v56 = vpop.f32.mrf.mxu0  ;;  %v1032_v39 = vpop.f32.mrf.mxu1  ;;  %v1875_v54 = vadd.f32 %v1874_v50, %v1593_v28  ;;  %v1905_v9 = vadd.f32 %v1904_v60, %v1595_v32 }
 0x150   : > { %v920_v58 = vadd.f32 %v919_v56, %v3218_v42  ;;  %v1033_v59 = vadd.f32 %v1032_v39, %v3223_v47  ;;  %v1609_v51 = vmax.f32 %v918_v22, 0.0  ;;  %v1611_v33 = vmax.f32 %v1031_v41, 0.0 }
 0x151   : > { %v921_v0 = vpop.f32.mrf.mxu0  ;;  %v1034_v48 = vpop.f32.mrf.mxu1  ;;  %v1890_v57 = vadd.f32 %v1889_v26, %v1594_v36 }
 0x152   : > { %v922_v63 = vadd.f32 %v921_v0, %v3208_v34  ;;  %v1035_v52 = vadd.f32 %v1034_v48, %v3213_v53  ;;  %v1610_v5 = vmax.f32 %v920_v58, 0.0  ;;  %v1612_v6 = vmax.f32 %v1033_v59, 0.0 }
 0x153   : > { %v923_v4 = vpop.f32.mrf.mxu0  ;;  %v1036_v61 = vpop.f32.mrf.mxu1  ;;  %v1920_v48 = vadd.f32 %v1919_v1, %v1596_v62  ;;  %v1906_v15 = vadd.f32 %v1905_v9, %v1611_v33 }
 0x154   : > { %v924_v55 = vadd.f32 %v923_v4, %v3218_v42  ;;  %v1037_v56 = vadd.f32 %v1036_v61, %v3223_v47  ;;  %v1625_v35 = vmax.f32 %v922_v63, 0.0  ;;  %v1627_v8 = vmax.f32 %v1035_v52, 0.0 }
 0x155   : > { %v927_v2 = vpop.f32.mrf.mxu0  ;;  %v1040_v14 = vpop.f32.mrf.mxu1  ;;  %v1876_v4 = vadd.f32 %v1875_v54, %v1609_v51  ;;  %v1891_v20 = vadd.f32 %v1890_v57, %v1610_v5  ;;  %v1921_v21 = vadd.f32 %v1920_v48, %v1612_v6 }
 0x156   : > { %v928_v0 = vadd.f32 %v927_v2, %v3208_v34  ;;  %v1041_v10 = vadd.f32 %v1040_v14, %v3213_v53  ;;  %v1626_v12 = vmax.f32 %v924_v55, 0.0  ;;  %v1628_v16 = vmax.f32 %v1037_v56, 0.0 }
 0x157   : > { %v929_v38 = vpop.f32.mrf.mxu0  ;;  %v1042_v23 = vpop.f32.mrf.mxu1  ;;  %v1877_v28 = vadd.f32 %v1876_v4, %v1625_v35  ;;  %v1907_v32 = vadd.f32 %v1906_v15, %v1627_v8 }
 0x158   : > { %v930_v37 = vadd.f32 %v929_v38, %v3218_v42  ;;  %v1043_v7 = vadd.f32 %v1042_v23, %v3223_v47  ;;  %v1641_v22 = vmax.f32 %v928_v0, 0.0  ;;  %v1643_v41 = vmax.f32 %v1041_v10, 0.0 }
 0x159   : > { %v931_v49 = vpop.f32.mrf.mxu0  ;;  %v1044_v40 = vpop.f32.mrf.mxu1  ;;  %v1892_v50 = vadd.f32 %v1891_v20, %v1626_v12 }
 0x15a   : > { %v932_v17 = vadd.f32 %v931_v49, %v3208_v34  ;;  %v1045_v2 = vadd.f32 %v1044_v40, %v3213_v53  ;;  %v1642_v36 = vmax.f32 %v930_v37, 0.0  ;;  %v1644_v58 = vmax.f32 %v1043_v7, 0.0 }
 0x15b   : > { %v933_v46 = vpop.f32.mrf.mxu0  ;;  %v1046_v3 = vpop.f32.mrf.mxu1  ;;  %v1922_v40 = vadd.f32 %v1921_v21, %v1628_v16 }
 0x15c   : > { %v934_v14 = vadd.f32 %v933_v46, %v3218_v42  ;;  %v1047_v38 = vadd.f32 %v1046_v3, %v3223_v47  ;;  %v1657_v60 = vmax.f32 %v932_v17, 0.0  ;;  %v1659_v62 = vmax.f32 %v1045_v2, 0.0 }
 0x15d   : > { %v937_v39 = vpop.f32.mrf.mxu0  ;;  %v1050_v45 = vpop.f32.mrf.mxu1  ;;  %v1878_v46 = vadd.f32 %v1877_v28, %v1641_v22  ;;  %v1908_v3 = vadd.f32 %v1907_v32, %v1643_v41  ;;  %v1923_v57 = vadd.f32 %v1922_v40, %v1644_v58 }
 0x15e   : > { %v938_v49 = vadd.f32 %v937_v39, %v3208_v34  ;;  %v1051_v63 = vadd.f32 %v1050_v45, %v3213_v53  ;;  %v1658_v26 = vmax.f32 %v934_v14, 0.0  ;;  %v1660_v54 = vmax.f32 %v1047_v38, 0.0 }
 0x15f   : > { %v939_v11 = vpop.f32.mrf.mxu0  ;;  %v1052_v61 = vpop.f32.mrf.mxu1  ;;  %v1893_v39 = vadd.f32 %v1892_v50, %v1642_v36  ;;  %v1879_v45 = vadd.f32 %v1878_v46, %v1657_v60  ;;  %v1909_v48 = vadd.f32 %v1908_v3, %v1659_v62 }
 0x160   : > { %v940_v1 = vadd.f32 %v939_v11, %v3218_v42  ;;  %v1053_v51 = vadd.f32 %v1052_v61, %v3223_v47  ;;  %v1673_v5 = vmax.f32 %v938_v49, 0.0  ;;  %v1675_v35 = vmax.f32 %v1051_v63, 0.0 }
 0x161   : > { %v941_v44 = vpop.f32.mrf.mxu0  ;;  %v1054_v13 = vpop.f32.mrf.mxu1  ;;  %v1894_v11 = vadd.f32 %v1893_v39, %v1658_v26  ;;  %v1924_v61 = vadd.f32 %v1923_v57, %v1660_v54 }
 0x162   : > { %v942_v9 = vadd.f32 %v941_v44, %v3208_v34  ;;  %v1055_v33 = vadd.f32 %v1054_v13, %v3213_v53  ;;  %v1674_v4 = vmax.f32 %v940_v1, 0.0  ;;  %v1676_v12 = vmax.f32 %v1053_v51, 0.0 }
 0x163   : > { %v943_v23 = vpop.f32.mrf.mxu0  ;;  %v1056_v59 = vpop.f32.mrf.mxu1  ;;  %v1880_v44 = vadd.f32 %v1879_v45, %v1673_v5  ;;  %v1910_v13 = vadd.f32 %v1909_v48, %v1675_v35 }
 0x164   : > { %v944_v6 = vadd.f32 %v943_v23, %v3218_v42  ;;  %v1057_v8 = vadd.f32 %v1056_v59, %v3223_v47  ;;  %v1689_v15 = vmax.f32 %v942_v9, 0.0  ;;  %v1691_v16 = vmax.f32 %v1055_v33, 0.0 }
 0x165   : > { %v947_v52 = vpop.f32.mrf.mxu0  ;;  %v1060_v55 = vpop.f32.mrf.mxu1  ;;  %v1895_v23 = vadd.f32 %v1894_v11, %v1674_v4  ;;  %v1925_v50 = vadd.f32 %v1924_v61, %v1676_v12 }
 0x166   : > { %v948_v37 = vadd.f32 %v947_v52, %v3208_v34  ;;  %v1061_v17 = vadd.f32 %v1060_v55, %v3213_v53  ;;  %v1690_v20 = vmax.f32 %v944_v6, 0.0  ;;  %v1692_v28 = vmax.f32 %v1057_v8, 0.0 }
 0x167   : > { %v949_v56 = vpop.f32.mrf.mxu0  ;;  %v1062_v0 = vpop.f32.mrf.mxu1  ;;  %v1881_v59 = vadd.f32 %v1880_v44, %v1689_v15  ;;  %v1911_v40 = vadd.f32 %v1910_v13, %v1691_v16 }
 0x168   : > { %v950_v21 = vadd.f32 %v949_v56, %v3218_v42  ;;  %v1063_v22 = vadd.f32 %v1062_v0, %v3223_v47  ;;  %v1705_v36 = vmax.f32 %v948_v37, 0.0  ;;  %v1707_v60 = vmax.f32 %v1061_v17, 0.0 }
 0x169   : > { %v951_v10 = vpop.f32.mrf.mxu0  ;;  %v1064_v7 = vpop.f32.mrf.mxu1  ;;  %v1896_v52 = vadd.f32 %v1895_v23, %v1690_v20  ;;  %v1926_v55 = vadd.f32 %v1925_v50, %v1692_v28 }
 0x16a   : > { %v952_v32 = vadd.f32 %v951_v10, %v3208_v34  ;;  %v1065_v41 = vadd.f32 %v1064_v7, %v3213_v53  ;;  %v1706_v46 = vmax.f32 %v950_v21, 0.0  ;;  %v1708_v26 = vmax.f32 %v1063_v22, 0.0 }
 0x16b   : > { %v953_v2 = vpop.f32.mrf.mxu0  ;;  %v1066_v14 = vpop.f32.mrf.mxu1  ;;  %v1882_v56 = vadd.f32 %v1881_v59, %v1705_v36  ;;  %v1912_v0 = vadd.f32 %v1911_v40, %v1707_v60 }
 0x16c   : > { %v954_v58 = vadd.f32 %v953_v2, %v3218_v42  ;;  %v1067_v62 = vadd.f32 %v1066_v14, %v3223_v47  ;;  %v1721_v3 = vmax.f32 %v952_v32, 0.0  ;;  %v1723_v54 = vmax.f32 %v1065_v41, 0.0 }
 0x16d   : > { %v957_v38 = vpop.f32.mrf.mxu0  ;;  %v1070_v49 = vpop.f32.mrf.mxu1  ;;  %v1897_v10 = vadd.f32 %v1896_v52, %v1706_v46  ;;  %v1927_v11 = vadd.f32 %v1926_v55, %v1708_v26 }
 0x16e   : > { %v958_v1 = vadd.f32 %v957_v38, %v3208_v34  ;;  %v1071_v9 = vadd.f32 %v1070_v49, %v3213_v53  ;;  %v1722_v39 = vmax.f32 %v954_v58, 0.0  ;;  %v1724_v45 = vmax.f32 %v1067_v62, 0.0 }
 0x16f   : > { %v959_v63 = vpop.f32.mrf.mxu0  ;;  %v1072_v51 = vpop.f32.mrf.mxu1  ;;  %v1883_v7 = vadd.f32 %v1882_v56, %v1721_v3  ;;  %v1913_v61 = vadd.f32 %v1912_v0, %v1723_v54 }
 0x170   : > { %v960_v57 = vadd.f32 %v959_v63, %v3218_v42  ;;  %v1073_v48 = vadd.f32 %v1072_v51, %v3223_v47  ;;  %v1737_v4 = vmax.f32 %v958_v1, 0.0  ;;  %v1739_v15 = vmax.f32 %v1071_v9, 0.0 }
 0x171   : > { %v961_v33 = vpop.f32.mrf.mxu0  ;;  %v1074_v6 = vpop.f32.mrf.mxu1  ;;  %v1898_v2 = vadd.f32 %v1897_v10, %v1722_v39  ;;  %v1928_v14 = vadd.f32 %v1927_v11, %v1724_v45  ;;  %v1801_v45 = vld [vmem:[#allocation2 + $0x50] sm:$0xff]  ;;  %v1803_v11 = vld [vmem:[#allocation2 + $0x8] sm:$0xff] }
 0x172   : > { %v962_v5 = vadd.f32 %v961_v33, %v3208_v34  ;;  %v1075_v35 = vadd.f32 %v1074_v6, %v3213_v53  ;;  %v1738_v44 = vmax.f32 %v960_v57, 0.0  ;;  %v1740_v13 = vmax.f32 %v1073_v48, 0.0 }
 0x173   : > { %v963_v8 = vpop.f32.mrf.mxu0  ;;  %v1076_v37 = vpop.f32.mrf.mxu1  ;;  %v1884_v38 = vadd.f32 %v1883_v7, %v1737_v4  ;;  %v1914_v49 = vadd.f32 %v1913_v61, %v1739_v15  ;;  %v1802_v7 = vld [vmem:[#allocation2 + $0x68] sm:$0xff] }
 0x174   : > { %v964_v12 = vadd.f32 %v963_v8, %v3218_v42  ;;  %v1077_v16 = vadd.f32 %v1076_v37, %v3223_v47  ;;  %v1753_v20 = vmax.f32 %v962_v5, 0.0  ;;  %v1755_v28 = vmax.f32 %v1075_v35, 0.0 }
 0x175   : > { %v967_v17 = vpop.f32.mrf.mxu0  ;;  %v1080_v22 = vpop.f32.mrf.mxu1  ;;  %v1899_v63 = vadd.f32 %v1898_v2, %v1738_v44  ;;  %v1929_v51 = vadd.f32 %v1928_v14, %v1740_v13 }
 0x176   : > { %v968_v21 = vadd.f32 %v967_v17, %v3208_v34  ;;  %v1081_v32 = vadd.f32 %v1080_v22, %v3213_v53  ;;  %v1754_v23 = vmax.f32 %v964_v12, 0.0  ;;  %v1756_v59 = vmax.f32 %v1077_v16, 0.0  ;;  %v1804_v17 = vld [vmem:[#allocation2 + $0x48] sm:$0xff] }
 0x177   : > { %v969_v41 = vpop.f32.mrf.mxu0  ;;  %v1082_v58 = vpop.f32.mrf.mxu1  ;;  %v1885_v52 = vadd.f32 %v1884_v38, %v1753_v20  ;;  %v1915_v55 = vadd.f32 %v1914_v49, %v1755_v28 }
 0x178   : > { %v1769_v50 = vmax.f32 %v968_v21, 0.0  ;;  %v970_v36 = vadd.f32 %v969_v41, %v3218_v42  ;;  %v1771_v40 = vmax.f32 %v1081_v32, 0.0  ;;  %v1083_v60 = vadd.f32 %v1082_v58, %v3223_v47 }
 0x179   : > { %v971_v62 = vpop.f32.mrf.mxu0  ;;  %v1084_v1 = vpop.f32.mrf.mxu1  ;;  %v1900_v33 = vadd.f32 %v1899_v63, %v1754_v23  ;;  %v1930_v6 = vadd.f32 %v1929_v51, %v1756_v59 }
 0x17a   : > { %v1770_v46 = vmax.f32 %v970_v36, 0.0  ;;  %v972_v26 = vadd.f32 %v971_v62, %v3208_v34  ;;  %v1772_v3 = vmax.f32 %v1083_v60, 0.0  ;;  %v1085_v54 = vadd.f32 %v1084_v1, %v3213_v53 }
 0x17b   : > { %v973_v9 = vpop.f32.mrf.mxu0  ;;  %v1886_v56 = vadd.f32 %v1885_v52, %v1769_v50  ;;  %v1086_v5 = vpop.f32.mrf.mxu1  ;;  %v1916_v0 = vadd.f32 %v1915_v55, %v1771_v40  ;;  %v3289_v50 = vld [vmem:[#allocation3 + $0x8] sm:$0xff] }
 0x17c   : > { %v1785_v39 = vmax.f32 %v972_v26, 0.0  ;;  %v974_v57 = vadd.f32 %v973_v9, %v3218_v42  ;;  %v1787_v48 = vmax.f32 %v1085_v54, 0.0  ;;  %v1087_v35 = vadd.f32 %v1086_v5, %v3223_v47 }
 0x17d   : > { %v1123_v34 = vpop.f32.mrf.mxu0  ;;  %v1901_v8 = vadd.f32 %v1900_v33, %v1770_v46  ;;  %v1236_v12 = vpop.f32.mrf.mxu1  ;;  %v1931_v53 = vadd.f32 %v1930_v6, %v1772_v3  ;;  %v3294_v59 = vrot.slane %v3289_v50, %v334_v24  ;;  %v3299_v60 = vrot.slane %v3289_v50, %v342_v27 }
 0x17e   : > { %v1887_v10 = vadd.f32 %v1886_v56, %v1785_v39  ;;  %v1786_v4 = vmax.f32 %v974_v57, 0.0  ;;  %v1917_v37 = vadd.f32 %v1916_v0, %v1787_v48  ;;  %v1788_v61 = vmax.f32 %v1087_v35, 0.0 }
 0x17f   : > { %v1125_v15 = vpop.f32.mrf.mxu0  ;;  %v1238_v2 = vpop.f32.mrf.mxu1  ;;  %v3304_v63 = vrot.slane %v3289_v50, %v338_v29  ;;  %v3309_v52 = vrot.slane %v3289_v50, %v346_v30  ;;  %v1124_v27 = vadd.f32 %v1123_v34, %v3294_v59  ;;  %v1237_v3 = vadd.f32 %v1236_v12, %v3299_v60 }
 0x180   : > { %v2057_v16 = vadd.f32 %v1887_v10, %v1801_v45  ;;  %v1902_v42 = vadd.f32 %v1901_v8, %v1786_v4  ;;  %v2059_v44 = vadd.f32 %v1917_v37, %v1803_v11  ;;  %v1932_v20 = vadd.f32 %v1931_v53, %v1788_v61 }
 0x181   : > { %v1127_v21 = vpop.f32.mrf.mxu0  ;;  %v1240_v22 = vpop.f32.mrf.mxu1  ;;  %v1126_v9 = vadd.f32 %v1125_v15, %v3304_v63  ;;  %v1239_v30 = vadd.f32 %v1238_v2, %v3309_v52  ;;  %v1549_v0 = vmax.f32 %v1124_v27, 0.0  ;;  %v1551_v8 = vmax.f32 %v1237_v3, 0.0 }
 0x182   : > { %2073 = vst [vmem:[#allocation2 + $0x50] sm:$0xff] %v2057_v16  ;;  %v2058_v47 = vadd.f32 %v1902_v42, %v1802_v7  ;;  %2075 = vst [vmem:[#allocation2 + $0x8] sm:$0xff] %v2059_v44  ;;  %v2060_v14 = vadd.f32 %v1932_v20, %v1804_v17  ;;  %v1128_v24 = vadd.f32 %v1127_v21, %v3294_v59 }
 0x183   : > { %v1129_v13 = vpop.f32.mrf.mxu0  ;;  %v1242_v28 = vpop.f32.mrf.mxu1  ;;  %v1241_v26 = vadd.f32 %v1240_v22, %v3299_v60  ;;  %v1550_v53 = vmax.f32 %v1126_v9, 0.0  ;;  %v1552_v37 = vmax.f32 %v1239_v30, 0.0 }
 0x184   : > { %2074 = vst [vmem:[#allocation2 + $0x68] sm:$0xff] %v2058_v47  ;;  %2076 = vst [vmem:[#allocation2 + $0x48] sm:$0xff] %v2060_v14  ;;  %v1130_v51 = vadd.f32 %v1129_v13, %v3304_v63  ;;  %v1243_v29 = vadd.f32 %v1242_v28, %v3309_v52  ;;  %v1565_v39 = vmax.f32 %v1128_v24, 0.0 }
 0x185   : > { %v1133_v32 = vpop.f32.mrf.mxu0  ;;  %v1246_v41 = vpop.f32.mrf.mxu1  ;;  %v1567_v57 = vmax.f32 %v1241_v26, 0.0 }
 0x186   : > { %v1134_v33 = vadd.f32 %v1133_v32, %v3294_v59  ;;  %v1247_v5 = vadd.f32 %v1246_v41, %v3299_v60  ;;  %v1566_v45 = vmax.f32 %v1130_v51, 0.0  ;;  %v1568_v10 = vmax.f32 %v1243_v29, 0.0 }
 0x187   : > { %v1135_v38 = vpop.f32.mrf.mxu0  ;;  %v1248_v23 = vpop.f32.mrf.mxu1  ;;  %v1933_v16 = vadd.f32 %v1565_v39, %v1549_v0  ;;  %v1963_v42 = vadd.f32 %v1567_v57, %v1551_v8 }
 0x188   : > { %v1136_v48 = vadd.f32 %v1135_v38, %v3304_v63  ;;  %v1249_v35 = vadd.f32 %v1248_v23, %v3309_v52  ;;  %v1581_v7 = vmax.f32 %v1134_v33, 0.0  ;;  %v1583_v17 = vmax.f32 %v1247_v5, 0.0 }
 0x189   : > { %v1137_v36 = vpop.f32.mrf.mxu0  ;;  %v1250_v58 = vpop.f32.mrf.mxu1  ;;  %v1948_v20 = vadd.f32 %v1566_v45, %v1550_v53  ;;  %v1978_v13 = vadd.f32 %v1568_v10, %v1552_v37 }
 0x18a   : > { %v1138_v11 = vadd.f32 %v1137_v36, %v3294_v59  ;;  %v1251_v4 = vadd.f32 %v1250_v58, %v3299_v60  ;;  %v1582_v21 = vmax.f32 %v1136_v48, 0.0  ;;  %v1584_v47 = vmax.f32 %v1249_v35, 0.0 }
 0x18b   : > { %v1139_v49 = vpop.f32.mrf.mxu0  ;;  %v1252_v40 = vpop.f32.mrf.mxu1  ;;  %v1934_v23 = vadd.f32 %v1933_v16, %v1581_v7  ;;  %v1964_v24 = vadd.f32 %v1963_v42, %v1583_v17 }
 0x18c   : > { %v1140_v61 = vadd.f32 %v1139_v49, %v3304_v63  ;;  %v1253_v2 = vadd.f32 %v1252_v40, %v3309_v52  ;;  %v1597_v28 = vmax.f32 %v1138_v11, 0.0  ;;  %v1599_v32 = vmax.f32 %v1251_v4, 0.0 }
 0x18d   : > { %v1143_v62 = vpop.f32.mrf.mxu0  ;;  %v1256_v46 = vpop.f32.mrf.mxu1  ;;  %v1949_v3 = vadd.f32 %v1948_v20, %v1582_v21  ;;  %v1979_v29 = vadd.f32 %v1978_v13, %v1584_v47 }
 0x18e   : > { %v1144_v22 = vadd.f32 %v1143_v62, %v3294_v59  ;;  %v1257_v41 = vadd.f32 %v1256_v46, %v3299_v60  ;;  %v1598_v36 = vmax.f32 %v1140_v61, 0.0  ;;  %v1600_v26 = vmax.f32 %v1253_v2, 0.0 }
 0x18f   : > { %v1145_v1 = vpop.f32.mrf.mxu0  ;;  %v1258_v55 = vpop.f32.mrf.mxu1  ;;  %v1935_v33 = vadd.f32 %v1934_v23, %v1597_v28  ;;  %v1965_v39 = vadd.f32 %v1964_v24, %v1599_v32 }
 0x190   : > { %v1146_v58 = vadd.f32 %v1145_v1, %v3304_v63  ;;  %v1259_v49 = vadd.f32 %v1258_v55, %v3309_v52  ;;  %v1613_v9 = vmax.f32 %v1144_v22, 0.0  ;;  %v1615_v57 = vmax.f32 %v1257_v41, 0.0 }
 0x191   : > { %v1147_v54 = vpop.f32.mrf.mxu0  ;;  %v1260_v56 = vpop.f32.mrf.mxu1  ;;  %v1950_v5 = vadd.f32 %v1949_v3, %v1598_v36 }
 0x192   : > { %v1148_v27 = vadd.f32 %v1147_v54, %v3294_v59  ;;  %v1261_v62 = vadd.f32 %v1260_v56, %v3299_v60  ;;  %v1614_v0 = vmax.f32 %v1146_v58, 0.0  ;;  %v1616_v45 = vmax.f32 %v1259_v49, 0.0 }
 0x193   : > { %v1149_v6 = vpop.f32.mrf.mxu0  ;;  %v1262_v34 = vpop.f32.mrf.mxu1  ;;  %v1980_v56 = vadd.f32 %v1979_v29, %v1600_v26  ;;  %v1966_v7 = vadd.f32 %v1965_v39, %v1615_v57 }
 0x194   : > { %v1150_v46 = vadd.f32 %v1149_v6, %v3304_v63  ;;  %v1263_v1 = vadd.f32 %v1262_v34, %v3309_v52  ;;  %v1629_v35 = vmax.f32 %v1148_v27, 0.0  ;;  %v1631_v8 = vmax.f32 %v1261_v62, 0.0 }
 0x195   : > { %v1153_v12 = vpop.f32.mrf.mxu0  ;;  %v1266_v15 = vpop.f32.mrf.mxu1  ;;  %v1936_v6 = vadd.f32 %v1935_v33, %v1613_v9  ;;  %v1951_v17 = vadd.f32 %v1950_v5, %v1614_v0  ;;  %v1981_v2 = vadd.f32 %v1980_v56, %v1616_v45 }
 0x196   : > { %v1154_v54 = vadd.f32 %v1153_v12, %v3294_v59  ;;  %v1267_v10 = vadd.f32 %v1266_v15, %v3299_v60  ;;  %v1630_v4 = vmax.f32 %v1150_v46, 0.0  ;;  %v1632_v61 = vmax.f32 %v1263_v1, 0.0 }
 0x197   : > { %v1155_v44 = vpop.f32.mrf.mxu0  ;;  %v1268_v14 = vpop.f32.mrf.mxu1  ;;  %v1937_v47 = vadd.f32 %v1936_v6, %v1629_v35  ;;  %v1967_v22 = vadd.f32 %v1966_v7, %v1631_v8 }
 0x198   : > { %v1156_v53 = vadd.f32 %v1155_v44, %v3304_v63  ;;  %v1269_v37 = vadd.f32 %v1268_v14, %v3309_v52  ;;  %v1645_v20 = vmax.f32 %v1154_v54, 0.0  ;;  %v1647_v13 = vmax.f32 %v1267_v10, 0.0 }
 0x199   : > { %v1157_v38 = vpop.f32.mrf.mxu0  ;;  %v1270_v40 = vpop.f32.mrf.mxu1  ;;  %v1952_v28 = vadd.f32 %v1951_v17, %v1630_v4  ;;  %v1982_v36 = vadd.f32 %v1981_v2, %v1632_v61 }
 0x19a   : > { %v1158_v16 = vadd.f32 %v1157_v38, %v3294_v59  ;;  %v1271_v12 = vadd.f32 %v1270_v40, %v3299_v60  ;;  %v1646_v32 = vmax.f32 %v1156_v53, 0.0  ;;  %v1648_v41 = vmax.f32 %v1269_v37, 0.0 }
 0x19b   : > { %v1159_v51 = vpop.f32.mrf.mxu0  ;;  %v1272_v30 = vpop.f32.mrf.mxu1  ;;  %v1938_v26 = vadd.f32 %v1937_v47, %v1645_v20  ;;  %v1968_v29 = vadd.f32 %v1967_v22, %v1647_v13 }
 0x19c   : > { %v1160_v15 = vadd.f32 %v1159_v51, %v3304_v63  ;;  %v1273_v44 = vadd.f32 %v1272_v30, %v3309_v52  ;;  %v1661_v58 = vmax.f32 %v1158_v16, 0.0  ;;  %v1663_v49 = vmax.f32 %v1271_v12, 0.0 }
 0x19d   : > { %v1163_v55 = vpop.f32.mrf.mxu0  ;;  %v1276_v48 = vpop.f32.mrf.mxu1  ;;  %v1953_v39 = vadd.f32 %v1952_v28, %v1646_v32  ;;  %v1983_v57 = vadd.f32 %v1982_v36, %v1648_v41 }
 0x19e   : > { %v1164_v38 = vadd.f32 %v1163_v55, %v3294_v59  ;;  %v1277_v40 = vadd.f32 %v1276_v48, %v3299_v60  ;;  %v1662_v27 = vmax.f32 %v1160_v15, 0.0  ;;  %v1664_v9 = vmax.f32 %v1273_v44, 0.0 }
 0x19f   : > { %v1165_v11 = vpop.f32.mrf.mxu0  ;;  %v1278_v34 = vpop.f32.mrf.mxu1  ;;  %v1939_v0 = vadd.f32 %v1938_v26, %v1661_v58  ;;  %v1969_v45 = vadd.f32 %v1968_v29, %v1663_v49 }
 0x1a0   : > { %v1166_v62 = vadd.f32 %v1165_v11, %v3304_v63  ;;  %v1279_v51 = vadd.f32 %v1278_v34, %v3309_v52  ;;  %v1677_v1 = vmax.f32 %v1164_v38, 0.0  ;;  %v1679_v54 = vmax.f32 %v1277_v40, 0.0 }
 0x1a1   : > { %v1167_v42 = vpop.f32.mrf.mxu0  ;;  %v1280_v21 = vpop.f32.mrf.mxu1  ;;  %v1954_v35 = vadd.f32 %v1953_v39, %v1662_v27  ;;  %v1984_v4 = vadd.f32 %v1983_v57, %v1664_v9 }
 0x1a2   : > { %v1168_v46 = vadd.f32 %v1167_v42, %v3294_v59  ;;  %v1281_v30 = vadd.f32 %v1280_v21, %v3299_v60  ;;  %v1678_v8 = vmax.f32 %v1166_v62, 0.0  ;;  %v1680_v10 = vmax.f32 %v1279_v51, 0.0 }
 0x1a3   : > { %v1169_v14 = vpop.f32.mrf.mxu0  ;;  %v1282_v23 = vpop.f32.mrf.mxu1  ;;  %v1940_v61 = vadd.f32 %v1939_v0, %v1677_v1  ;;  %v1970_v2 = vadd.f32 %v1969_v45, %v1679_v54 }
 0x1a4   : > { %v1170_v55 = vadd.f32 %v1169_v14, %v3304_v63  ;;  %v1283_v48 = vadd.f32 %v1282_v23, %v3309_v52  ;;  %v1693_v53 = vmax.f32 %v1168_v46, 0.0  ;;  %v1695_v37 = vmax.f32 %v1281_v30, 0.0 }
 0x1a5   : > { %v1173_v24 = vpop.f32.mrf.mxu0  ;;  %v1286_v3 = vpop.f32.mrf.mxu1  ;;  %v1955_v22 = vadd.f32 %v1954_v35, %v1678_v8  ;;  %v1985_v13 = vadd.f32 %v1984_v4, %v1680_v10 }
 0x1a6   : > { %v1174_v11 = vadd.f32 %v1173_v24, %v3294_v59  ;;  %v1287_v34 = vadd.f32 %v1286_v3, %v3299_v60  ;;  %v1694_v16 = vmax.f32 %v1170_v55, 0.0  ;;  %v1696_v20 = vmax.f32 %v1283_v48, 0.0 }
 0x1a7   : > { %v1175_v33 = vpop.f32.mrf.mxu0  ;;  %v1288_v5 = vpop.f32.mrf.mxu1  ;;  %v1941_v32 = vadd.f32 %v1940_v61, %v1693_v53  ;;  %v1971_v41 = vadd.f32 %v1970_v2, %v1695_v37 }
 0x1a8   : > { %v1176_v12 = vadd.f32 %v1175_v33, %v3304_v63  ;;  %v1289_v42 = vadd.f32 %v1288_v5, %v3309_v52  ;;  %v1709_v44 = vmax.f32 %v1174_v11, 0.0  ;;  %v1711_v38 = vmax.f32 %v1287_v34, 0.0 }
 0x1a9   : > { %v1177_v56 = vpop.f32.mrf.mxu0  ;;  %v1290_v6 = vpop.f32.mrf.mxu1  ;;  %v1956_v58 = vadd.f32 %v1955_v22, %v1694_v16  ;;  %v1986_v27 = vadd.f32 %v1985_v13, %v1696_v20 }
 0x1aa   : > { %v1178_v15 = vadd.f32 %v1177_v56, %v3294_v59  ;;  %v1291_v21 = vadd.f32 %v1290_v6, %v3299_v60  ;;  %v1710_v49 = vmax.f32 %v1176_v12, 0.0  ;;  %v1712_v40 = vmax.f32 %v1289_v42, 0.0 }
 0x1ab   : > { %v1179_v7 = vpop.f32.mrf.mxu0  ;;  %v1292_v17 = vpop.f32.mrf.mxu1  ;;  %v1942_v9 = vadd.f32 %v1941_v32, %v1709_v44  ;;  %v1972_v57 = vadd.f32 %v1971_v41, %v1711_v38 }
 0x1ac   : > { %v1180_v14 = vadd.f32 %v1179_v7, %v3304_v63  ;;  %v1293_v23 = vadd.f32 %v1292_v17, %v3309_v52  ;;  %v1725_v62 = vmax.f32 %v1178_v15, 0.0  ;;  %v1727_v51 = vmax.f32 %v1291_v21, 0.0 }
 0x1ad   : > { %v1183_v47 = vpop.f32.mrf.mxu0  ;;  %v1296_v28 = vpop.f32.mrf.mxu1  ;;  %v1957_v45 = vadd.f32 %v1956_v58, %v1710_v49  ;;  %v1987_v54 = vadd.f32 %v1986_v27, %v1712_v40 }
 0x1ae   : > { %v1184_v24 = vadd.f32 %v1183_v47, %v3294_v59  ;;  %v1297_v3 = vadd.f32 %v1296_v28, %v3299_v60  ;;  %v1726_v46 = vmax.f32 %v1180_v14, 0.0  ;;  %v1728_v1 = vmax.f32 %v1293_v23, 0.0 }
 0x1af   : > { %v1185_v36 = vpop.f32.mrf.mxu0  ;;  %v1298_v26 = vpop.f32.mrf.mxu1  ;;  %v1943_v8 = vadd.f32 %v1942_v9, %v1725_v62  ;;  %v1973_v10 = vadd.f32 %v1972_v57, %v1727_v51 }
 0x1b0   : > { %v1186_v30 = vadd.f32 %v1185_v36, %v3304_v63  ;;  %v1299_v55 = vadd.f32 %v1298_v26, %v3309_v52  ;;  %v1741_v48 = vmax.f32 %v1184_v24, 0.0  ;;  %v1743_v11 = vmax.f32 %v1297_v3, 0.0 }
 0x1b1   : > { %v1187_v29 = vpop.f32.mrf.mxu0  ;;  %v1300_v39 = vpop.f32.mrf.mxu1  ;;  %v1958_v53 = vadd.f32 %v1957_v45, %v1726_v46  ;;  %v1988_v16 = vadd.f32 %v1987_v54, %v1728_v1 }
 0x1b2   : > { %v1188_v33 = vadd.f32 %v1187_v29, %v3294_v59  ;;  %v1301_v5 = vadd.f32 %v1300_v39, %v3299_v60  ;;  %v1742_v37 = vmax.f32 %v1186_v30, 0.0  ;;  %v1744_v12 = vmax.f32 %v1299_v55, 0.0 }
 0x1b3   : > { %v1189_v0 = vpop.f32.mrf.mxu0  ;;  %v1302_v35 = vpop.f32.mrf.mxu1  ;;  %v1944_v20 = vadd.f32 %v1943_v8, %v1741_v48  ;;  %v1974_v13 = vadd.f32 %v1973_v10, %v1743_v11  ;;  %v1806_v48 = vld [vmem:[#allocation2 + $0x20] sm:$0xff]  ;;  %v1808_v10 = vld [vmem:[#allocation2 + $0x38] sm:$0xff] }
 0x1b4   : > { %v1190_v56 = vadd.f32 %v1189_v0, %v3304_v63  ;;  %v1303_v6 = vadd.f32 %v1302_v35, %v3309_v52  ;;  %v1757_v34 = vmax.f32 %v1188_v33, 0.0  ;;  %v1759_v42 = vmax.f32 %v1301_v5, 0.0  ;;  %v1805_v33 = vld [vmem:[#allocation2 + $0x40] sm:$0xff]  ;;  %v1807_v5 = vld [vmem:[#allocation2 + $0x10] sm:$0xff] }
 0x1b5   : > { %v1193_v4 = vpop.f32.mrf.mxu0  ;;  %v1306_v61 = vpop.f32.mrf.mxu1  ;;  %v1959_v41 = vadd.f32 %v1958_v53, %v1742_v37  ;;  %v1989_v49 = vadd.f32 %v1988_v16, %v1744_v12 }
 0x1b6   : > { %v1194_v7 = vadd.f32 %v1193_v4, %v3294_v59  ;;  %v1307_v17 = vadd.f32 %v1306_v61, %v3299_v60  ;;  %v1758_v15 = vmax.f32 %v1190_v56, 0.0  ;;  %v1760_v44 = vmax.f32 %v1303_v6, 0.0 }
 0x1b7   : > { %v1195_v2 = vpop.f32.mrf.mxu0  ;;  %v1308_v22 = vpop.f32.mrf.mxu1  ;;  %v1945_v38 = vadd.f32 %v1944_v20, %v1757_v34  ;;  %v1975_v40 = vadd.f32 %v1974_v13, %v1759_v42 }
 0x1b8   : > { %v1773_v21 = vmax.f32 %v1194_v7, 0.0  ;;  %v1196_v47 = vadd.f32 %v1195_v2, %v3304_v63  ;;  %v1775_v14 = vmax.f32 %v1307_v17, 0.0  ;;  %v1309_v28 = vadd.f32 %v1308_v22, %v3309_v52 }
 0x1b9   : > { %v1197_v32 = vpop.f32.mrf.mxu0  ;;  %v1310_v58 = vpop.f32.mrf.mxu1  ;;  %v1960_v62 = vadd.f32 %v1959_v41, %v1758_v15  ;;  %v1990_v46 = vadd.f32 %v1989_v49, %v1760_v44  ;;  %v3383_v22 = vrot.slane %v3289_v50, %v358_v43  ;;  %v3388_v44 = vrot.slane %v3289_v50, %v354_v18 }
 0x1ba   : > { %v1774_v23 = vmax.f32 %v1196_v47, 0.0  ;;  %v1198_v36 = vadd.f32 %v1197_v32, %v3294_v59  ;;  %v1776_v24 = vmax.f32 %v1309_v28, 0.0  ;;  %v1311_v26 = vadd.f32 %v1310_v58, %v3299_v60 }
 0x1bb   : > { %v1199_v27 = vpop.f32.mrf.mxu0  ;;  %v1946_v51 = vadd.f32 %v1945_v38, %v1773_v21  ;;  %v1312_v9 = vpop.f32.mrf.mxu1  ;;  %v1976_v30 = vadd.f32 %v1975_v40, %v1775_v14  ;;  %v3378_v21 = vrot.slane %v3289_v50, %v350_v31  ;;  %v3393_v14 = vrot.slane %v3289_v50, %v362_v25 }
 0x1bc   : > { %v1789_v3 = vmax.f32 %v1198_v36, 0.0  ;;  %v1200_v29 = vadd.f32 %v1199_v27, %v3304_v63  ;;  %v1791_v39 = vmax.f32 %v1311_v26, 0.0  ;;  %v1313_v57 = vadd.f32 %v1312_v9, %v3309_v52 }
 0x1bd   : > { %v1349_v59 = vpop.f32.mrf.mxu0  ;;  %v1961_v1 = vadd.f32 %v1960_v62, %v1774_v23  ;;  %v1462_v45 = vpop.f32.mrf.mxu1  ;;  %v1991_v60 = vadd.f32 %v1990_v46, %v1776_v24 }
 0x1be   : > { %v1947_v55 = vadd.f32 %v1946_v51, %v1789_v3  ;;  %v1790_v0 = vmax.f32 %v1200_v29, 0.0  ;;  %v1977_v54 = vadd.f32 %v1976_v30, %v1791_v39  ;;  %v1792_v56 = vmax.f32 %v1313_v57, 0.0 }
 0x1bf   : > { %v1351_v35 = vpop.f32.mrf.mxu0  ;;  %v1464_v11 = vpop.f32.mrf.mxu1  ;;  %v1350_v43 = vadd.f32 %v1349_v59, %v3378_v21  ;;  %v1463_v36 = vadd.f32 %v1462_v45, %v3383_v22 }
 0x1c0   : > { %v2061_v8 = vadd.f32 %v1947_v55, %v1805_v33  ;;  %v1962_v63 = vadd.f32 %v1961_v1, %v1790_v0  ;;  %v2063_v6 = vadd.f32 %v1977_v54, %v1807_v5  ;;  %v1992_v4 = vadd.f32 %v1991_v60, %v1792_v56 }
 0x1c1   : > { %v1353_v53 = vpop.f32.mrf.mxu0  ;;  %v1466_v37 = vpop.f32.mrf.mxu1  ;;  %v1352_v49 = vadd.f32 %v1351_v35, %v3388_v44  ;;  %v1465_v25 = vadd.f32 %v1464_v11, %v3393_v14  ;;  %v1553_v51 = vmax.f32 %v1350_v43, 0.0  ;;  %v1555_v30 = vmax.f32 %v1463_v36, 0.0 }
 0x1c2   : > { %2077 = vst [vmem:[#allocation2 + $0x40] sm:$0xff] %v2061_v8  ;;  %v2062_v52 = vadd.f32 %v1962_v63, %v1806_v48  ;;  %2079 = vst [vmem:[#allocation2 + $0x10] sm:$0xff] %v2063_v6  ;;  %v2064_v34 = vadd.f32 %v1992_v4, %v1808_v10  ;;  %v1354_v31 = vadd.f32 %v1353_v53, %v3378_v21 }
 0x1c3   : > { %v1355_v7 = vpop.f32.mrf.mxu0  ;;  %v1468_v61 = vpop.f32.mrf.mxu1  ;;  %v1467_v32 = vadd.f32 %v1466_v37, %v3383_v22  ;;  %v1554_v1 = vmax.f32 %v1352_v49, 0.0  ;;  %v1556_v55 = vmax.f32 %v1465_v25, 0.0 }
 0x1c4   : > { %2078 = vst [vmem:[#allocation2 + $0x20] sm:$0xff] %v2062_v52  ;;  %2080 = vst [vmem:[#allocation2 + $0x38] sm:$0xff] %v2064_v34  ;;  %v1356_v38 = vadd.f32 %v1355_v7, %v3388_v44  ;;  %v1469_v18 = vadd.f32 %v1468_v61, %v3393_v14  ;;  %v1569_v24 = vmax.f32 %v1354_v31, 0.0 }
 0x1c5   : > { %v1359_v16 = vpop.f32.mrf.mxu0  ;;  %v1472_v12 = vpop.f32.mrf.mxu1  ;;  %v1571_v26 = vmax.f32 %v1467_v32, 0.0 }
 0x1c6   : > { %v1360_v50 = vadd.f32 %v1359_v16, %v3378_v21  ;;  %v1473_v27 = vadd.f32 %v1472_v12, %v3383_v22  ;;  %v1570_v3 = vmax.f32 %v1356_v38, 0.0  ;;  %v1572_v33 = vmax.f32 %v1469_v18, 0.0 }
 0x1c7   : > { %v1361_v42 = vpop.f32.mrf.mxu0  ;;  %v1474_v17 = vpop.f32.mrf.mxu1  ;;  %v1993_v60 = vadd.f32 %v1569_v24, %v1553_v51  ;;  %v2023_v54 = vadd.f32 %v1571_v26, %v1555_v30 }
 0x1c8   : > { %v1362_v29 = vadd.f32 %v1361_v42, %v3388_v44  ;;  %v1475_v9 = vadd.f32 %v1474_v17, %v3393_v14  ;;  %v1585_v5 = vmax.f32 %v1360_v50, 0.0  ;;  %v1587_v48 = vmax.f32 %v1473_v27, 0.0 }
 0x1c9   : > { %v1363_v2 = vpop.f32.mrf.mxu0  ;;  %v1476_v20 = vpop.f32.mrf.mxu1  ;;  %v2008_v8 = vadd.f32 %v1570_v3, %v1554_v1  ;;  %v2038_v4 = vadd.f32 %v1572_v33, %v1556_v55 }
 0x1ca   : > { %v1364_v39 = vadd.f32 %v1363_v2, %v3378_v21  ;;  %v1477_v57 = vadd.f32 %v1476_v20, %v3383_v22  ;;  %v1586_v63 = vmax.f32 %v1362_v29, 0.0  ;;  %v1588_v10 = vmax.f32 %v1475_v9, 0.0 }
 0x1cb   : > { %v1365_v15 = vpop.f32.mrf.mxu0  ;;  %v1478_v47 = vpop.f32.mrf.mxu1  ;;  %v1994_v7 = vadd.f32 %v1993_v60, %v1585_v5  ;;  %v2024_v17 = vadd.f32 %v2023_v54, %v1587_v48 }
 0x1cc   : > { %v1366_v0 = vadd.f32 %v1365_v15, %v3388_v44  ;;  %v1479_v56 = vadd.f32 %v1478_v47, %v3393_v14  ;;  %v1601_v53 = vmax.f32 %v1364_v39, 0.0  ;;  %v1603_v52 = vmax.f32 %v1477_v57, 0.0 }
 0x1cd   : > { %v1369_v13 = vpop.f32.mrf.mxu0  ;;  %v1482_v28 = vpop.f32.mrf.mxu1  ;;  %v2039_v31 = vadd.f32 %v2038_v4, %v1588_v10 }
 0x1ce   : > { %v1370_v11 = vadd.f32 %v1369_v13, %v3378_v21  ;;  %v1483_v37 = vadd.f32 %v1482_v28, %v3383_v22  ;;  %v1602_v61 = vmax.f32 %v1366_v0, 0.0  ;;  %v1604_v2 = vmax.f32 %v1479_v56, 0.0 }
 0x1cf   : > { %v1371_v41 = vpop.f32.mrf.mxu0  ;;  %v1484_v23 = vpop.f32.mrf.mxu1  ;;  %v2009_v13 = vadd.f32 %v2008_v8, %v1586_v63  ;;  %v1995_v38 = vadd.f32 %v1994_v7, %v1601_v53  ;;  %v2025_v36 = vadd.f32 %v2024_v17, %v1603_v52 }
 0x1d0   : > { %v1372_v16 = vadd.f32 %v1371_v41, %v3388_v44  ;;  %v1485_v12 = vadd.f32 %v1484_v23, %v3393_v14  ;;  %v1617_v32 = vmax.f32 %v1370_v11, 0.0  ;;  %v1619_v18 = vmax.f32 %v1483_v37, 0.0 }
 0x1d1   : > { %v1373_v58 = vpop.f32.mrf.mxu0  ;;  %v1486_v40 = vpop.f32.mrf.mxu1  ;;  %v2010_v49 = vadd.f32 %v2009_v13, %v1602_v61 }
 0x1d2   : > { %v1374_v20 = vadd.f32 %v1373_v58, %v3378_v21  ;;  %v1487_v15 = vadd.f32 %v1486_v40, %v3383_v22  ;;  %v1618_v25 = vmax.f32 %v1372_v16, 0.0  ;;  %v1620_v50 = vmax.f32 %v1485_v12, 0.0 }
 0x1d3   : > { %v1375_v62 = vpop.f32.mrf.mxu0  ;;  %v1488_v46 = vpop.f32.mrf.mxu1  ;;  %v2040_v40 = vadd.f32 %v2039_v31, %v1604_v2  ;;  %v2026_v33 = vadd.f32 %v2025_v36, %v1619_v18 }
 0x1d4   : > { %v1376_v28 = vadd.f32 %v1375_v62, %v3388_v44  ;;  %v1489_v41 = vadd.f32 %v1488_v46, %v3393_v14  ;;  %v1633_v26 = vmax.f32 %v1374_v20, 0.0  ;;  %v1635_v27 = vmax.f32 %v1487_v15, 0.0 }
 0x1d5   : > { %v1379_v59 = vpop.f32.mrf.mxu0  ;;  %v1492_v45 = vpop.f32.mrf.mxu1  ;;  %v1996_v62 = vadd.f32 %v1995_v38, %v1617_v32  ;;  %v2011_v55 = vadd.f32 %v2010_v49, %v1618_v25  ;;  %v2041_v5 = vadd.f32 %v2040_v40, %v1620_v50 }
 0x1d6   : > { %v1380_v58 = vadd.f32 %v1379_v59, %v3378_v21  ;;  %v1493_v51 = vadd.f32 %v1492_v45, %v3383_v22  ;;  %v1634_v29 = vmax.f32 %v1376_v28, 0.0  ;;  %v1636_v39 = vmax.f32 %v1489_v41, 0.0 }
 0x1d7   : > { %v1381_v35 = vpop.f32.mrf.mxu0  ;;  %v1494_v6 = vpop.f32.mrf.mxu1  ;;  %v1997_v54 = vadd.f32 %v1996_v62, %v1633_v26  ;;  %v2027_v48 = vadd.f32 %v2026_v33, %v1635_v27 }
 0x1d8   : > { %v1382_v9 = vadd.f32 %v1381_v35, %v3388_v44  ;;  %v1495_v30 = vadd.f32 %v1494_v6, %v3393_v14  ;;  %v1649_v0 = vmax.f32 %v1380_v58, 0.0  ;;  %v1651_v56 = vmax.f32 %v1493_v51, 0.0 }
 0x1d9   : > { %v1383_v34 = vpop.f32.mrf.mxu0  ;;  %v1496_v42 = vpop.f32.mrf.mxu1  ;;  %v2012_v63 = vadd.f32 %v2011_v55, %v1634_v29  ;;  %v2042_v53 = vadd.f32 %v2041_v5, %v1636_v39 }
 0x1da   : > { %v1384_v57 = vadd.f32 %v1383_v34, %v3378_v21  ;;  %v1497_v59 = vadd.f32 %v1496_v42, %v3383_v22  ;;  %v1650_v10 = vmax.f32 %v1382_v9, 0.0  ;;  %v1652_v11 = vmax.f32 %v1495_v30, 0.0 }
 0x1db   : > { %v1385_v47 = vpop.f32.mrf.mxu0  ;;  %v1498_v43 = vpop.f32.mrf.mxu1  ;;  %v1998_v61 = vadd.f32 %v1997_v54, %v1649_v0  ;;  %v2028_v2 = vadd.f32 %v2027_v48, %v1651_v56 }
 0x1dc   : > { %v1386_v45 = vadd.f32 %v1385_v47, %v3388_v44  ;;  %v1499_v35 = vadd.f32 %v1498_v43, %v3393_v14  ;;  %v1665_v52 = vmax.f32 %v1384_v57, 0.0  ;;  %v1667_v37 = vmax.f32 %v1497_v59, 0.0 }
 0x1dd   : > { %v1389_v23 = vpop.f32.mrf.mxu0  ;;  %v1502_v24 = vpop.f32.mrf.mxu1  ;;  %v2013_v31 = vadd.f32 %v2012_v63, %v1650_v10  ;;  %v2043_v32 = vadd.f32 %v2042_v53, %v1652_v11 }
 0x1de   : > { %v1390_v6 = vadd.f32 %v1389_v23, %v3378_v21  ;;  %v1503_v34 = vadd.f32 %v1502_v24, %v3383_v22  ;;  %v1666_v16 = vmax.f32 %v1386_v45, 0.0  ;;  %v1668_v20 = vmax.f32 %v1499_v35, 0.0 }
 0x1df   : > { %v1391_v3 = vpop.f32.mrf.mxu0  ;;  %v1504_v46 = vpop.f32.mrf.mxu1  ;;  %v1999_v36 = vadd.f32 %v1998_v61, %v1665_v52  ;;  %v2029_v18 = vadd.f32 %v2028_v2, %v1667_v37 }
 0x1e0   : > { %v1392_v12 = vadd.f32 %v1391_v3, %v3388_v44  ;;  %v1505_v42 = vadd.f32 %v1504_v46, %v3393_v14  ;;  %v1681_v28 = vmax.f32 %v1390_v6, 0.0  ;;  %v1683_v41 = vmax.f32 %v1503_v34, 0.0 }
 0x1e1   : > { %v1393_v1 = vpop.f32.mrf.mxu0  ;;  %v1506_v60 = vpop.f32.mrf.mxu1  ;;  %v2014_v25 = vadd.f32 %v2013_v31, %v1666_v16  ;;  %v2044_v26 = vadd.f32 %v2043_v32, %v1668_v20 }
 0x1e2   : > { %v1394_v15 = vadd.f32 %v1393_v1, %v3378_v21  ;;  %v1507_v47 = vadd.f32 %v1506_v60, %v3383_v22  ;;  %v1682_v50 = vmax.f32 %v1392_v12, 0.0  ;;  %v1684_v58 = vmax.f32 %v1505_v42, 0.0 }
 0x1e3   : > { %v1395_v8 = vpop.f32.mrf.mxu0  ;;  %v1508_v4 = vpop.f32.mrf.mxu1  ;;  %v2000_v29 = vadd.f32 %v1999_v36, %v1681_v28  ;;  %v2030_v39 = vadd.f32 %v2029_v18, %v1683_v41 }
 0x1e4   : > { %v1396_v43 = vadd.f32 %v1395_v8, %v3388_v44  ;;  %v1509_v23 = vadd.f32 %v1508_v4, %v3393_v14  ;;  %v1697_v27 = vmax.f32 %v1394_v15, 0.0  ;;  %v1699_v51 = vmax.f32 %v1507_v47, 0.0 }
 0x1e5   : > { %v1399_v7 = vpop.f32.mrf.mxu0  ;;  %v1512_v17 = vpop.f32.mrf.mxu1  ;;  %v2015_v5 = vadd.f32 %v2014_v25, %v1682_v50  ;;  %v2045_v0 = vadd.f32 %v2044_v26, %v1684_v58 }
 0x1e6   : > { %v1400_v24 = vadd.f32 %v1399_v7, %v3378_v21  ;;  %v1513_v3 = vadd.f32 %v1512_v17, %v3383_v22  ;;  %v1698_v9 = vmax.f32 %v1396_v43, 0.0  ;;  %v1700_v57 = vmax.f32 %v1509_v23, 0.0 }
 0x1e7   : > { %v1401_v13 = vpop.f32.mrf.mxu0  ;;  %v1514_v38 = vpop.f32.mrf.mxu1  ;;  %v2001_v48 = vadd.f32 %v2000_v29, %v1697_v27  ;;  %v2031_v56 = vadd.f32 %v2030_v39, %v1699_v51 }
 0x1e8   : > { %v1402_v30 = vadd.f32 %v1401_v13, %v3388_v44  ;;  %v1515_v46 = vadd.f32 %v1514_v38, %v3393_v14  ;;  %v1713_v45 = vmax.f32 %v1400_v24, 0.0  ;;  %v1715_v35 = vmax.f32 %v1513_v3, 0.0 }
 0x1e9   : > { %v1403_v49 = vpop.f32.mrf.mxu0  ;;  %v1516_v40 = vpop.f32.mrf.mxu1  ;;  %v2016_v10 = vadd.f32 %v2015_v5, %v1698_v9  ;;  %v2046_v52 = vadd.f32 %v2045_v0, %v1700_v57 }
 0x1ea   : > { %v1404_v59 = vadd.f32 %v1403_v49, %v3378_v21  ;;  %v1517_v1 = vadd.f32 %v1516_v40, %v3383_v22  ;;  %v1714_v11 = vmax.f32 %v1402_v30, 0.0  ;;  %v1716_v6 = vmax.f32 %v1515_v46, 0.0 }
 0x1eb   : > { %v1405_v62 = vpop.f32.mrf.mxu0  ;;  %v1518_v33 = vpop.f32.mrf.mxu1  ;;  %v2002_v16 = vadd.f32 %v2001_v48, %v1713_v45  ;;  %v2032_v20 = vadd.f32 %v2031_v56, %v1715_v35 }
 0x1ec   : > { %v1406_v60 = vadd.f32 %v1405_v62, %v3388_v44  ;;  %v1519_v8 = vadd.f32 %v1518_v33, %v3393_v14  ;;  %v1729_v37 = vmax.f32 %v1404_v59, 0.0  ;;  %v1731_v34 = vmax.f32 %v1517_v1, 0.0 }
 0x1ed   : > { %v1409_v55 = vpop.f32.mrf.mxu0  ;;  %v1522_v54 = vpop.f32.mrf.mxu1  ;;  %v2017_v32 = vadd.f32 %v2016_v10, %v1714_v11  ;;  %v2047_v28 = vadd.f32 %v2046_v52, %v1716_v6 }
 0x1ee   : > { %v1410_v4 = vadd.f32 %v1409_v55, %v3378_v21  ;;  %v1523_v7 = vadd.f32 %v1522_v54, %v3383_v22  ;;  %v1730_v12 = vmax.f32 %v1406_v60, 0.0  ;;  %v1732_v15 = vmax.f32 %v1519_v8, 0.0 }
 0x1ef   : > { %v1411_v63 = vpop.f32.mrf.mxu0  ;;  %v1524_v53 = vpop.f32.mrf.mxu1  ;;  %v2003_v18 = vadd.f32 %v2002_v16, %v1729_v37  ;;  %v2033_v41 = vadd.f32 %v2032_v20, %v1731_v34 }
 0x1f0   : > { %v1412_v42 = vadd.f32 %v1411_v63, %v3388_v44  ;;  %v1525_v47 = vadd.f32 %v1524_v53, %v3393_v14  ;;  %v1745_v43 = vmax.f32 %v1410_v4, 0.0  ;;  %v1747_v23 = vmax.f32 %v1523_v7, 0.0  ;;  %v1809_v7 = vld [vmem:[#allocation2 + $0x60] sm:$0xff] }
 0x1f1   : > { %v1413_v61 = vpop.f32.mrf.mxu0  ;;  %v1526_v2 = vpop.f32.mrf.mxu1  ;;  %v2018_v50 = vadd.f32 %v2017_v32, %v1730_v12  ;;  %v2048_v27 = vadd.f32 %v2047_v28, %v1732_v15 }
 0x1f2   : > { %v1414_v17 = vadd.f32 %v1413_v61, %v3378_v21  ;;  %v1527_v13 = vadd.f32 %v1526_v2, %v3383_v22  ;;  %v1746_v58 = vmax.f32 %v1412_v42, 0.0  ;;  %v1748_v51 = vmax.f32 %v1525_v47, 0.0  ;;  %v1811_v42 = vld [vmem:[#allocation2 + $0x78] sm:$0xff] }
 0x1f3   : > { %v1415_v31 = vpop.f32.mrf.mxu0  ;;  %v1528_v36 = vpop.f32.mrf.mxu1  ;;  %v2004_v9 = vadd.f32 %v2003_v18, %v1745_v43  ;;  %v2034_v57 = vadd.f32 %v2033_v41, %v1747_v23 }
 0x1f4   : > { %v1416_v38 = vadd.f32 %v1415_v31, %v3388_v44  ;;  %v1529_v49 = vadd.f32 %v1528_v36, %v3393_v14  ;;  %v1761_v24 = vmax.f32 %v1414_v17, 0.0  ;;  %v1763_v3 = vmax.f32 %v1527_v13, 0.0  ;;  %v1812_v31 = vld [vmem:[#allocation2 + $0x28] sm:$0xff] }
 0x1f5   : > { %v1419_v25 = vpop.f32.mrf.mxu0  ;;  %v1532_v26 = vpop.f32.mrf.mxu1  ;;  %v2019_v0 = vadd.f32 %v2018_v50, %v1746_v58  ;;  %v2049_v56 = vadd.f32 %v2048_v27, %v1748_v51 }
 0x1f6   : > { %v1420_v40 = vadd.f32 %v1419_v25, %v3378_v21  ;;  %v1533_v62 = vadd.f32 %v1532_v26, %v3383_v22  ;;  %v1762_v30 = vmax.f32 %v1416_v38, 0.0  ;;  %v1764_v59 = vmax.f32 %v1529_v49, 0.0 }
 0x1f7   : > { %v1421_v29 = vpop.f32.mrf.mxu0  ;;  %v1534_v39 = vpop.f32.mrf.mxu1  ;;  %v2005_v45 = vadd.f32 %v2004_v9, %v1761_v24  ;;  %v2035_v35 = vadd.f32 %v2034_v57, %v1763_v3 }
 0x1f8   : > { %v1777_v46 = vmax.f32 %v1420_v40, 0.0  ;;  %v1422_v33 = vadd.f32 %v1421_v29, %v3388_v44  ;;  %v1779_v1 = vmax.f32 %v1533_v62, 0.0  ;;  %v1535_v55 = vadd.f32 %v1534_v39, %v3393_v14 }
 0x1f9   : > { %v1423_v5 = vpop.f32.mrf.mxu0  ;;  %v1536_v48 = vpop.f32.mrf.mxu1  ;;  %v2020_v11 = vadd.f32 %v2019_v0, %v1762_v30  ;;  %v2050_v37 = vadd.f32 %v2049_v56, %v1764_v59 }
 0x1fa   : > { %v1778_v60 = vmax.f32 %v1422_v33, 0.0  ;;  %v1424_v54 = vadd.f32 %v1423_v5, %v3378_v21  ;;  %v1780_v8 = vmax.f32 %v1535_v55, 0.0  ;;  %v1537_v63 = vadd.f32 %v1536_v48, %v3383_v22  ;;  %v1810_v22 = vld [vmem:[#allocation2 + $0x70] sm:$0xff] }
 0x1fb   : > { %v1425_v10 = vpop.f32.mrf.mxu0  ;;  %v2006_v6 = vadd.f32 %v2005_v45, %v1777_v46  ;;  %v1538_v52 = vpop.f32.mrf.mxu1  ;;  %v2036_v34 = vadd.f32 %v2035_v35, %v1779_v1 }
 0x1fc   : > { %v1793_v4 = vmax.f32 %v1424_v54, 0.0  ;;  %v1426_v53 = vadd.f32 %v1425_v10, %v3388_v44  ;;  %v1795_v61 = vmax.f32 %v1537_v63, 0.0  ;;  %v1539_v16 = vadd.f32 %v1538_v52, %v3393_v14 }
 0x1fd   : > { %v2021_v21 = vadd.f32 %v2020_v11, %v1778_v60  ;;  %v2051_v2 = vadd.f32 %v2050_v37, %v1780_v8 }
 0x1fe   : > { %v2007_v12 = vadd.f32 %v2006_v6, %v1793_v4  ;;  %v1794_v17 = vmax.f32 %v1426_v53, 0.0  ;;  %v2037_v20 = vadd.f32 %v2036_v34, %v1795_v61  ;;  %v1796_v15 = vmax.f32 %v1539_v16, 0.0 }
 0x200   : > { %v2065_v47 = vadd.f32 %v2007_v12, %v1809_v7  ;;  %v2022_v13 = vadd.f32 %v2021_v21, %v1794_v17  ;;  %v2067_v32 = vadd.f32 %v2037_v20, %v1811_v42  ;;  %v2052_v44 = vadd.f32 %v2051_v2, %v1796_v15  ;;  %2088 = sbr.rel (%p2568_p5) target bundleno = 561 (0x231), region = 44 }
 0x202   : > { %2081 = vst [vmem:[#allocation2 + $0x60] sm:$0xff] %v2065_v47  ;;  %v2066_v28 = vadd.f32 %v2022_v13, %v1810_v22  ;;  %2083 = vst [vmem:[#allocation2 + $0x78] sm:$0xff] %v2067_v32  ;;  %v2068_v43 = vadd.f32 %v2052_v44, %v1812_v31 }
 0x204   : > { %2082 = vst [vmem:[#allocation2 + $0x70] sm:$0xff] %v2066_v28  ;;  %2084 = vst [vmem:[#allocation2 + $0x28] sm:$0xff] %v2068_v43 }
 0x205   : > { %v2089_v14 = vld [vmem:[#allocation2 + $0x30] sm:$0xff]  ;;  %v2090_v38 = vld [vmem:[#allocation2] sm:$0xff]  ;;  %v2091_v36 = vld [vmem:[#allocation2 + $0x58] sm:$0xff]  ;;  %v2706_v51 = vmov 1966171168  }
 0x206   : > { %v2092_v18 = vld [vmem:[#allocation2 + $0x18] sm:$0xff]  ;;  %v2093_v41 = vld [vmem:[#allocation2 + $0x50] sm:$0xff]  ;;  %v2094_v23 = vld [vmem:[#allocation2 + $0x68] sm:$0xff]  ;;  %v2105_v49 = vrot.slane %v2089_v14, 4  ;;  %v2111_v25 = vrot.slane %v2090_v38, 4  ;;  %v2117_v50 = vrot.slane %v2091_v36, 4  ;;  %v3460_v3 = vunpack.c.l.s4 %v2706_v51 }
 0x207   : > { %v2095_v58 = vld [vmem:[#allocation2 + $0x8] sm:$0xff]  ;;  %v2123_v40 = vrot.slane %v2092_v18, 4  ;;  %v2129_v26 = vrot.slane %v2093_v41, 4  ;;  %v2135_v27 = vrot.slane %v2094_v23, 4  ;;  %v2097_v34 = vld [vmem:[#allocation2 + $0x40] sm:$0xff]  ;;  %v2099_v61 = vld [vmem:[#allocation2 + $0x10] sm:$0xff] }
 0x208   : > { %v2096_v24 = vld [vmem:[#allocation2 + $0x48] sm:$0xff]  ;;  %v2106_v62 = vadd.f32 %v2105_v49, %v2089_v14  ;;  %v2112_v29 = vadd.f32 %v2111_v25, %v2090_v38  ;;  %v2118_v9 = vadd.f32 %v2117_v50, %v2091_v36  ;;  %v2141_v30 = vrot.slane %v2095_v58, 4  ;;  %v2098_v7 = vld [vmem:[#allocation2 + $0x20] sm:$0xff]  ;;  %v2100_v17 = vld [vmem:[#allocation2 + $0x38] sm:$0xff] }
 0x209   : > { %v2124_v46 = vadd.f32 %v2123_v40, %v2092_v18  ;;  %v2130_v33 = vadd.f32 %v2129_v26, %v2093_v41  ;;  %v2136_v39 = vadd.f32 %v2135_v27, %v2094_v23  ;;  %v2147_v57 = vrot.slane %v2096_v24, 4  ;;  %v2101_v2 = vld [vmem:[#allocation2 + $0x60] sm:$0xff]  ;;  %v2103_v31 = vld [vmem:[#allocation2 + $0x78] sm:$0xff] }
 0x20a   : > { %v2107_v59 = vrot.slane %v2106_v62, 2  ;;  %v2113_v1 = vrot.slane %v2112_v29, 2  ;;  %v2119_v55 = vrot.slane %v2118_v9, 2  ;;  %v2142_v5 = vadd.f32 %v2141_v30, %v2095_v58 }
 0x20b   : > { %v2125_v0 = vrot.slane %v2124_v46, 2  ;;  %v2131_v45 = vrot.slane %v2130_v33, 2  ;;  %v2137_v60 = vrot.slane %v2136_v39, 2  ;;  %v2148_v54 = vadd.f32 %v2147_v57, %v2096_v24  ;;  %v2102_v20 = vld [vmem:[#allocation2 + $0x70] sm:$0xff]  ;;  %v2104_v14 = vld [vmem:[#allocation2 + $0x28] sm:$0xff] }
 0x20c   : > { %v2108_v48 = vadd.f32 %v2107_v59, %v2106_v62  ;;  %v2114_v56 = vadd.f32 %v2113_v1, %v2112_v29  ;;  %v2120_v35 = vadd.f32 %v2119_v55, %v2118_v9  ;;  %v2143_v8 = vrot.slane %v2142_v5, 2 }
 0x20d   : > { %v2126_v63 = vadd.f32 %v2125_v0, %v2124_v46  ;;  %v2132_v10 = vadd.f32 %v2131_v45, %v2130_v33  ;;  %v2138_v11 = vadd.f32 %v2137_v60, %v2136_v39  ;;  %v2149_v6 = vrot.slane %v2148_v54, 2 }
 0x20e   : > { %v2109_v4 = vrot.slane %v2108_v48, 1  ;;  %v2115_v53 = vrot.slane %v2114_v56, 1  ;;  %v2121_v52 = vrot.slane %v2120_v35, 1  ;;  %v2144_v37 = vadd.f32 %v2143_v8, %v2142_v5 }
 0x20f   : > { %v2127_v16 = vrot.slane %v2126_v63, 1  ;;  %v2133_v21 = vrot.slane %v2132_v10, 1  ;;  %v2139_v12 = vrot.slane %v2138_v11, 1  ;;  %v2150_v42 = vadd.f32 %v2149_v6, %v2148_v54 }
 0x210   : > { %v2110_v22 = vadd.f32 %v2109_v4, %v2108_v48  ;;  %v2116_v15 = vadd.f32 %v2115_v53, %v2114_v56  ;;  %v2122_v47 = vadd.f32 %v2121_v52, %v2120_v35  ;;  %v2145_v13 = vrot.slane %v2144_v37, 1 }
 0x211   : > { %v2128_v32 = vadd.f32 %v2127_v16, %v2126_v63  ;;  %v2134_v44 = vadd.f32 %v2133_v21, %v2132_v10  ;;  %v2140_v28 = vadd.f32 %v2139_v12, %v2138_v11  ;;  %v2151_v43 = vrot.slane %v2150_v42, 1 }
 0x212   : > { %v2146_v38 = vadd.f32 %v2145_v13, %v2144_v37  ;;  %v2153_v36 = vrot.slane %v2097_v34, 4  ;;  %v2159_v18 = vrot.slane %v2098_v7, 4  ;;  %v2165_v41 = vrot.slane %v2099_v61, 4 }
 0x213   : > { %v2152_v23 = vadd.f32 %v2151_v43, %v2150_v42  ;;  %v2171_v49 = vrot.slane %v2100_v17, 4  ;;  %v2177_v25 = vrot.slane %v2101_v2, 4  ;;  %v2183_v50 = vrot.slane %v2102_v20, 4 }
 0x214   : > { %v2154_v58 = vadd.f32 %v2153_v36, %v2097_v34  ;;  %v2160_v24 = vadd.f32 %v2159_v18, %v2098_v7  ;;  %v2166_v40 = vadd.f32 %v2165_v41, %v2099_v61  ;;  %v2189_v26 = vrot.slane %v2103_v31, 4 }
 0x215   : > { %v2172_v27 = vadd.f32 %v2171_v49, %v2100_v17  ;;  %v2178_v51 = vadd.f32 %v2177_v25, %v2101_v2  ;;  %v2184_v62 = vadd.f32 %v2183_v50, %v2102_v20  ;;  %v2195_v29 = vrot.slane %v2104_v14, 4 }
 0x216   : > { %v2155_v9 = vrot.slane %v2154_v58, 2  ;;  %v2161_v30 = vrot.slane %v2160_v24, 2  ;;  %v2167_v46 = vrot.slane %v2166_v40, 2  ;;  %v2190_v33 = vadd.f32 %v2189_v26, %v2103_v31 }
 0x217   : > { %v2173_v39 = vrot.slane %v2172_v27, 2  ;;  %v2179_v57 = vrot.slane %v2178_v51, 2  ;;  %v2185_v59 = vrot.slane %v2184_v62, 2  ;;  %v2196_v1 = vadd.f32 %v2195_v29, %v2104_v14 }
 0x218   : > { %v2156_v55 = vadd.f32 %v2155_v9, %v2154_v58  ;;  %v2162_v5 = vadd.f32 %v2161_v30, %v2160_v24  ;;  %v2168_v0 = vadd.f32 %v2167_v46, %v2166_v40  ;;  %v2191_v45 = vrot.slane %v2190_v33, 2 }
 0x219   : > { %v2174_v60 = vadd.f32 %v2173_v39, %v2172_v27  ;;  %v2180_v54 = vadd.f32 %v2179_v57, %v2178_v51  ;;  %v2186_v48 = vadd.f32 %v2185_v59, %v2184_v62  ;;  %v2197_v56 = vrot.slane %v2196_v1, 2 }
 0x21a   : > { %v2157_v35 = vrot.slane %v2156_v55, 1  ;;  %v2163_v8 = vrot.slane %v2162_v5, 1  ;;  %v2169_v63 = vrot.slane %v2168_v0, 1  ;;  %v2192_v10 = vadd.f32 %v2191_v45, %v2190_v33 }
 0x21b   : > { %v2175_v11 = vrot.slane %v2174_v60, 1  ;;  %v2181_v6 = vrot.slane %v2180_v54, 1  ;;  %v2187_v4 = vrot.slane %v2186_v48, 1  ;;  %v2198_v53 = vadd.f32 %v2197_v56, %v2196_v1 }
 0x21c   : > { %v2158_v52 = vadd.f32 %v2157_v35, %v2156_v55  ;;  %v2164_v37 = vadd.f32 %v2163_v8, %v2162_v5  ;;  %v2170_v34 = vadd.f32 %v2169_v63, %v2168_v0  ;;  %v2193_v7 = vrot.slane %v2192_v10, 1 }
 0x21d   : > { %v2176_v61 = vadd.f32 %v2175_v11, %v2174_v60  ;;  %v2182_v16 = vadd.f32 %v2181_v6, %v2180_v54  ;;  %v2188_v21 = vadd.f32 %v2187_v4, %v2186_v48  ;;  %v2199_v12 = vrot.slane %v2198_v53, 1 }
 0x21e   : > { %v2194_v42 = vadd.f32 %v2193_v7, %v2192_v10  ;;  %v2201_v17 = vmul.f32 0.00390625, %v2110_v22  ;;  %v2202_v2 = vmul.f32 0.00390625, %v2116_v15  ;;  %v2203_v20 = vmul.f32 0.00390625, %v2122_v47 }
 0x21f   : > { %v2200_v13 = vadd.f32 %v2199_v12, %v2198_v53  ;;  %v2204_v31 = vmul.f32 0.00390625, %v2128_v32  ;;  %v2205_v43 = vmul.f32 0.00390625, %v2134_v44  ;;  %v2206_v14 = vmul.f32 0.00390625, %v2140_v28 }
 0x220   : > { %v2207_v36 = vmul.f32 0.00390625, %v2146_v38  ;;  %v2208_v18 = vmul.f32 0.00390625, %v2152_v23  ;;  %v2209_v41 = vmul.f32 0.00390625, %v2158_v52  ;;  %v2210_v49 = vmul.f32 0.00390625, %v2164_v37 }
 0x221   : > { %v2211_v25 = vmul.f32 0.00390625, %v2170_v34  ;;  %v2212_v50 = vmul.f32 0.00390625, %v2176_v61  ;;  %v2213_v58 = vmul.f32 0.00390625, %v2182_v16  ;;  %v2214_v24 = vmul.f32 0.00390625, %v2188_v21 }
 0x222   : > { %v2215_v40 = vmul.f32 0.00390625, %v2194_v42  ;;  %v2216_v26 = vmul.f32 0.00390625, %v2200_v13  ;;  %v2233_v27 = vcombine.low %v2201_v17, %v2202_v2  ;;  %v2234_v51 = vcombine.low %v2203_v20, %v2204_v31 }
 0x223   : > { %v2235_v62 = vcombine.low %v2205_v43, %v2206_v14  ;;  %v2236_v22 = vcombine.low %v2207_v36, %v2208_v18  ;;  %v2239_v15 = vunpack.c.0.s8 %v3460_v3  ;;  %v2282_v47 = vcombine.low %v2209_v41, %v2210_v49 }
 0x224   : > { %v2283_v32 = vcombine.low %v2211_v25, %v2212_v50  ;;  %v2284_v44 = vcombine.low %v2213_v58, %v2214_v24  ;;  %v2285_v28 = vcombine.low %v2215_v40, %v2216_v26 }
 0x225   : > { %v2242_v38 = vsub.s32 %v2239_v15, %v3069_v19 }
 0x227   : > { %v2243_v23 = vrot.slane %v2233_v27, %v2242_v38  ;;  %v2250_v29 = vrot.slane %v2234_v51, %v2242_v38  ;;  %v2257_v9 = vrot.slane %v2235_v62, %v2242_v38  ;;  %v2264_v30 = vrot.slane %v2236_v22, %v2242_v38 }
 0x228   : > { %v2292_v46 = vrot.slane %v2282_v47, %v2242_v38  ;;  %v2299_v33 = vrot.slane %v2283_v32, %v2242_v38  ;;  %v2306_v39 = vrot.slane %v2284_v44, %v2242_v38  ;;  %v2313_v57 = vrot.slane %v2285_v28, %v2242_v38 }
 0x229   : > { %v2265_v59 = vcombine.low %v2243_v23, %v2250_v29  ;;  %v2266_v1 = vcombine.low %v2257_v9, %v2264_v30 }
 0x22a   : > { %v2314_v55 = vcombine.low %v2292_v46, %v2299_v33  ;;  %v2315_v3 = vcombine.low %v2306_v39, %v2313_v57 }
 0x22b   : > { %v2273_v5 = vrot.slane %v2265_v59, %v2242_v38  ;;  %v2280_v0 = vrot.slane %v2266_v1, %v2242_v38 }
 0x22c   : > { %v2322_v45 = vrot.slane %v2314_v55, %v2242_v38  ;;  %v2329_v60 = vrot.slane %v2315_v3, %v2242_v38 }
 0x22d   : > { %v2281_v54 = vcombine.low %v2273_v5, %v2280_v0 }
 0x22e   : > { %v2330_v19 = vcombine.low %v2322_v45, %v2329_v60 }
 0x22f   : > { %2333 = vst [vmem:[%s2789_s6] sm:$0xff] %v2281_v54 }
 0x230   : > { %2334 = vst [vmem:[%s2789_s6 + $0x8] sm:$0xff] %v2330_v19 }
 0x231 PF: > { %s14_s16 = sadd.s32 1, %s2701_s16   ;;  %s3487_s12 = smov %s2693_s14 }
 0x232   : > { %p11_p6 = scmp.ge.s32.totalorder %s14_s16, 6   ;;  %s3488_s13 = smov %s2697_s15 }
 0x233   : > { %s3489_s14 = smov %s3492_s18  ;;  %s3490_s15 = smov %s3496_s19 }
 0x234   :  { %13 = sbr.rel (!%p11_p6) target bundleno = 3 (0x3), region = 79 }
 0x239   :  { %2363 = vsyncpa [#allocation4], 1 }
 0x23a   :  { %2365 = vsyncpa [#allocation4 + $0x1], 1 }

// kernel: _lambda_.3
= control target key start
LH: loop header
LB: loop body
LE: loop exit
PB: predicated region body
PF: predicated region fallthrough
CT: control target
= control target key end

     0   :  { %v538_v36 = vlaneseq  ;;  %v5682_v37 = vmov 1966171168   ;;  %s7512_s0 = inlined_call_operand.vmem [shape: bf16[2,2048], index: 0, kind: input, shape index: {}]   ;;  %s7513_s1 = inlined_call_operand.vmem [shape: bf16[2048,512], index: 1, kind: input, shape index: {}]   ;;  %s7514_s2 = inlined_call_operand.vmem [shape: f32[1,512], index: 2, kind: input, shape index: {}]   ;;  %s7515_s3 = inlined_call_operand.vmem [shape: bf16[512,128], index: 3, kind: input, shape index: {}]   ;;  %s7516_s4 = inlined_call_operand.vmem [shape: f32[1,128], index: 4, kind: input, shape index: {}]   ;;  %s7517_s5 = inlined_call_operand.hbm [shape: f32[2,128], index: 5, kind: output, shape index: {}]  }
   0x1   :  { %v4855_v0 = vld [vmem:[%s7513_s1 + $0xe4] ss:$16 sps:$4 sm:$0xff]   ;;  %v4859_v2 = vld [vmem:[%s7513_s1 + $0xe0] ss:$16 sps:$4 sm:$0xff]   ;;  %v562_v38 = vunpack.c.l.s4 %v5682_v37 }
   0x2   :  { %v4857_v1 = vld [vmem:[%s7513_s1 + $0x2e4] ss:$16 sps:$4 sm:$0xff]   ;;  %3234 = vmatprep.subr.bf16.mxu0 %v4855_v0  ;;  %v4860_v3 = vld [vmem:[%s7513_s1 + $0x2e0] ss:$16 sps:$4 sm:$0xff]   ;;  %v5831_v42 = vshrl.u32 %v538_v36, 7 }
   0x3   :  { %3275 = vmatprep.subr.bf16.mxu1 %v4857_v1  ;;  %v4861_v4 = vld [vmem:[%s7513_s1 + $0xc4] ss:$16 sps:$4 sm:$0xff]   ;;  %3235 = vmatpush1.bf16.msra.mxu0 %v4859_v2  ;;  %v4865_v6 = vld [vmem:[%s7513_s1 + $0xc0] ss:$16 sps:$4 sm:$0xff]   ;;  %v563_v43 = vunpack.c.0.s8 %v562_v38 }
   0x4   :  { %3276 = vmatpush1.bf16.msra.mxu1 %v4860_v3  ;;  %v4863_v5 = vld [vmem:[%s7513_s1 + $0x2c4] ss:$16 sps:$4 sm:$0xff]   ;;  %3236 = vmatprep.subr.bf16.mxu0 %v4861_v4  ;;  %v4866_v7 = vld [vmem:[%s7513_s1 + $0x2c0] ss:$16 sps:$4 sm:$0xff]  }
   0x5   :  { %3277 = vmatprep.subr.bf16.mxu1 %v4863_v5  ;;  %v4867_v8 = vld [vmem:[%s7513_s1 + $0xa4] ss:$16 sps:$4 sm:$0xff]   ;;  %v4871_v10 = vld [vmem:[%s7513_s1 + $0xa0] ss:$16 sps:$4 sm:$0xff]   ;;  %v5849_v49 = vsub.s32 %v563_v43, %v5831_v42 }
   0x6   :  { %v4869_v9 = vld [vmem:[%s7513_s1 + $0x2a4] ss:$16 sps:$4 sm:$0xff]   ;;  %v4872_v11 = vld [vmem:[%s7513_s1 + $0x2a0] ss:$16 sps:$4 sm:$0xff]  }
   0x7   :  { %3237 = vmatpush1.bf16.msra.mxu0 %v4865_v6  ;;  %v4873_v12 = vld [vmem:[%s7513_s1 + $0x84] ss:$16 sps:$4 sm:$0xff]   ;;  %v4877_v14 = vld [vmem:[%s7513_s1 + $0x80] ss:$16 sps:$4 sm:$0xff]  }
   0x8   :  { %3278 = vmatpush1.bf16.msra.mxu1 %v4866_v7  ;;  %3238 = vmatprep.subr.bf16.mxu0 %v4867_v8  ;;  %v4875_v13 = vld [vmem:[%s7513_s1 + $0x284] ss:$16 sps:$4 sm:$0xff]   ;;  %v4878_v15 = vld [vmem:[%s7513_s1 + $0x280] ss:$16 sps:$4 sm:$0xff]  }
   0x9   :  { %3279 = vmatprep.subr.bf16.mxu1 %v4869_v9  ;;  %v4879_v16 = vld [vmem:[%s7513_s1 + $0x64] ss:$16 sps:$4 sm:$0xff]   ;;  %v4883_v18 = vld [vmem:[%s7513_s1 + $0x60] ss:$16 sps:$4 sm:$0xff]  }
   0xa   :  { %v4881_v17 = vld [vmem:[%s7513_s1 + $0x264] ss:$16 sps:$4 sm:$0xff]   ;;  %v4884_v19 = vld [vmem:[%s7513_s1 + $0x260] ss:$16 sps:$4 sm:$0xff]  }
   0xb   :  { %3239 = vmatpush1.bf16.msra.mxu0 %v4871_v10  ;;  %v4885_v20 = vld [vmem:[%s7513_s1 + $0x44] ss:$16 sps:$4 sm:$0xff]   ;;  %v4889_v22 = vld [vmem:[%s7513_s1 + $0x40] ss:$16 sps:$4 sm:$0xff]  }
   0xc   :  { %3280 = vmatpush1.bf16.msra.mxu1 %v4872_v11  ;;  %3240 = vmatprep.subr.bf16.mxu0 %v4873_v12  ;;  %v4887_v21 = vld [vmem:[%s7513_s1 + $0x244] ss:$16 sps:$4 sm:$0xff]   ;;  %v4890_v23 = vld [vmem:[%s7513_s1 + $0x240] ss:$16 sps:$4 sm:$0xff]  }
   0xd   :  { %3281 = vmatprep.subr.bf16.mxu1 %v4875_v13  ;;  %v4891_v24 = vld [vmem:[%s7513_s1 + $0x24] ss:$16 sps:$4 sm:$0xff]   ;;  %v4895_v26 = vld [vmem:[%s7513_s1 + $0x20] ss:$16 sps:$4 sm:$0xff]  }
   0xe   :  { %v4893_v25 = vld [vmem:[%s7513_s1 + $0x224] ss:$16 sps:$4 sm:$0xff]   ;;  %v4896_v27 = vld [vmem:[%s7513_s1 + $0x220] ss:$16 sps:$4 sm:$0xff]  }
   0xf   :  { %3241 = vmatpush1.bf16.msra.mxu0 %v4877_v14  ;;  %v4897_v28 = vld [vmem:[%s7513_s1 + $0x4] ss:$16 sps:$4 sm:$0xff]   ;;  %v4901_v30 = vld [vmem:[%s7513_s1] ss:$16 sps:$4 sm:$0xff]  }
  0x10   :  { %3282 = vmatpush1.bf16.msra.mxu1 %v4878_v15  ;;  %3242 = vmatprep.subr.bf16.mxu0 %v4879_v16  ;;  %v4899_v29 = vld [vmem:[%s7513_s1 + $0x204] ss:$16 sps:$4 sm:$0xff]   ;;  %v4902_v31 = vld [vmem:[%s7513_s1 + $0x200] ss:$16 sps:$4 sm:$0xff]  }
  0x11   :  { %3283 = vmatprep.subr.bf16.mxu1 %v4881_v17  ;;  %v4903_v32 = vld [vmem:[%s7513_s1 + $0x1e4] ss:$16 sps:$4 sm:$0xff]   ;;  %v4907_v34 = vld [vmem:[%s7513_s1 + $0x1e0] ss:$16 sps:$4 sm:$0xff]  }
  0x12   :  { %v4905_v33 = vld [vmem:[%s7513_s1 + $0x3e4] ss:$16 sps:$4 sm:$0xff]   ;;  %v4908_v35 = vld [vmem:[%s7513_s1 + $0x3e0] ss:$16 sps:$4 sm:$0xff]  }
  0x13   :  { %3243 = vmatpush1.bf16.msra.mxu0 %v4883_v18  ;;  %v4909_v39 = vld [vmem:[%s7513_s1 + $0x1c4] ss:$16 sps:$4 sm:$0xff]   ;;  %v4913_v41 = vld [vmem:[%s7513_s1 + $0x1c0] ss:$16 sps:$4 sm:$0xff]  }
  0x14   :  { %3284 = vmatpush1.bf16.msra.mxu1 %v4884_v19  ;;  %3244 = vmatprep.subr.bf16.mxu0 %v4885_v20  ;;  %v4911_v40 = vld [vmem:[%s7513_s1 + $0x3c4] ss:$16 sps:$4 sm:$0xff]   ;;  %v4914_v44 = vld [vmem:[%s7513_s1 + $0x3c0] ss:$16 sps:$4 sm:$0xff]  }
  0x15   :  { %3285 = vmatprep.subr.bf16.mxu1 %v4887_v21  ;;  %v4915_v45 = vld [vmem:[%s7513_s1 + $0x1a4] ss:$16 sps:$4 sm:$0xff]   ;;  %v4919_v47 = vld [vmem:[%s7513_s1 + $0x1a0] ss:$16 sps:$4 sm:$0xff]  }
  0x16   :  { %v4917_v46 = vld [vmem:[%s7513_s1 + $0x3a4] ss:$16 sps:$4 sm:$0xff]   ;;  %v4920_v48 = vld [vmem:[%s7513_s1 + $0x3a0] ss:$16 sps:$4 sm:$0xff]  }
  0x17   :  { %3245 = vmatpush1.bf16.msra.mxu0 %v4889_v22  ;;  %v4921_v50 = vld [vmem:[%s7513_s1 + $0x184] ss:$16 sps:$4 sm:$0xff]   ;;  %v4925_v53 = vld [vmem:[%s7513_s1 + $0x180] ss:$16 sps:$4 sm:$0xff]  }
  0x18   :  { %3286 = vmatpush1.bf16.msra.mxu1 %v4890_v23  ;;  %3246 = vmatprep.subr.bf16.mxu0 %v4891_v24  ;;  %v4923_v51 = vld [vmem:[%s7513_s1 + $0x384] ss:$16 sps:$4 sm:$0xff]   ;;  %v4926_v55 = vld [vmem:[%s7513_s1 + $0x380] ss:$16 sps:$4 sm:$0xff]  }
  0x19   :  { %3287 = vmatprep.subr.bf16.mxu1 %v4893_v25  ;;  %v22_v52 = vld [vmem:[%s7512_s0] sm:$0xff] }
  0x1a   :  { %v567_v54 = vrot.slane %v22_v52, %v5849_v49  ;;  %v4927_v56 = vld [vmem:[%s7513_s1 + $0x164] ss:$16 sps:$4 sm:$0xff]   ;;  %v4931_v59 = vld [vmem:[%s7513_s1 + $0x160] ss:$16 sps:$4 sm:$0xff]   ;;  %v560_v1 = vcombine.high %v22_v52, %v22_v52 }
  0x1b   :  { %3247 = vmatpush1.bf16.msra.mxu0 %v4895_v26  ;;  %v4929_v57 = vld [vmem:[%s7513_s1 + $0x364] ss:$16 sps:$4 sm:$0xff]   ;;  %v4932_v61 = vld [vmem:[%s7513_s1 + $0x360] ss:$16 sps:$4 sm:$0xff]  }
  0x1c   :  { %3288 = vmatpush1.bf16.msra.mxu1 %v4896_v27  ;;  %3248 = vmatprep.subr.bf16.mxu0 %v4897_v28  ;;  %v575_v58 = vcombine.high %v567_v54, %v567_v54  ;;  %v4933_v62 = vld [vmem:[%s7513_s1 + $0x144] ss:$16 sps:$4 sm:$0xff]   ;;  %v4937_v2 = vld [vmem:[%s7513_s1 + $0x140] ss:$16 sps:$4 sm:$0xff]   ;;  %v5907_v6 = vrot.slane %v560_v1, %v5849_v49  ;;  %v5927_v13 = vrot.slane %v567_v54, %v5849_v49 }
  0x1d   :  { %3289 = vmatprep.subr.bf16.mxu1 %v4899_v29  ;;  %v4935_v63 = vld [vmem:[%s7513_s1 + $0x344] ss:$16 sps:$4 sm:$0xff]   ;;  %v4938_v3 = vld [vmem:[%s7513_s1 + $0x340] ss:$16 sps:$4 sm:$0xff]  }
  0x1e   :  { %v5877_v60 = vrot.slane %v575_v58, %v5849_v49  ;;  %v4939_v4 = vld [vmem:[%s7513_s1 + $0x124] ss:$16 sps:$4 sm:$0xff]   ;;  %v4943_v7 = vld [vmem:[%s7513_s1 + $0x120] ss:$16 sps:$4 sm:$0xff]   ;;  %v576_v11 = vcombine.high %v5907_v6, %v5907_v6  ;;  %v5943_v18 = vcombine.high %v5927_v13, %v5927_v13 }
  0x1f   :  { %3249 = vmatpush1.bf16.msra.mxu0 %v4901_v30  ;;  %v4941_v5 = vld [vmem:[%s7513_s1 + $0x324] ss:$16 sps:$4 sm:$0xff]   ;;  %v4944_v8 = vld [vmem:[%s7513_s1 + $0x320] ss:$16 sps:$4 sm:$0xff]  }
  0x20   :  { %3290 = vmatpush1.bf16.msra.mxu1 %v4902_v31  ;;  %3250 = vmatprep.subr.bf16.mxu0 %v4903_v32  ;;  %v5890_v0 = vcombine.high %v5877_v60, %v5877_v60  ;;  %v4945_v9 = vld [vmem:[%s7513_s1 + $0x104] ss:$16 sps:$4 sm:$0xff]   ;;  %v4949_v12 = vld [vmem:[%s7513_s1 + $0x100] ss:$16 sps:$4 sm:$0xff]   ;;  %v5939_v17 = vrot.slane %v576_v11, %v5849_v49 }
  0x21   :  { %3291 = vmatprep.subr.bf16.mxu1 %v4905_v33  ;;  %3266 = vmatprep.mubr.bf16.mxu0 %v5877_v60  ;;  %v4947_v10 = vld [vmem:[%s7513_s1 + $0x304] ss:$16 sps:$4 sm:$0xff]   ;;  %v4950_v14 = vld [vmem:[%s7513_s1 + $0x300] ss:$16 sps:$4 sm:$0xff]  }
  0x22   :  { %3307 = vmatprep.mubr.bf16.mxu1 %v5890_v0  ;;  %v4953_v15 = vld [vmem:[%s7513_s1 + $0x4e4] ss:$16 sps:$4 sm:$0xff]   ;;  %v4951_v19 = vld [vmem:[%s7513_s1 + $0x4e0] ss:$16 sps:$4 sm:$0xff]   ;;  %v5959_v23 = vcombine.high %v5939_v17, %v5939_v17 }
  0x23   :  { %3251 = vmatpush2.bf16.msra.mxu0 %v4907_v34  ;;  %v4956_v16 = vld [vmem:[%s7513_s1 + $0x6e4] ss:$16 sps:$4 sm:$0xff]   ;;  %v4954_v20 = vld [vmem:[%s7513_s1 + $0x6e0] ss:$16 sps:$4 sm:$0xff]  }
  0x24   :  { %3292 = vmatpush2.bf16.msra.mxu1 %v4908_v35  ;;  %3252 = vmatprep.subr.bf16.mxu0 %v4909_v39  ;;  %v4959_v21 = vld [vmem:[%s7513_s1 + $0x4c4] ss:$16 sps:$4 sm:$0xff]   ;;  %v4957_v24 = vld [vmem:[%s7513_s1 + $0x4c0] ss:$16 sps:$4 sm:$0xff]  }
  0x25   :  { %3293 = vmatprep.subr.bf16.mxu1 %v4911_v40  ;;  %v4962_v22 = vld [vmem:[%s7513_s1 + $0x6c4] ss:$16 sps:$4 sm:$0xff]   ;;  %v4960_v25 = vld [vmem:[%s7513_s1 + $0x6c0] ss:$16 sps:$4 sm:$0xff]  }
  0x26   :  { %v4965_v26 = vld [vmem:[%s7513_s1 + $0x4a4] ss:$16 sps:$4 sm:$0xff]   ;;  %v4963_v28 = vld [vmem:[%s7513_s1 + $0x4a0] ss:$16 sps:$4 sm:$0xff]  }
  0x27   :  { %3253 = vmatpush2.bf16.msra.mxu0 %v4913_v41  ;;  %v4968_v27 = vld [vmem:[%s7513_s1 + $0x6a4] ss:$16 sps:$4 sm:$0xff]   ;;  %v4966_v29 = vld [vmem:[%s7513_s1 + $0x6a0] ss:$16 sps:$4 sm:$0xff]  }
  0x28   :  { %3294 = vmatpush2.bf16.msra.mxu1 %v4914_v44  ;;  %3254 = vmatprep.subr.bf16.mxu0 %v4915_v45  ;;  %v4971_v30 = vld [vmem:[%s7513_s1 + $0x484] ss:$16 sps:$4 sm:$0xff]   ;;  %v4969_v32 = vld [vmem:[%s7513_s1 + $0x480] ss:$16 sps:$4 sm:$0xff]  }
  0x29   :  { %3295 = vmatprep.subr.bf16.mxu1 %v4917_v46  ;;  %v4974_v31 = vld [vmem:[%s7513_s1 + $0x684] ss:$16 sps:$4 sm:$0xff]   ;;  %v4972_v33 = vld [vmem:[%s7513_s1 + $0x680] ss:$16 sps:$4 sm:$0xff]  }
  0x2a   :  { %v4977_v34 = vld [vmem:[%s7513_s1 + $0x464] ss:$16 sps:$4 sm:$0xff]   ;;  %v4975_v36 = vld [vmem:[%s7513_s1 + $0x460] ss:$16 sps:$4 sm:$0xff]  }
  0x2b   :  { %3255 = vmatpush2.bf16.msra.mxu0 %v4919_v47  ;;  %v4980_v35 = vld [vmem:[%s7513_s1 + $0x664] ss:$16 sps:$4 sm:$0xff]   ;;  %v4978_v37 = vld [vmem:[%s7513_s1 + $0x660] ss:$16 sps:$4 sm:$0xff]  }
  0x2c   :  { %3296 = vmatpush2.bf16.msra.mxu1 %v4920_v48  ;;  %3256 = vmatprep.subr.bf16.mxu0 %v4921_v50  ;;  %v4983_v38 = vld [vmem:[%s7513_s1 + $0x444] ss:$16 sps:$4 sm:$0xff]   ;;  %v4981_v40 = vld [vmem:[%s7513_s1 + $0x440] ss:$16 sps:$4 sm:$0xff]  }
  0x2d   :  { %3297 = vmatprep.subr.bf16.mxu1 %v4923_v51  ;;  %v4986_v39 = vld [vmem:[%s7513_s1 + $0x644] ss:$16 sps:$4 sm:$0xff]   ;;  %v4984_v41 = vld [vmem:[%s7513_s1 + $0x640] ss:$16 sps:$4 sm:$0xff]  }
  0x2e   :  { %v4989_v43 = vld [vmem:[%s7513_s1 + $0x424] ss:$16 sps:$4 sm:$0xff]   ;;  %v4987_v45 = vld [vmem:[%s7513_s1 + $0x420] ss:$16 sps:$4 sm:$0xff]  }
  0x2f   :  { %3257 = vmatpush2.bf16.msra.mxu0 %v4925_v53  ;;  %v4992_v44 = vld [vmem:[%s7513_s1 + $0x624] ss:$16 sps:$4 sm:$0xff]   ;;  %v4990_v46 = vld [vmem:[%s7513_s1 + $0x620] ss:$16 sps:$4 sm:$0xff]  }
  0x30   :  { %3298 = vmatpush2.bf16.msra.mxu1 %v4926_v55  ;;  %3258 = vmatprep.subr.bf16.mxu0 %v4927_v56  ;;  %v4995_v47 = vld [vmem:[%s7513_s1 + $0x404] ss:$16 sps:$4 sm:$0xff]   ;;  %v4993_v50 = vld [vmem:[%s7513_s1 + $0x400] ss:$16 sps:$4 sm:$0xff]  }
  0x31   :  { %3299 = vmatprep.subr.bf16.mxu1 %v4929_v57  ;;  %v4998_v48 = vld [vmem:[%s7513_s1 + $0x604] ss:$16 sps:$4 sm:$0xff]   ;;  %v4996_v51 = vld [vmem:[%s7513_s1 + $0x600] ss:$16 sps:$4 sm:$0xff]  }
  0x32   :  { %v5001_v52 = vld [vmem:[%s7513_s1 + $0x5e4] ss:$16 sps:$4 sm:$0xff]   ;;  %v4999_v54 = vld [vmem:[%s7513_s1 + $0x5e0] ss:$16 sps:$4 sm:$0xff]  }
  0x33   :  { %3259 = vmatpush2.bf16.msra.mxu0 %v4931_v59  ;;  %v5004_v53 = vld [vmem:[%s7513_s1 + $0x7e4] ss:$16 sps:$4 sm:$0xff]   ;;  %v5002_v55 = vld [vmem:[%s7513_s1 + $0x7e0] ss:$16 sps:$4 sm:$0xff]  }
  0x34   :  { %3300 = vmatpush2.bf16.msra.mxu1 %v4932_v61  ;;  %3260 = vmatprep.subr.bf16.mxu0 %v4933_v62  ;;  %v5007_v56 = vld [vmem:[%s7513_s1 + $0x5c4] ss:$16 sps:$4 sm:$0xff]   ;;  %v5005_v58 = vld [vmem:[%s7513_s1 + $0x5c0] ss:$16 sps:$4 sm:$0xff]  }
  0x35   :  { %3301 = vmatprep.subr.bf16.mxu1 %v4935_v63  ;;  %v5010_v57 = vld [vmem:[%s7513_s1 + $0x7c4] ss:$16 sps:$4 sm:$0xff]   ;;  %v5008_v59 = vld [vmem:[%s7513_s1 + $0x7c0] ss:$16 sps:$4 sm:$0xff]  }
  0x36   :  { %v5013_v61 = vld [vmem:[%s7513_s1 + $0x5a4] ss:$16 sps:$4 sm:$0xff]   ;;  %v5011_v63 = vld [vmem:[%s7513_s1 + $0x5a0] ss:$16 sps:$4 sm:$0xff]  }
  0x37   :  { %3261 = vmatpush2.bf16.msra.mxu0 %v4937_v2  ;;  %v5016_v62 = vld [vmem:[%s7513_s1 + $0x7a4] ss:$16 sps:$4 sm:$0xff]   ;;  %v5014_v1 = vld [vmem:[%s7513_s1 + $0x7a0] ss:$16 sps:$4 sm:$0xff]  }
  0x38   :  { %3302 = vmatpush2.bf16.msra.mxu1 %v4938_v3  ;;  %3262 = vmatprep.subr.bf16.mxu0 %v4939_v4  ;;  %v5019_v2 = vld [vmem:[%s7513_s1 + $0x584] ss:$16 sps:$4 sm:$0xff]   ;;  %v5017_v4 = vld [vmem:[%s7513_s1 + $0x580] ss:$16 sps:$4 sm:$0xff]  }
  0x39   :  { %3303 = vmatprep.subr.bf16.mxu1 %v4941_v5  ;;  %v5022_v3 = vld [vmem:[%s7513_s1 + $0x784] ss:$16 sps:$4 sm:$0xff]   ;;  %v5020_v5 = vld [vmem:[%s7513_s1 + $0x780] ss:$16 sps:$4 sm:$0xff]  }
  0x3a   :  { %v5031_v11 = vld [vmem:[%s7513_s1 + $0x544] ss:$16 sps:$4 sm:$0xff]  }
  0x3b   :  { %3263 = vmatpush2.bf16.msra.mxu0 %v4943_v7  ;;  %v5025_v7 = vld [vmem:[%s7513_s1 + $0x564] ss:$16 sps:$4 sm:$0xff]  }
  0x3c   :  { %3304 = vmatpush2.bf16.msra.mxu1 %v4944_v8  ;;  %3264 = vmatprep.subr.bf16.mxu0 %v4945_v9  ;;  %v5028_v8 = vld [vmem:[%s7513_s1 + $0x764] ss:$16 sps:$4 sm:$0xff]   ;;  %v5023_v9 = vld [vmem:[%s7513_s1 + $0x560] ss:$16 sps:$4 sm:$0xff]  }
  0x3d   :  { %3305 = vmatprep.subr.bf16.mxu1 %v4947_v10  ;;  %v5026_v10 = vld [vmem:[%s7513_s1 + $0x760] ss:$16 sps:$4 sm:$0xff]  }
  0x3f   :  { %3265 = vmatpush2.bf16.msra.mxu0 %v4949_v12  ;;  %v5034_v12 = vld [vmem:[%s7513_s1 + $0x744] ss:$16 sps:$4 sm:$0xff]  }
  0x40   :  { %3306 = vmatpush2.bf16.msra.mxu1 %v4950_v14  ;;  %3316 = vmatprep.subr.bf16.mxu0 %v4953_v15  ;;  %v5029_v14 = vld [vmem:[%s7513_s1 + $0x540] ss:$16 sps:$4 sm:$0xff]  }
  0x41   :  { %3357 = vmatprep.subr.bf16.mxu1 %v4956_v16  ;;  %v5032_v15 = vld [vmem:[%s7513_s1 + $0x740] ss:$16 sps:$4 sm:$0xff]   ;;  %v5037_v16 = vld [vmem:[%s7513_s1 + $0x524] ss:$16 sps:$4 sm:$0xff]  }
  0x42   :  { %3267 = vmatmul.mubr.bf16.vlgmr.msra.gmra.mxu0 %v5927_v13 }
  0x43   :  { %3308 = vmatmul.mubr.bf16.vlgmr.msra.gmra.mxu1 %v5943_v18  ;;  %3317 = vmatpush1.bf16.msra.mxu0 %v4951_v19  ;;  %v5040_v19 = vld [vmem:[%s7513_s1 + $0x724] ss:$16 sps:$4 sm:$0xff]  }
  0x44   :  { %3358 = vmatpush1.bf16.msra.mxu1 %v4954_v20  ;;  %3318 = vmatprep.subr.bf16.mxu0 %v4959_v21  ;;  %v5035_v20 = vld [vmem:[%s7513_s1 + $0x520] ss:$16 sps:$4 sm:$0xff]  }
  0x45   :  { %3359 = vmatprep.subr.bf16.mxu1 %v4962_v22  ;;  %3348 = vmatprep.mubr.bf16.mxu0 %v5939_v17  ;;  %v5038_v21 = vld [vmem:[%s7513_s1 + $0x720] ss:$16 sps:$4 sm:$0xff]   ;;  %v5043_v22 = vld [vmem:[%s7513_s1 + $0x504] ss:$16 sps:$4 sm:$0xff]  }
  0x46   :  { %3389 = vmatprep.mubr.bf16.mxu1 %v5959_v23 }
  0x47   :  { %3319 = vmatpush1.bf16.msra.mxu0 %v4957_v24  ;;  %v5046_v24 = vld [vmem:[%s7513_s1 + $0x704] ss:$16 sps:$4 sm:$0xff]  }
  0x48   :  { %3360 = vmatpush1.bf16.msra.mxu1 %v4960_v25  ;;  %3320 = vmatprep.subr.bf16.mxu0 %v4965_v26  ;;  %v5041_v25 = vld [vmem:[%s7513_s1 + $0x500] ss:$16 sps:$4 sm:$0xff]   ;;  %v6138_v26 = vrot.slane %v5907_v6, %v5849_v49 }
  0x49   :  { %3361 = vmatprep.subr.bf16.mxu1 %v4968_v27  ;;  %v5044_v27 = vld [vmem:[%s7513_s1 + $0x700] ss:$16 sps:$4 sm:$0xff]  }
  0x4a   :  { %v6151_v6 = vcombine.high %v6138_v26, %v6138_v26 }
  0x4b   :  { %3321 = vmatpush1.bf16.msra.mxu0 %v4963_v28  ;;  %v5050_v28 = vld [vmem:[%s7513_s1 + $0x8e4] ss:$16 sps:$4 sm:$0xff]  }
  0x4c   :  { %3362 = vmatpush1.bf16.msra.mxu1 %v4966_v29  ;;  %3322 = vmatprep.subr.bf16.mxu0 %v4971_v30  ;;  %v5053_v29 = vld [vmem:[%s7513_s1 + $0xae4] ss:$16 sps:$4 sm:$0xff]   ;;  %v5048_v30 = vld [vmem:[%s7513_s1 + $0x8e0] ss:$16 sps:$4 sm:$0xff]  }
  0x4d   :  { %3363 = vmatprep.subr.bf16.mxu1 %v4974_v31  ;;  %v5051_v31 = vld [vmem:[%s7513_s1 + $0xae0] ss:$16 sps:$4 sm:$0xff]  }
  0x4f   :  { %3323 = vmatpush1.bf16.msra.mxu0 %v4969_v32  ;;  %v6162_v32 = vld [vmem:[%s7512_s0 + $0x8] sm:$0xff] }
  0x50   :  { %3364 = vmatpush1.bf16.msra.mxu1 %v4972_v33  ;;  %3324 = vmatprep.subr.bf16.mxu0 %v4977_v34  ;;  %v5056_v33 = vld [vmem:[%s7513_s1 + $0x8c4] ss:$16 sps:$4 sm:$0xff]  }
  0x51   :  { %3365 = vmatprep.subr.bf16.mxu1 %v4980_v35  ;;  %v5059_v34 = vld [vmem:[%s7513_s1 + $0xac4] ss:$16 sps:$4 sm:$0xff]   ;;  %v6172_v35 = vrot.slane %v6162_v32, %v5849_v49 }
  0x53   :  { %3325 = vmatpush1.bf16.msra.mxu0 %v4975_v36  ;;  %v624_v36 = vcombine.high %v6172_v35, %v6172_v35 }
  0x54   :  { %3366 = vmatpush1.bf16.msra.mxu1 %v4978_v37  ;;  %3326 = vmatprep.subr.bf16.mxu0 %v4983_v38  ;;  %v5054_v37 = vld [vmem:[%s7513_s1 + $0x8c0] ss:$16 sps:$4 sm:$0xff]  }
  0x55   :  { %3367 = vmatprep.subr.bf16.mxu1 %v4986_v39  ;;  %v5057_v38 = vld [vmem:[%s7513_s1 + $0xac0] ss:$16 sps:$4 sm:$0xff]   ;;  %v5062_v39 = vld [vmem:[%s7513_s1 + $0x8a4] ss:$16 sps:$4 sm:$0xff]  }
  0x57   :  { %3327 = vmatpush1.bf16.msra.mxu0 %v4981_v40  ;;  %v5065_v40 = vld [vmem:[%s7513_s1 + $0xaa4] ss:$16 sps:$4 sm:$0xff]  }
  0x58   :  { %3368 = vmatpush1.bf16.msra.mxu1 %v4984_v41  ;;  %3328 = vmatprep.subr.bf16.mxu0 %v4989_v43  ;;  %v6191_v41 = vrot.slane %v624_v36, %v5849_v49  ;;  %v5126_v36 = vld [vmem:[%s7513_s1 + $0x940] ss:$16 sps:$4 sm:$0xff]  }
  0x59   :  { %3369 = vmatprep.subr.bf16.mxu1 %v4992_v44  ;;  %v5060_v44 = vld [vmem:[%s7513_s1 + $0x8a0] ss:$16 sps:$4 sm:$0xff]  }
  0x5a   :  { %v6196_v43 = vcombine.high %v6191_v41, %v6191_v41 }
  0x5b   :  { %3329 = vmatpush1.bf16.msra.mxu0 %v4987_v45  ;;  %v5063_v45 = vld [vmem:[%s7513_s1 + $0xaa0] ss:$16 sps:$4 sm:$0xff]  }
  0x5c   :  { %3370 = vmatpush1.bf16.msra.mxu1 %v4990_v46  ;;  %3330 = vmatprep.subr.bf16.mxu0 %v4995_v47  ;;  %v5068_v46 = vld [vmem:[%s7513_s1 + $0x884] ss:$16 sps:$4 sm:$0xff]  }
  0x5d   :  { %3371 = vmatprep.subr.bf16.mxu1 %v4998_v48  ;;  %v5071_v47 = vld [vmem:[%s7513_s1 + $0xa84] ss:$16 sps:$4 sm:$0xff]   ;;  %v5066_v48 = vld [vmem:[%s7513_s1 + $0x880] ss:$16 sps:$4 sm:$0xff]  }
  0x5f   :  { %3331 = vmatpush1.bf16.msra.mxu0 %v4993_v50  ;;  %v5069_v50 = vld [vmem:[%s7513_s1 + $0xa80] ss:$16 sps:$4 sm:$0xff]  }
  0x60   :  { %3372 = vmatpush1.bf16.msra.mxu1 %v4996_v51  ;;  %3332 = vmatprep.subr.bf16.mxu0 %v5001_v52  ;;  %v5074_v51 = vld [vmem:[%s7513_s1 + $0x864] ss:$16 sps:$4 sm:$0xff]  }
  0x61   :  { %3373 = vmatprep.subr.bf16.mxu1 %v5004_v53  ;;  %v5077_v52 = vld [vmem:[%s7513_s1 + $0xa64] ss:$16 sps:$4 sm:$0xff]   ;;  %v5072_v53 = vld [vmem:[%s7513_s1 + $0x860] ss:$16 sps:$4 sm:$0xff]  }
  0x63   :  { %3333 = vmatpush2.bf16.msra.mxu0 %v4999_v54  ;;  %v5075_v54 = vld [vmem:[%s7513_s1 + $0xa60] ss:$16 sps:$4 sm:$0xff]  }
  0x64   :  { %3374 = vmatpush2.bf16.msra.mxu1 %v5002_v55  ;;  %3334 = vmatprep.subr.bf16.mxu0 %v5007_v56  ;;  %v5080_v55 = vld [vmem:[%s7513_s1 + $0x844] ss:$16 sps:$4 sm:$0xff]  }
  0x65   :  { %3375 = vmatprep.subr.bf16.mxu1 %v5010_v57  ;;  %v5083_v56 = vld [vmem:[%s7513_s1 + $0xa44] ss:$16 sps:$4 sm:$0xff]   ;;  %v5078_v57 = vld [vmem:[%s7513_s1 + $0x840] ss:$16 sps:$4 sm:$0xff]  }
  0x67   :  { %3335 = vmatpush2.bf16.msra.mxu0 %v5005_v58  ;;  %v5081_v58 = vld [vmem:[%s7513_s1 + $0xa40] ss:$16 sps:$4 sm:$0xff]  }
  0x68   :  { %3376 = vmatpush2.bf16.msra.mxu1 %v5008_v59  ;;  %3336 = vmatprep.subr.bf16.mxu0 %v5013_v61  ;;  %v5086_v59 = vld [vmem:[%s7513_s1 + $0x824] ss:$16 sps:$4 sm:$0xff]  }
  0x69   :  { %3377 = vmatprep.subr.bf16.mxu1 %v5016_v62  ;;  %v5089_v61 = vld [vmem:[%s7513_s1 + $0xa24] ss:$16 sps:$4 sm:$0xff]   ;;  %v5084_v62 = vld [vmem:[%s7513_s1 + $0x820] ss:$16 sps:$4 sm:$0xff]  }
  0x6b   :  { %3337 = vmatpush2.bf16.msra.mxu0 %v5011_v63  ;;  %v5087_v63 = vld [vmem:[%s7513_s1 + $0xa20] ss:$16 sps:$4 sm:$0xff]  }
  0x6c   :  { %3378 = vmatpush2.bf16.msra.mxu1 %v5014_v1  ;;  %3338 = vmatprep.subr.bf16.mxu0 %v5019_v2  ;;  %v5092_v1 = vld [vmem:[%s7513_s1 + $0x804] ss:$16 sps:$4 sm:$0xff]  }
  0x6d   :  { %3379 = vmatprep.subr.bf16.mxu1 %v5022_v3  ;;  %v5095_v2 = vld [vmem:[%s7513_s1 + $0xa04] ss:$16 sps:$4 sm:$0xff]   ;;  %v5090_v3 = vld [vmem:[%s7513_s1 + $0x800] ss:$16 sps:$4 sm:$0xff]  }
  0x6f   :  { %3339 = vmatpush2.bf16.msra.mxu0 %v5017_v4  ;;  %v5093_v4 = vld [vmem:[%s7513_s1 + $0xa00] ss:$16 sps:$4 sm:$0xff]  }
  0x70   :  { %3380 = vmatpush2.bf16.msra.mxu1 %v5020_v5  ;;  %3340 = vmatprep.subr.bf16.mxu0 %v5025_v7  ;;  %v5098_v5 = vld [vmem:[%s7513_s1 + $0x9e4] ss:$16 sps:$4 sm:$0xff]  }
  0x71   :  { %3381 = vmatprep.subr.bf16.mxu1 %v5028_v8  ;;  %v5101_v7 = vld [vmem:[%s7513_s1 + $0xbe4] ss:$16 sps:$4 sm:$0xff]   ;;  %v5096_v8 = vld [vmem:[%s7513_s1 + $0x9e0] ss:$16 sps:$4 sm:$0xff]  }
  0x73   :  { %3341 = vmatpush2.bf16.msra.mxu0 %v5023_v9  ;;  %v5099_v9 = vld [vmem:[%s7513_s1 + $0xbe0] ss:$16 sps:$4 sm:$0xff]  }
  0x74   :  { %3382 = vmatpush2.bf16.msra.mxu1 %v5026_v10  ;;  %3342 = vmatprep.subr.bf16.mxu0 %v5031_v11  ;;  %v5104_v10 = vld [vmem:[%s7513_s1 + $0x9c4] ss:$16 sps:$4 sm:$0xff]  }
  0x75   :  { %3383 = vmatprep.subr.bf16.mxu1 %v5034_v12  ;;  %v5107_v11 = vld [vmem:[%s7513_s1 + $0xbc4] ss:$16 sps:$4 sm:$0xff]   ;;  %v5102_v12 = vld [vmem:[%s7513_s1 + $0x9c0] ss:$16 sps:$4 sm:$0xff]  }
  0x77   :  { %3343 = vmatpush2.bf16.msra.mxu0 %v5029_v14  ;;  %v5105_v14 = vld [vmem:[%s7513_s1 + $0xbc0] ss:$16 sps:$4 sm:$0xff]  }
  0x78   :  { %3384 = vmatpush2.bf16.msra.mxu1 %v5032_v15  ;;  %3344 = vmatprep.subr.bf16.mxu0 %v5037_v16  ;;  %v5110_v15 = vld [vmem:[%s7513_s1 + $0x9a4] ss:$16 sps:$4 sm:$0xff]  }
  0x79   :  { %3385 = vmatprep.subr.bf16.mxu1 %v5040_v19  ;;  %v5113_v16 = vld [vmem:[%s7513_s1 + $0xba4] ss:$16 sps:$4 sm:$0xff]   ;;  %v5108_v19 = vld [vmem:[%s7513_s1 + $0x9a0] ss:$16 sps:$4 sm:$0xff]  }
  0x7b   :  { %3345 = vmatpush2.bf16.msra.mxu0 %v5035_v20  ;;  %v5111_v20 = vld [vmem:[%s7513_s1 + $0xba0] ss:$16 sps:$4 sm:$0xff]  }
  0x7c   :  { %3386 = vmatpush2.bf16.msra.mxu1 %v5038_v21  ;;  %3346 = vmatprep.subr.bf16.mxu0 %v5043_v22  ;;  %v5116_v21 = vld [vmem:[%s7513_s1 + $0x984] ss:$16 sps:$4 sm:$0xff]  }
  0x7d   :  { %3387 = vmatprep.subr.bf16.mxu1 %v5046_v24  ;;  %v5119_v22 = vld [vmem:[%s7513_s1 + $0xb84] ss:$16 sps:$4 sm:$0xff]   ;;  %v5114_v24 = vld [vmem:[%s7513_s1 + $0x980] ss:$16 sps:$4 sm:$0xff]  }
  0x7f   :  { %3347 = vmatpush2.bf16.msra.mxu0 %v5041_v25  ;;  %v5117_v25 = vld [vmem:[%s7513_s1 + $0xb80] ss:$16 sps:$4 sm:$0xff]  }
  0x80   :  { %3388 = vmatpush2.bf16.msra.mxu1 %v5044_v27  ;;  %3398 = vmatprep.subr.bf16.mxu0 %v5050_v28  ;;  %v5122_v27 = vld [vmem:[%s7513_s1 + $0x964] ss:$16 sps:$4 sm:$0xff]  }
  0x81   :  { %3439 = vmatprep.subr.bf16.mxu1 %v5053_v29  ;;  %v5125_v28 = vld [vmem:[%s7513_s1 + $0xb64] ss:$16 sps:$4 sm:$0xff]   ;;  %v5120_v29 = vld [vmem:[%s7513_s1 + $0x960] ss:$16 sps:$4 sm:$0xff]  }
  0x82   :  { %3349 = vmatmul.mubr.bf16.vlgmr.msra.gmra.mxu0 %v6138_v26 }
  0x83   :  { %3390 = vmatmul.mubr.bf16.vlgmr.msra.gmra.mxu1 %v6151_v6  ;;  %3399 = vmatpush1.bf16.msra.mxu0 %v5048_v30  ;;  %v5123_v30 = vld [vmem:[%s7513_s1 + $0xb60] ss:$16 sps:$4 sm:$0xff]  }
  0x84   :  { %3440 = vmatpush1.bf16.msra.mxu1 %v5051_v31  ;;  %3400 = vmatprep.subr.bf16.mxu0 %v5056_v33  ;;  %v5128_v31 = vld [vmem:[%s7513_s1 + $0x944] ss:$16 sps:$4 sm:$0xff]  }
  0x85   :  { %3441 = vmatprep.subr.bf16.mxu1 %v5059_v34  ;;  %3430 = vmatprep.mubr.bf16.mxu0 %v6191_v41  ;;  %v5131_v33 = vld [vmem:[%s7513_s1 + $0xb44] ss:$16 sps:$4 sm:$0xff]   ;;  %v609_v34 = vcombine.high %v6162_v32, %v6162_v32 }
  0x86   :  { %3471 = vmatprep.mubr.bf16.mxu1 %v6196_v43  ;;  %v5137_v32 = vld [vmem:[%s7513_s1 + $0xb24] ss:$16 sps:$4 sm:$0xff]  }
  0x87   :  { %3401 = vmatpush1.bf16.msra.mxu0 %v5054_v37  ;;  %v5129_v37 = vld [vmem:[%s7513_s1 + $0xb40] ss:$16 sps:$4 sm:$0xff]  }
  0x88   :  { %3442 = vmatpush1.bf16.msra.mxu1 %v5057_v38  ;;  %3402 = vmatprep.subr.bf16.mxu0 %v5062_v39  ;;  %v5134_v38 = vld [vmem:[%s7513_s1 + $0x924] ss:$16 sps:$4 sm:$0xff]   ;;  %v6346_v39 = vrot.slane %v609_v34, %v5849_v49  ;;  %v5195_v34 = vld [vmem:[%s7513_s1 + $0xfe0] ss:$16 sps:$4 sm:$0xff]  }
  0x89   :  { %3443 = vmatprep.subr.bf16.mxu1 %v5065_v40  ;;  %v5132_v40 = vld [vmem:[%s7513_s1 + $0x920] ss:$16 sps:$4 sm:$0xff]  }
  0x8b   :  { %3403 = vmatpush1.bf16.msra.mxu0 %v5060_v44  ;;  %v5135_v44 = vld [vmem:[%s7513_s1 + $0xb20] ss:$16 sps:$4 sm:$0xff]  }
  0x8c   :  { %3444 = vmatpush1.bf16.msra.mxu1 %v5063_v45  ;;  %3404 = vmatprep.subr.bf16.mxu0 %v5068_v46  ;;  %v5140_v45 = vld [vmem:[%s7513_s1 + $0x904] ss:$16 sps:$4 sm:$0xff]  }
  0x8d   :  { %3445 = vmatprep.subr.bf16.mxu1 %v5071_v47  ;;  %v5143_v46 = vld [vmem:[%s7513_s1 + $0xb04] ss:$16 sps:$4 sm:$0xff]   ;;  %v625_v47 = vcombine.high %v6346_v39, %v6346_v39 }
  0x8f   :  { %3405 = vmatpush1.bf16.msra.mxu0 %v5066_v48  ;;  %v5138_v48 = vld [vmem:[%s7513_s1 + $0x900] ss:$16 sps:$4 sm:$0xff]  }
  0x90   :  { %3446 = vmatpush1.bf16.msra.mxu1 %v5069_v50  ;;  %3406 = vmatprep.subr.bf16.mxu0 %v5074_v51  ;;  %v6367_v50 = vrot.slane %v6172_v35, %v5849_v49  ;;  %v5141_v51 = vld [vmem:[%s7513_s1 + $0xb00] ss:$16 sps:$4 sm:$0xff]  }
  0x91   :  { %3447 = vmatprep.subr.bf16.mxu1 %v5077_v52  ;;  %v5146_v52 = vld [vmem:[%s7513_s1 + $0xce4] ss:$16 sps:$4 sm:$0xff]  }
  0x92   :  { %v6383_v35 = vcombine.high %v6367_v50, %v6367_v50 }
  0x93   :  { %3407 = vmatpush1.bf16.msra.mxu0 %v5072_v53  ;;  %v5149_v53 = vld [vmem:[%s7513_s1 + $0xee4] ss:$16 sps:$4 sm:$0xff]  }
  0x94   :  { %3448 = vmatpush1.bf16.msra.mxu1 %v5075_v54  ;;  %3408 = vmatprep.subr.bf16.mxu0 %v5080_v55  ;;  %v6379_v54 = vrot.slane %v625_v47, %v5849_v49  ;;  %v5144_v55 = vld [vmem:[%s7513_s1 + $0xce0] ss:$16 sps:$4 sm:$0xff]   ;;  %v5212_v47 = vld [vmem:[%s7513_s1 + $0xd84] ss:$16 sps:$4 sm:$0xff]  }
  0x95   :  { %3449 = vmatprep.subr.bf16.mxu1 %v5083_v56  ;;  %v5147_v56 = vld [vmem:[%s7513_s1 + $0xee0] ss:$16 sps:$4 sm:$0xff]  }
  0x97   :  { %3409 = vmatpush1.bf16.msra.mxu0 %v5078_v57  ;;  %v5152_v57 = vld [vmem:[%s7513_s1 + $0xcc4] ss:$16 sps:$4 sm:$0xff]  }
  0x98   :  { %3450 = vmatpush1.bf16.msra.mxu1 %v5081_v58  ;;  %3410 = vmatprep.subr.bf16.mxu0 %v5086_v59  ;;  %v5155_v58 = vld [vmem:[%s7513_s1 + $0xec4] ss:$16 sps:$4 sm:$0xff]   ;;  %v6399_v59 = vcombine.high %v6379_v54, %v6379_v54 }
  0x99   :  { %3451 = vmatprep.subr.bf16.mxu1 %v5089_v61  ;;  %v5150_v61 = vld [vmem:[%s7513_s1 + $0xcc0] ss:$16 sps:$4 sm:$0xff]  }
  0x9b   :  { %3411 = vmatpush1.bf16.msra.mxu0 %v5084_v62  ;;  %v5153_v62 = vld [vmem:[%s7513_s1 + $0xec0] ss:$16 sps:$4 sm:$0xff]  }
  0x9c   :  { %3452 = vmatpush1.bf16.msra.mxu1 %v5087_v63  ;;  %3412 = vmatprep.subr.bf16.mxu0 %v5092_v1  ;;  %v5158_v63 = vld [vmem:[%s7513_s1 + $0xca4] ss:$16 sps:$4 sm:$0xff]  }
  0x9d   :  { %3453 = vmatprep.subr.bf16.mxu1 %v5095_v2  ;;  %v5161_v1 = vld [vmem:[%s7513_s1 + $0xea4] ss:$16 sps:$4 sm:$0xff]   ;;  %v5156_v2 = vld [vmem:[%s7513_s1 + $0xca0] ss:$16 sps:$4 sm:$0xff]  }
  0x9f   :  { %3413 = vmatpush1.bf16.msra.mxu0 %v5090_v3  ;;  %v5159_v3 = vld [vmem:[%s7513_s1 + $0xea0] ss:$16 sps:$4 sm:$0xff]  }
  0xa0   :  { %3454 = vmatpush1.bf16.msra.mxu1 %v5093_v4  ;;  %3414 = vmatprep.subr.bf16.mxu0 %v5098_v5  ;;  %v5164_v4 = vld [vmem:[%s7513_s1 + $0xc84] ss:$16 sps:$4 sm:$0xff]  }
  0xa1   :  { %3455 = vmatprep.subr.bf16.mxu1 %v5101_v7  ;;  %v5167_v5 = vld [vmem:[%s7513_s1 + $0xe84] ss:$16 sps:$4 sm:$0xff]   ;;  %v5162_v7 = vld [vmem:[%s7513_s1 + $0xc80] ss:$16 sps:$4 sm:$0xff]  }
  0xa3   :  { %3415 = vmatpush2.bf16.msra.mxu0 %v5096_v8  ;;  %v5165_v8 = vld [vmem:[%s7513_s1 + $0xe80] ss:$16 sps:$4 sm:$0xff]  }
  0xa4   :  { %3456 = vmatpush2.bf16.msra.mxu1 %v5099_v9  ;;  %3416 = vmatprep.subr.bf16.mxu0 %v5104_v10  ;;  %v5170_v9 = vld [vmem:[%s7513_s1 + $0xc64] ss:$16 sps:$4 sm:$0xff]  }
  0xa5   :  { %3457 = vmatprep.subr.bf16.mxu1 %v5107_v11  ;;  %v5173_v10 = vld [vmem:[%s7513_s1 + $0xe64] ss:$16 sps:$4 sm:$0xff]   ;;  %v5168_v11 = vld [vmem:[%s7513_s1 + $0xc60] ss:$16 sps:$4 sm:$0xff]  }
  0xa7   :  { %3417 = vmatpush2.bf16.msra.mxu0 %v5102_v12  ;;  %v5171_v12 = vld [vmem:[%s7513_s1 + $0xe60] ss:$16 sps:$4 sm:$0xff]  }
  0xa8   :  { %3458 = vmatpush2.bf16.msra.mxu1 %v5105_v14  ;;  %3418 = vmatprep.subr.bf16.mxu0 %v5110_v15  ;;  %v5176_v14 = vld [vmem:[%s7513_s1 + $0xc44] ss:$16 sps:$4 sm:$0xff]  }
  0xa9   :  { %3459 = vmatprep.subr.bf16.mxu1 %v5113_v16  ;;  %v5179_v15 = vld [vmem:[%s7513_s1 + $0xe44] ss:$16 sps:$4 sm:$0xff]   ;;  %v5174_v16 = vld [vmem:[%s7513_s1 + $0xc40] ss:$16 sps:$4 sm:$0xff]  }
  0xab   :  { %3419 = vmatpush2.bf16.msra.mxu0 %v5108_v19  ;;  %v5177_v19 = vld [vmem:[%s7513_s1 + $0xe40] ss:$16 sps:$4 sm:$0xff]  }
  0xac   :  { %3460 = vmatpush2.bf16.msra.mxu1 %v5111_v20  ;;  %3420 = vmatprep.subr.bf16.mxu0 %v5116_v21  ;;  %v5182_v20 = vld [vmem:[%s7513_s1 + $0xc24] ss:$16 sps:$4 sm:$0xff]  }
  0xad   :  { %3461 = vmatprep.subr.bf16.mxu1 %v5119_v22  ;;  %v5185_v21 = vld [vmem:[%s7513_s1 + $0xe24] ss:$16 sps:$4 sm:$0xff]   ;;  %v5180_v22 = vld [vmem:[%s7513_s1 + $0xc20] ss:$16 sps:$4 sm:$0xff]  }
  0xaf   :  { %3421 = vmatpush2.bf16.msra.mxu0 %v5114_v24  ;;  %v5183_v24 = vld [vmem:[%s7513_s1 + $0xe20] ss:$16 sps:$4 sm:$0xff]  }
  0xb0   :  { %3462 = vmatpush2.bf16.msra.mxu1 %v5117_v25  ;;  %3422 = vmatprep.subr.bf16.mxu0 %v5122_v27  ;;  %v5188_v25 = vld [vmem:[%s7513_s1 + $0xc04] ss:$16 sps:$4 sm:$0xff]  }
  0xb1   :  { %3463 = vmatprep.subr.bf16.mxu1 %v5125_v28  ;;  %v5191_v27 = vld [vmem:[%s7513_s1 + $0xe04] ss:$16 sps:$4 sm:$0xff]   ;;  %v5186_v28 = vld [vmem:[%s7513_s1 + $0xc00] ss:$16 sps:$4 sm:$0xff]  }
  0xb3   :  { %3423 = vmatpush2.bf16.msra.mxu0 %v5120_v29  ;;  %v5189_v29 = vld [vmem:[%s7513_s1 + $0xe00] ss:$16 sps:$4 sm:$0xff]  }
  0xb4   :  { %3464 = vmatpush2.bf16.msra.mxu1 %v5123_v30  ;;  %3424 = vmatprep.subr.bf16.mxu0 %v5128_v31  ;;  %v5194_v30 = vld [vmem:[%s7513_s1 + $0xde4] ss:$16 sps:$4 sm:$0xff]  }
  0xb5   :  { %3465 = vmatprep.subr.bf16.mxu1 %v5131_v33  ;;  %v5197_v31 = vld [vmem:[%s7513_s1 + $0xfe4] ss:$16 sps:$4 sm:$0xff]   ;;  %v5192_v33 = vld [vmem:[%s7513_s1 + $0xde0] ss:$16 sps:$4 sm:$0xff]  }
  0xb7   :  { %3425 = vmatpush2.bf16.msra.mxu0 %v5126_v36  ;;  %v5200_v36 = vld [vmem:[%s7513_s1 + $0xdc4] ss:$16 sps:$4 sm:$0xff]  }
  0xb8   :  { %3466 = vmatpush2.bf16.msra.mxu1 %v5129_v37  ;;  %3426 = vmatprep.subr.bf16.mxu0 %v5134_v38  ;;  %v5203_v37 = vld [vmem:[%s7513_s1 + $0xfc4] ss:$16 sps:$4 sm:$0xff]   ;;  %v5198_v38 = vld [vmem:[%s7513_s1 + $0xdc0] ss:$16 sps:$4 sm:$0xff]  }
  0xb9   :  { %3467 = vmatprep.subr.bf16.mxu1 %v5137_v32  ;;  %v5201_v32 = vld [vmem:[%s7513_s1 + $0xfc0] ss:$16 sps:$4 sm:$0xff]  }
  0xbb   :  { %3427 = vmatpush2.bf16.msra.mxu0 %v5132_v40  ;;  %v5206_v40 = vld [vmem:[%s7513_s1 + $0xda4] ss:$16 sps:$4 sm:$0xff]  }
  0xbc   :  { %3468 = vmatpush2.bf16.msra.mxu1 %v5135_v44  ;;  %3428 = vmatprep.subr.bf16.mxu0 %v5140_v45  ;;  %v5209_v44 = vld [vmem:[%s7513_s1 + $0xfa4] ss:$16 sps:$4 sm:$0xff]   ;;  %v5204_v45 = vld [vmem:[%s7513_s1 + $0xda0] ss:$16 sps:$4 sm:$0xff]  }
  0xbd   :  { %3469 = vmatprep.subr.bf16.mxu1 %v5143_v46  ;;  %v5207_v46 = vld [vmem:[%s7513_s1 + $0xfa0] ss:$16 sps:$4 sm:$0xff]  }
  0xbf   :  { %3429 = vmatpush2.bf16.msra.mxu0 %v5138_v48  ;;  %v5215_v48 = vld [vmem:[%s7513_s1 + $0xf84] ss:$16 sps:$4 sm:$0xff]  }
  0xc0   :  { %3470 = vmatpush2.bf16.msra.mxu1 %v5141_v51  ;;  %3480 = vmatprep.subr.bf16.mxu0 %v5146_v52  ;;  %v5210_v51 = vld [vmem:[%s7513_s1 + $0xd80] ss:$16 sps:$4 sm:$0xff]  }
  0xc1   :  { %3521 = vmatprep.subr.bf16.mxu1 %v5149_v53  ;;  %v5213_v52 = vld [vmem:[%s7513_s1 + $0xf80] ss:$16 sps:$4 sm:$0xff]   ;;  %v5218_v53 = vld [vmem:[%s7513_s1 + $0xd64] ss:$16 sps:$4 sm:$0xff]  }
  0xc2   :  { %3431 = vmatmul.mubr.bf16.vlgmr.msra.gmra.mxu0 %v6367_v50 }
  0xc3   :  { %3472 = vmatmul.mubr.bf16.vlgmr.msra.gmra.mxu1 %v6383_v35  ;;  %3481 = vmatpush1.bf16.msra.mxu0 %v5144_v55  ;;  %v5221_v55 = vld [vmem:[%s7513_s1 + $0xf64] ss:$16 sps:$4 sm:$0xff]  }
  0xc4   :  { %3522 = vmatpush1.bf16.msra.mxu1 %v5147_v56  ;;  %3482 = vmatprep.subr.bf16.mxu0 %v5152_v57  ;;  %v5216_v56 = vld [vmem:[%s7513_s1 + $0xd60] ss:$16 sps:$4 sm:$0xff]  }
  0xc5   :  { %3523 = vmatprep.subr.bf16.mxu1 %v5155_v58  ;;  %3512 = vmatprep.mubr.bf16.mxu0 %v6379_v54  ;;  %v5219_v57 = vld [vmem:[%s7513_s1 + $0xf60] ss:$16 sps:$4 sm:$0xff]   ;;  %v5224_v58 = vld [vmem:[%s7513_s1 + $0xd44] ss:$16 sps:$4 sm:$0xff]  }
  0xc6   :  { %3553 = vmatprep.mubr.bf16.mxu1 %v6399_v59 }
  0xc7   :  { %3483 = vmatpush1.bf16.msra.mxu0 %v5150_v61  ;;  %v5227_v61 = vld [vmem:[%s7513_s1 + $0xf44] ss:$16 sps:$4 sm:$0xff]  }
  0xc8   :  { %3524 = vmatpush1.bf16.msra.mxu1 %v5153_v62  ;;  %3484 = vmatprep.subr.bf16.mxu0 %v5158_v63  ;;  %v5222_v62 = vld [vmem:[%s7513_s1 + $0xd40] ss:$16 sps:$4 sm:$0xff]  }
  0xc9   :  { %3525 = vmatprep.subr.bf16.mxu1 %v5161_v1  ;;  %v5225_v63 = vld [vmem:[%s7513_s1 + $0xf40] ss:$16 sps:$4 sm:$0xff]   ;;  %v5230_v1 = vld [vmem:[%s7513_s1 + $0xd24] ss:$16 sps:$4 sm:$0xff]  }
  0xcb   :  { %3485 = vmatpush1.bf16.msra.mxu0 %v5156_v2  ;;  %v5233_v2 = vld [vmem:[%s7513_s1 + $0xf24] ss:$16 sps:$4 sm:$0xff]  }
  0xcc   :  { %3526 = vmatpush1.bf16.msra.mxu1 %v5159_v3  ;;  %3486 = vmatprep.subr.bf16.mxu0 %v5164_v4  ;;  %v5228_v3 = vld [vmem:[%s7513_s1 + $0xd20] ss:$16 sps:$4 sm:$0xff]  }
  0xcd   :  { %3527 = vmatprep.subr.bf16.mxu1 %v5167_v5  ;;  %v5231_v4 = vld [vmem:[%s7513_s1 + $0xf20] ss:$16 sps:$4 sm:$0xff]   ;;  %v5236_v5 = vld [vmem:[%s7513_s1 + $0xd04] ss:$16 sps:$4 sm:$0xff]  }
  0xcf   :  { %3487 = vmatpush1.bf16.msra.mxu0 %v5162_v7  ;;  %v5239_v7 = vld [vmem:[%s7513_s1 + $0xf04] ss:$16 sps:$4 sm:$0xff]  }
  0xd0   :  { %3528 = vmatpush1.bf16.msra.mxu1 %v5165_v8  ;;  %3488 = vmatprep.subr.bf16.mxu0 %v5170_v9  ;;  %v5234_v8 = vld [vmem:[%s7513_s1 + $0xd00] ss:$16 sps:$4 sm:$0xff]  }
  0xd1   :  { %3529 = vmatprep.subr.bf16.mxu1 %v5173_v10  ;;  %v5237_v9 = vld [vmem:[%s7513_s1 + $0xf00] ss:$16 sps:$4 sm:$0xff]   ;;  %v6581_v10 = vrot.slane %v6346_v39, %v5849_v49  ;;  %v544_v49 = vsub.s32 1, %v5831_v42 }
  0xd3   :  { %3489 = vmatpush1.bf16.msra.mxu0 %v5168_v11  ;;  %v536_v11 = vld [vmem:[%s7514_s2] sm:$0xf]  ;;  %v6596_v39 = vcombine.high %v6581_v10, %v6581_v10 }
  0xd4   :  { %3530 = vmatpush1.bf16.msra.mxu1 %v5171_v12  ;;  %3490 = vmatprep.subr.bf16.mxu0 %v5176_v14  ;;  %v540_v12 = vsub.s32 0, %v5831_v42  ;;  %v5243_v14 = vld [vmem:[%s7513_s1 + $0xec] ss:$16 sps:$4 sm:$0xff]  }
  0xd5   :  { %3531 = vmatprep.subr.bf16.mxu1 %v5179_v15  ;;  %v5246_v15 = vld [vmem:[%s7513_s1 + $0x2ec] ss:$16 sps:$4 sm:$0xff]  }
  0xd7   :  { %3491 = vmatpush1.bf16.msra.mxu0 %v5174_v16  ;;  %v5241_v16 = vld [vmem:[%s7513_s1 + $0xe8] ss:$16 sps:$4 sm:$0xff]  }
  0xd8   :  { %3532 = vmatpush1.bf16.msra.mxu1 %v5177_v19  ;;  %3492 = vmatprep.subr.bf16.mxu0 %v5182_v20  ;;  %v541_v19 = vrot.slane %v536_v11, %v540_v12  ;;  %v5244_v20 = vld [vmem:[%s7513_s1 + $0x2e8] ss:$16 sps:$4 sm:$0xff]   ;;  %v5294_v12 = vld [vmem:[%s7513_s1 + $0x3ec] ss:$16 sps:$4 sm:$0xff]  }
  0xd9   :  { %3533 = vmatprep.subr.bf16.mxu1 %v5185_v21  ;;  %v5249_v21 = vld [vmem:[%s7513_s1 + $0xcc] ss:$16 sps:$4 sm:$0xff]  }
  0xdb   :  { %3493 = vmatpush1.bf16.msra.mxu0 %v5180_v22  ;;  %v5252_v22 = vld [vmem:[%s7513_s1 + $0x2cc] ss:$16 sps:$4 sm:$0xff]  }
  0xdc   :  { %3534 = vmatpush1.bf16.msra.mxu1 %v5183_v24  ;;  %3494 = vmatprep.subr.bf16.mxu0 %v5188_v25  ;;  %v545_v24 = vrot.slane %v536_v11, %v544_v49  ;;  %v5291_v11 = vld [vmem:[%s7513_s1 + $0x1ec] ss:$16 sps:$4 sm:$0xff]  }
  0xdd   :  { %3535 = vmatprep.subr.bf16.mxu1 %v5191_v27  ;;  %v5297_v49 = vld [vmem:[%s7513_s1 + $0x1cc] ss:$16 sps:$4 sm:$0xff]  }
  0xdf   :  { %3495 = vmatpush1.bf16.msra.mxu0 %v5186_v28  ;;  %v5247_v28 = vld [vmem:[%s7513_s1 + $0xc8] ss:$16 sps:$4 sm:$0xff]  }
  0xe0   :  { %3536 = vmatpush1.bf16.msra.mxu1 %v5189_v29  ;;  %3496 = vmatprep.subr.bf16.mxu0 %v5194_v30  ;;  %v5250_v29 = vld [vmem:[%s7513_s1 + $0x2c8] ss:$16 sps:$4 sm:$0xff]  }
  0xe1   :  { %3537 = vmatprep.subr.bf16.mxu1 %v5197_v31 }
  0xe3   :  { %3497 = vmatpush2.bf16.msra.mxu0 %v5192_v33 }
  0xe4   :  { %3538 = vmatpush2.bf16.msra.mxu1 %v5195_v34  ;;  %3498 = vmatprep.subr.bf16.mxu0 %v5200_v36  ;;  %v5255_v34 = vld [vmem:[%s7513_s1 + $0xac] ss:$16 sps:$4 sm:$0xff]  }
  0xe5   :  { %3539 = vmatprep.subr.bf16.mxu1 %v5203_v37  ;;  %v5258_v36 = vld [vmem:[%s7513_s1 + $0x2ac] ss:$16 sps:$4 sm:$0xff]  }
  0xe7   :  { %3499 = vmatpush2.bf16.msra.mxu0 %v5198_v38 }
  0xe8   :  { %3540 = vmatpush2.bf16.msra.mxu1 %v5201_v32  ;;  %3500 = vmatprep.subr.bf16.mxu0 %v5206_v40  ;;  %v5253_v32 = vld [vmem:[%s7513_s1 + $0xa8] ss:$16 sps:$4 sm:$0xff]  }
  0xe9   :  { %3541 = vmatprep.subr.bf16.mxu1 %v5209_v44  ;;  %v5256_v40 = vld [vmem:[%s7513_s1 + $0x2a8] ss:$16 sps:$4 sm:$0xff]  }
  0xeb   :  { %3501 = vmatpush2.bf16.msra.mxu0 %v5204_v45 }
  0xec   :  { %3542 = vmatpush2.bf16.msra.mxu1 %v5207_v46  ;;  %3502 = vmatprep.subr.bf16.mxu0 %v5212_v47 }
  0xed   :  { %3543 = vmatprep.subr.bf16.mxu1 %v5215_v48 }
  0xef   :  { %3503 = vmatpush2.bf16.msra.mxu0 %v5210_v51  ;;  %v5261_v51 = vld [vmem:[%s7513_s1 + $0x8c] ss:$16 sps:$4 sm:$0xff]  }
  0xf0   :  { %3544 = vmatpush2.bf16.msra.mxu1 %v5213_v52  ;;  %3504 = vmatprep.subr.bf16.mxu0 %v5218_v53  ;;  %v5262_v52 = vld [vmem:[%s7513_s1 + $0x288] ss:$16 sps:$4 sm:$0xff]   ;;  %v5267_v53 = vld [vmem:[%s7513_s1 + $0x6c] ss:$16 sps:$4 sm:$0xff]  }
  0xf1   :  { %3545 = vmatprep.subr.bf16.mxu1 %v5221_v55  ;;  %v5270_v55 = vld [vmem:[%s7513_s1 + $0x26c] ss:$16 sps:$4 sm:$0xff]  }
  0xf3   :  { %3505 = vmatpush2.bf16.msra.mxu0 %v5216_v56  ;;  %v5265_v56 = vld [vmem:[%s7513_s1 + $0x68] ss:$16 sps:$4 sm:$0xff]  }
  0xf4   :  { %3546 = vmatpush2.bf16.msra.mxu1 %v5219_v57  ;;  %3506 = vmatprep.subr.bf16.mxu0 %v5224_v58  ;;  %v5268_v57 = vld [vmem:[%s7513_s1 + $0x268] ss:$16 sps:$4 sm:$0xff]   ;;  %v5273_v58 = vld [vmem:[%s7513_s1 + $0x4c] ss:$16 sps:$4 sm:$0xff]  }
  0xf5   :  { %3547 = vmatprep.subr.bf16.mxu1 %v5227_v61  ;;  %v5276_v61 = vld [vmem:[%s7513_s1 + $0x24c] ss:$16 sps:$4 sm:$0xff]  }
  0xf7   :  { %3507 = vmatpush2.bf16.msra.mxu0 %v5222_v62  ;;  %v5271_v62 = vld [vmem:[%s7513_s1 + $0x48] ss:$16 sps:$4 sm:$0xff]  }
  0xf8   :  { %3548 = vmatpush2.bf16.msra.mxu1 %v5225_v63  ;;  %3508 = vmatprep.subr.bf16.mxu0 %v5230_v1  ;;  %v5274_v63 = vld [vmem:[%s7513_s1 + $0x248] ss:$16 sps:$4 sm:$0xff]   ;;  %v5279_v1 = vld [vmem:[%s7513_s1 + $0x2c] ss:$16 sps:$4 sm:$0xff]  }
  0xf9   :  { %3549 = vmatprep.subr.bf16.mxu1 %v5233_v2  ;;  %v5282_v2 = vld [vmem:[%s7513_s1 + $0x22c] ss:$16 sps:$4 sm:$0xff]  }
  0xfb   :  { %3509 = vmatpush2.bf16.msra.mxu0 %v5228_v3  ;;  %v5277_v3 = vld [vmem:[%s7513_s1 + $0x28] ss:$16 sps:$4 sm:$0xff]  }
  0xfc   :  { %3550 = vmatpush2.bf16.msra.mxu1 %v5231_v4  ;;  %3510 = vmatprep.subr.bf16.mxu0 %v5236_v5  ;;  %v5280_v4 = vld [vmem:[%s7513_s1 + $0x228] ss:$16 sps:$4 sm:$0xff]   ;;  %v5285_v5 = vld [vmem:[%s7513_s1 + $0xc] ss:$16 sps:$4 sm:$0xff]  }
  0xfd   :  { %3551 = vmatprep.subr.bf16.mxu1 %v5239_v7  ;;  %v5288_v7 = vld [vmem:[%s7513_s1 + $0x20c] ss:$16 sps:$4 sm:$0xff]  }
  0xff   :  { %3511 = vmatpush2.bf16.msra.mxu0 %v5234_v8  ;;  %v5283_v8 = vld [vmem:[%s7513_s1 + $0x8] ss:$16 sps:$4 sm:$0xff]  }
 0x100   :  { %3552 = vmatpush2.bf16.msra.mxu1 %v5237_v9  ;;  %3562 = vmatprep.subr.bf16.mxu0 %v5243_v14  ;;  %v5286_v9 = vld [vmem:[%s7513_s1 + $0x208] ss:$16 sps:$4 sm:$0xff]  }
 0x101   :  { %3603 = vmatprep.subr.bf16.mxu1 %v5246_v15  ;;  %v5289_v14 = vld [vmem:[%s7513_s1 + $0x1e8] ss:$16 sps:$4 sm:$0xff]  }
 0x102   :  { %v3268_v25 = vpop.f32.mrf.mxu0  ;;  %3513 = vmatmul.mubr.bf16.vlgmr.msra.gmra.mxu0 %v6581_v10  ;;  %v5292_v15 = vld [vmem:[%s7513_s1 + $0x3e8] ss:$16 sps:$4 sm:$0xff]  }
 0x103   :  { %v3309_v27 = vpop.f32.mrf.mxu1  ;;  %3554 = vmatmul.mubr.bf16.vlgmr.msra.gmra.mxu1 %v6596_v39  ;;  %v3269_v30 = vadd.f32 %v3268_v25, %v541_v19  ;;  %3563 = vmatpush1.bf16.msra.mxu0 %v5241_v16  ;;  %v5300_v16 = vld [vmem:[%s7513_s1 + $0x3cc] ss:$16 sps:$4 sm:$0xff]   ;;  %v5295_v19 = vld [vmem:[%s7513_s1 + $0x1c8] ss:$16 sps:$4 sm:$0xff]  }
 0x104   :  { %3604 = vmatpush1.bf16.msra.mxu1 %v5244_v20  ;;  %v3270_v31 = vpop.f32.mrf.mxu0  ;;  %3564 = vmatprep.subr.bf16.mxu0 %v5249_v21  ;;  %v5298_v20 = vld [vmem:[%s7513_s1 + $0x3c8] ss:$16 sps:$4 sm:$0xff]   ;;  %v5303_v21 = vld [vmem:[%s7513_s1 + $0x1ac] ss:$16 sps:$4 sm:$0xff]  }
 0x105   :  { %v3311_v33 = vpop.f32.mrf.mxu1  ;;  %3605 = vmatprep.subr.bf16.mxu1 %v5252_v22  ;;  %v6624_v37 = vadd.f32 %v3309_v27, %v3269_v30  ;;  %v3271_v38 = vadd.f32 %v3270_v31, %v545_v24  ;;  %3594 = vmatprep.mubr.bf16.mxu0 %v5877_v60  ;;  %v5264_v60 = vld [vmem:[%s7513_s1 + $0x28c] ss:$16 sps:$4 sm:$0xff]   ;;  %v5301_v24 = vld [vmem:[%s7513_s1 + $0x1a8] ss:$16 sps:$4 sm:$0xff]  }
 0x106   :  { %3635 = vmatprep.mubr.bf16.mxu1 %v5890_v0  ;;  %v3272_v44 = vpop.f32.mrf.mxu0  ;;  %v5259_v0 = vld [vmem:[%s7513_s1 + $0x88] ss:$16 sps:$4 sm:$0xff]   ;;  %v5306_v22 = vld [vmem:[%s7513_s1 + $0x3ac] ss:$16 sps:$4 sm:$0xff]  }
 0x107   :  { %v3313_v45 = vpop.f32.mrf.mxu1  ;;  %v6634_v46 = vadd.f32 %v3311_v33, %v3271_v38  ;;  %3565 = vmatpush1.bf16.msra.mxu0 %v5247_v28  ;;  %v5304_v25 = vld [vmem:[%s7513_s1 + $0x3a8] ss:$16 sps:$4 sm:$0xff]   ;;  %v5309_v27 = vld [vmem:[%s7513_s1 + $0x18c] ss:$16 sps:$4 sm:$0xff]  }
 0x108   :  { %3606 = vmatpush1.bf16.msra.mxu1 %v5250_v29  ;;  %v3273_v47 = vpop.f32.mrf.mxu0  ;;  %3566 = vmatprep.subr.bf16.mxu0 %v5255_v34  ;;  %v5312_v28 = vld [vmem:[%s7513_s1 + $0x38c] ss:$16 sps:$4 sm:$0xff]   ;;  %v5307_v29 = vld [vmem:[%s7513_s1 + $0x188] ss:$16 sps:$4 sm:$0xff]  }
 0x109   :  { %v3314_v48 = vpop.f32.mrf.mxu1  ;;  %3607 = vmatprep.subr.bf16.mxu1 %v5258_v36  ;;  %v5310_v30 = vld [vmem:[%s7513_s1 + $0x388] ss:$16 sps:$4 sm:$0xff]   ;;  %v5315_v31 = vld [vmem:[%s7513_s1 + $0x16c] ss:$16 sps:$4 sm:$0xff]  }
 0x10a   :  { %v5318_v33 = vld [vmem:[%s7513_s1 + $0x36c] ss:$16 sps:$4 sm:$0xff]   ;;  %v5313_v34 = vld [vmem:[%s7513_s1 + $0x168] ss:$16 sps:$4 sm:$0xff]  }
 0x10b   :  { %3567 = vmatpush1.bf16.msra.mxu0 %v5253_v32  ;;  %v5316_v36 = vld [vmem:[%s7513_s1 + $0x368] ss:$16 sps:$4 sm:$0xff]   ;;  %v5321_v38 = vld [vmem:[%s7513_s1 + $0x14c] ss:$16 sps:$4 sm:$0xff]  }
 0x10c   :  { %3608 = vmatpush1.bf16.msra.mxu1 %v5256_v40  ;;  %3568 = vmatprep.subr.bf16.mxu0 %v5261_v51  ;;  %v5324_v32 = vld [vmem:[%s7513_s1 + $0x34c] ss:$16 sps:$4 sm:$0xff]   ;;  %v5319_v40 = vld [vmem:[%s7513_s1 + $0x148] ss:$16 sps:$4 sm:$0xff]  }
 0x10d   :  { %3609 = vmatprep.subr.bf16.mxu1 %v5264_v60  ;;  %v5322_v44 = vld [vmem:[%s7513_s1 + $0x348] ss:$16 sps:$4 sm:$0xff]   ;;  %v5327_v45 = vld [vmem:[%s7513_s1 + $0x12c] ss:$16 sps:$4 sm:$0xff]  }
 0x10e   :  { %v5330_v47 = vld [vmem:[%s7513_s1 + $0x32c] ss:$16 sps:$4 sm:$0xff]   ;;  %v5325_v48 = vld [vmem:[%s7513_s1 + $0x128] ss:$16 sps:$4 sm:$0xff]  }
 0x10f   :  { %3569 = vmatpush1.bf16.msra.mxu0 %v5259_v0  ;;  %v5328_v51 = vld [vmem:[%s7513_s1 + $0x328] ss:$16 sps:$4 sm:$0xff]   ;;  %v5333_v60 = vld [vmem:[%s7513_s1 + $0x10c] ss:$16 sps:$4 sm:$0xff]  }
 0x110   :  { %3610 = vmatpush1.bf16.msra.mxu1 %v5262_v52  ;;  %3570 = vmatprep.subr.bf16.mxu0 %v5267_v53  ;;  %v5336_v0 = vld [vmem:[%s7513_s1 + $0x30c] ss:$16 sps:$4 sm:$0xff]   ;;  %v5331_v52 = vld [vmem:[%s7513_s1 + $0x108] ss:$16 sps:$4 sm:$0xff]  }
 0x111   :  { %3611 = vmatprep.subr.bf16.mxu1 %v5270_v55  ;;  %v5334_v53 = vld [vmem:[%s7513_s1 + $0x308] ss:$16 sps:$4 sm:$0xff]   ;;  %v5339_v55 = vld [vmem:[%s7513_s1 + $0x4ec] ss:$16 sps:$4 sm:$0xff]  }
 0x113   :  { %3571 = vmatpush1.bf16.msra.mxu0 %v5265_v56  ;;  %v5342_v56 = vld [vmem:[%s7513_s1 + $0x6ec] ss:$16 sps:$4 sm:$0xff]  }
 0x114   :  { %3612 = vmatpush1.bf16.msra.mxu1 %v5268_v57  ;;  %3572 = vmatprep.subr.bf16.mxu0 %v5273_v58  ;;  %v5337_v57 = vld [vmem:[%s7513_s1 + $0x4e8] ss:$16 sps:$4 sm:$0xff]  }
 0x115   :  { %3613 = vmatprep.subr.bf16.mxu1 %v5276_v61  ;;  %v5340_v58 = vld [vmem:[%s7513_s1 + $0x6e8] ss:$16 sps:$4 sm:$0xff]   ;;  %v5345_v61 = vld [vmem:[%s7513_s1 + $0x4cc] ss:$16 sps:$4 sm:$0xff]  }
 0x117   :  { %3573 = vmatpush1.bf16.msra.mxu0 %v5271_v62  ;;  %v5348_v62 = vld [vmem:[%s7513_s1 + $0x6cc] ss:$16 sps:$4 sm:$0xff]  }
 0x118   :  { %3614 = vmatpush1.bf16.msra.mxu1 %v5274_v63  ;;  %3574 = vmatprep.subr.bf16.mxu0 %v5279_v1  ;;  %v5343_v63 = vld [vmem:[%s7513_s1 + $0x4c8] ss:$16 sps:$4 sm:$0xff]  }
 0x119   :  { %3615 = vmatprep.subr.bf16.mxu1 %v5282_v2  ;;  %v5346_v1 = vld [vmem:[%s7513_s1 + $0x6c8] ss:$16 sps:$4 sm:$0xff]  }
 0x11b   :  { %3575 = vmatpush1.bf16.msra.mxu0 %v5277_v3 }
 0x11c   :  { %3616 = vmatpush1.bf16.msra.mxu1 %v5280_v4  ;;  %3576 = vmatprep.subr.bf16.mxu0 %v5285_v5 }
 0x11d   :  { %3617 = vmatprep.subr.bf16.mxu1 %v5288_v7 }
 0x11f   :  { %3577 = vmatpush1.bf16.msra.mxu0 %v5283_v8  ;;  %v5351_v8 = vld [vmem:[%s7513_s1 + $0x4ac] ss:$16 sps:$4 sm:$0xff]  }
 0x120   :  { %3618 = vmatpush1.bf16.msra.mxu1 %v5286_v9  ;;  %3578 = vmatprep.subr.bf16.mxu0 %v5291_v11  ;;  %v5354_v9 = vld [vmem:[%s7513_s1 + $0x6ac] ss:$16 sps:$4 sm:$0xff]  }
 0x121   :  { %3619 = vmatprep.subr.bf16.mxu1 %v5294_v12 }
 0x123   :  { %3579 = vmatpush2.bf16.msra.mxu0 %v5289_v14 }
 0x124   :  { %3620 = vmatpush2.bf16.msra.mxu1 %v5292_v15  ;;  %3580 = vmatprep.subr.bf16.mxu0 %v5297_v49 }
 0x125   :  { %3621 = vmatprep.subr.bf16.mxu1 %v5300_v16  ;;  %v5357_v16 = vld [vmem:[%s7513_s1 + $0x48c] ss:$16 sps:$4 sm:$0xff]  }
 0x127   :  { %3581 = vmatpush2.bf16.msra.mxu0 %v5295_v19  ;;  %v5358_v19 = vld [vmem:[%s7513_s1 + $0x688] ss:$16 sps:$4 sm:$0xff]  }
 0x128   :  { %3622 = vmatpush2.bf16.msra.mxu1 %v5298_v20  ;;  %3582 = vmatprep.subr.bf16.mxu0 %v5303_v21  ;;  %v5363_v20 = vld [vmem:[%s7513_s1 + $0x46c] ss:$16 sps:$4 sm:$0xff]  }
 0x129   :  { %3623 = vmatprep.subr.bf16.mxu1 %v5306_v22  ;;  %v5366_v21 = vld [vmem:[%s7513_s1 + $0x66c] ss:$16 sps:$4 sm:$0xff]   ;;  %v5361_v22 = vld [vmem:[%s7513_s1 + $0x468] ss:$16 sps:$4 sm:$0xff]  }
 0x12b   :  { %3583 = vmatpush2.bf16.msra.mxu0 %v5301_v24  ;;  %v5364_v24 = vld [vmem:[%s7513_s1 + $0x668] ss:$16 sps:$4 sm:$0xff]  }
 0x12c   :  { %3624 = vmatpush2.bf16.msra.mxu1 %v5304_v25  ;;  %3584 = vmatprep.subr.bf16.mxu0 %v5309_v27  ;;  %v5369_v25 = vld [vmem:[%s7513_s1 + $0x44c] ss:$16 sps:$4 sm:$0xff]  }
 0x12d   :  { %3625 = vmatprep.subr.bf16.mxu1 %v5312_v28  ;;  %v5372_v27 = vld [vmem:[%s7513_s1 + $0x64c] ss:$16 sps:$4 sm:$0xff]   ;;  %v5367_v28 = vld [vmem:[%s7513_s1 + $0x448] ss:$16 sps:$4 sm:$0xff]  }
 0x12f   :  { %3585 = vmatpush2.bf16.msra.mxu0 %v5307_v29  ;;  %v5370_v29 = vld [vmem:[%s7513_s1 + $0x648] ss:$16 sps:$4 sm:$0xff]  }
 0x130   :  { %3626 = vmatpush2.bf16.msra.mxu1 %v5310_v30  ;;  %3586 = vmatprep.subr.bf16.mxu0 %v5315_v31  ;;  %v5375_v30 = vld [vmem:[%s7513_s1 + $0x42c] ss:$16 sps:$4 sm:$0xff]  }
 0x131   :  { %3627 = vmatprep.subr.bf16.mxu1 %v5318_v33  ;;  %v5378_v31 = vld [vmem:[%s7513_s1 + $0x62c] ss:$16 sps:$4 sm:$0xff]   ;;  %v5373_v33 = vld [vmem:[%s7513_s1 + $0x428] ss:$16 sps:$4 sm:$0xff]  }
 0x133   :  { %3587 = vmatpush2.bf16.msra.mxu0 %v5313_v34  ;;  %v5376_v34 = vld [vmem:[%s7513_s1 + $0x628] ss:$16 sps:$4 sm:$0xff]  }
 0x134   :  { %3628 = vmatpush2.bf16.msra.mxu1 %v5316_v36  ;;  %3588 = vmatprep.subr.bf16.mxu0 %v5321_v38  ;;  %v5381_v36 = vld [vmem:[%s7513_s1 + $0x40c] ss:$16 sps:$4 sm:$0xff]  }
 0x135   :  { %3629 = vmatprep.subr.bf16.mxu1 %v5324_v32  ;;  %v5384_v38 = vld [vmem:[%s7513_s1 + $0x60c] ss:$16 sps:$4 sm:$0xff]   ;;  %v5379_v32 = vld [vmem:[%s7513_s1 + $0x408] ss:$16 sps:$4 sm:$0xff]  }
 0x137   :  { %3589 = vmatpush2.bf16.msra.mxu0 %v5319_v40  ;;  %v5382_v40 = vld [vmem:[%s7513_s1 + $0x608] ss:$16 sps:$4 sm:$0xff]  }
 0x138   :  { %3630 = vmatpush2.bf16.msra.mxu1 %v5322_v44  ;;  %3590 = vmatprep.subr.bf16.mxu0 %v5327_v45  ;;  %v5387_v44 = vld [vmem:[%s7513_s1 + $0x5ec] ss:$16 sps:$4 sm:$0xff]  }
 0x139   :  { %3631 = vmatprep.subr.bf16.mxu1 %v5330_v47  ;;  %v5390_v45 = vld [vmem:[%s7513_s1 + $0x7ec] ss:$16 sps:$4 sm:$0xff]   ;;  %v5385_v47 = vld [vmem:[%s7513_s1 + $0x5e8] ss:$16 sps:$4 sm:$0xff]  }
 0x13b   :  { %3591 = vmatpush2.bf16.msra.mxu0 %v5325_v48  ;;  %v5388_v48 = vld [vmem:[%s7513_s1 + $0x7e8] ss:$16 sps:$4 sm:$0xff]  }
 0x13c   :  { %3632 = vmatpush2.bf16.msra.mxu1 %v5328_v51  ;;  %3592 = vmatprep.subr.bf16.mxu0 %v5333_v60  ;;  %v5393_v51 = vld [vmem:[%s7513_s1 + $0x5cc] ss:$16 sps:$4 sm:$0xff]  }
 0x13d   :  { %3633 = vmatprep.subr.bf16.mxu1 %v5336_v0  ;;  %v5396_v60 = vld [vmem:[%s7513_s1 + $0x7cc] ss:$16 sps:$4 sm:$0xff]  }
 0x13f   :  { %3593 = vmatpush2.bf16.msra.mxu0 %v5331_v52 }
 0x140   :  { %3634 = vmatpush2.bf16.msra.mxu1 %v5334_v53  ;;  %3644 = vmatprep.subr.bf16.mxu0 %v5339_v55 }
 0x141   :  { %3685 = vmatprep.subr.bf16.mxu1 %v5342_v56 }
 0x142   :  { %v3350_v2 = vpop.f32.mrf.mxu0  ;;  %3595 = vmatmul.mubr.bf16.vlgmr.msra.gmra.mxu0 %v5927_v13 }
 0x143   :  { %v3391_v3 = vpop.f32.mrf.mxu1  ;;  %3636 = vmatmul.mubr.bf16.vlgmr.msra.gmra.mxu1 %v5943_v18  ;;  %v3351_v4 = vadd.f32 %v3350_v2, %v6624_v37  ;;  %3645 = vmatpush1.bf16.msra.mxu0 %v5337_v57  ;;  %v5349_v18 = vld [vmem:[%s7513_s1 + $0x4a8] ss:$16 sps:$4 sm:$0xff]  }
 0x144   :  { %3686 = vmatpush1.bf16.msra.mxu1 %v5340_v58  ;;  %v3352_v5 = vpop.f32.mrf.mxu0  ;;  %3646 = vmatprep.subr.bf16.mxu0 %v5345_v61  ;;  %v5352_v37 = vld [vmem:[%s7513_s1 + $0x6a8] ss:$16 sps:$4 sm:$0xff]  }
 0x145   :  { %v3393_v7 = vpop.f32.mrf.mxu1  ;;  %3687 = vmatprep.subr.bf16.mxu1 %v5348_v62  ;;  %v6825_v11 = vadd.f32 %v3391_v3, %v3351_v4  ;;  %v3353_v13 = vadd.f32 %v3352_v5, %v6634_v46  ;;  %3676 = vmatprep.mubr.bf16.mxu0 %v5939_v17  ;;  %v5360_v17 = vld [vmem:[%s7513_s1 + $0x68c] ss:$16 sps:$4 sm:$0xff]  }
 0x146   :  { %3717 = vmatprep.mubr.bf16.mxu1 %v5959_v23  ;;  %v3354_v12 = vpop.f32.mrf.mxu0  ;;  %v5355_v23 = vld [vmem:[%s7513_s1 + $0x488] ss:$16 sps:$4 sm:$0xff]  }
 0x147   :  { %v3395_v14 = vpop.f32.mrf.mxu1  ;;  %v6836_v15 = vadd.f32 %v3393_v7, %v3353_v13  ;;  %3647 = vmatpush1.bf16.msra.mxu0 %v5343_v63 }
 0x148   :  { %3688 = vmatpush1.bf16.msra.mxu1 %v5346_v1  ;;  %v3355_v49 = vpop.f32.mrf.mxu0  ;;  %3648 = vmatprep.subr.bf16.mxu0 %v5351_v8 }
 0x149   :  { %v3396_v46 = vpop.f32.mrf.mxu1  ;;  %3689 = vmatprep.subr.bf16.mxu1 %v5354_v9 }
 0x14b   :  { %3649 = vmatpush1.bf16.msra.mxu0 %v5349_v18 }
 0x14c   :  { %3690 = vmatpush1.bf16.msra.mxu1 %v5352_v37  ;;  %3650 = vmatprep.subr.bf16.mxu0 %v5357_v16 }
 0x14d   :  { %3691 = vmatprep.subr.bf16.mxu1 %v5360_v17 }
 0x14f   :  { %3651 = vmatpush1.bf16.msra.mxu0 %v5355_v23 }
 0x150   :  { %3692 = vmatpush1.bf16.msra.mxu1 %v5358_v19  ;;  %3652 = vmatprep.subr.bf16.mxu0 %v5363_v20 }
 0x151   :  { %3693 = vmatprep.subr.bf16.mxu1 %v5366_v21 }
 0x153   :  { %3653 = vmatpush1.bf16.msra.mxu0 %v5361_v22 }
 0x154   :  { %3694 = vmatpush1.bf16.msra.mxu1 %v5364_v24  ;;  %3654 = vmatprep.subr.bf16.mxu0 %v5369_v25 }
 0x155   :  { %3695 = vmatprep.subr.bf16.mxu1 %v5372_v27 }
 0x157   :  { %3655 = vmatpush1.bf16.msra.mxu0 %v5367_v28 }
 0x158   :  { %3696 = vmatpush1.bf16.msra.mxu1 %v5370_v29  ;;  %3656 = vmatprep.subr.bf16.mxu0 %v5375_v30 }
 0x159   :  { %3697 = vmatprep.subr.bf16.mxu1 %v5378_v31 }
 0x15b   :  { %3657 = vmatpush1.bf16.msra.mxu0 %v5373_v33 }
 0x15c   :  { %3698 = vmatpush1.bf16.msra.mxu1 %v5376_v34  ;;  %3658 = vmatprep.subr.bf16.mxu0 %v5381_v36 }
 0x15d   :  { %3699 = vmatprep.subr.bf16.mxu1 %v5384_v38 }
 0x15f   :  { %3659 = vmatpush1.bf16.msra.mxu0 %v5379_v32 }
 0x160   :  { %3700 = vmatpush1.bf16.msra.mxu1 %v5382_v40  ;;  %3660 = vmatprep.subr.bf16.mxu0 %v5387_v44 }
 0x161   :  { %3701 = vmatprep.subr.bf16.mxu1 %v5390_v45 }
 0x162   :  { %10 = vsyncpa [#allocation3], 0  ;;  %v5391_v0 = vld [vmem:[%s7513_s1 + $0x5c8] ss:$16 sps:$4 sm:$0xff]   ;;  %v5399_v53 = vld [vmem:[%s7513_s1 + $0x5ac] ss:$16 sps:$4 sm:$0xff]  }
 0x163   :  { %3661 = vmatpush2.bf16.msra.mxu0 %v5385_v47  ;;  %v5394_v52 = vld [vmem:[%s7513_s1 + $0x7c8] ss:$16 sps:$4 sm:$0xff]   ;;  %v5402_v55 = vld [vmem:[%s7513_s1 + $0x7ac] ss:$16 sps:$4 sm:$0xff]   ;;  %vm4242_vm0 = vcmask 1041408   ;;  %s5683_s27 = smov [#allocation2]  }
 0x164   :  { %3702 = vmatpush2.bf16.msra.mxu1 %v5388_v48  ;;  %3662 = vmatprep.subr.bf16.mxu0 %v5393_v51  ;;  %v5397_v56 = vld [vmem:[%s7513_s1 + $0x5a8] ss:$16 sps:$4 sm:$0xff]   ;;  %v5405_v58 = vld [vmem:[%s7513_s1 + $0x58c] ss:$16 sps:$4 sm:$0xff]   ;;  %s4256_s28 = sshll.u32 %s5683_s27, 4  ;;  %s4257_s28 = int_to_ptr.vmem [resolvable:$true] %s4256_s28 }
 0x165   :  { %3703 = vmatprep.subr.bf16.mxu1 %v5396_v60  ;;  %v5400_v57 = vld [vmem:[%s7513_s1 + $0x7a8] ss:$16 sps:$4 sm:$0xff]   ;;  %v5408_v61 = vld [vmem:[%s7513_s1 + $0x78c] ss:$16 sps:$4 sm:$0xff]   ;;  %p5665_p1 = scmp.lt.s32.totalorder %s4257_s28, %s4257_s28 }
 0x166   :  { %v5403_v62 = vld [vmem:[%s7513_s1 + $0x588] ss:$16 sps:$4 sm:$0xff]   ;;  %v5411_v1 = vld [vmem:[%s7513_s1 + $0x56c] ss:$16 sps:$4 sm:$0xff]  }
 0x167   :  { %3663 = vmatpush2.bf16.msra.mxu0 %v5391_v0  ;;  %v5406_v63 = vld [vmem:[%s7513_s1 + $0x788] ss:$16 sps:$4 sm:$0xff]   ;;  %v5414_v2 = vld [vmem:[%s7513_s1 + $0x76c] ss:$16 sps:$4 sm:$0xff]  }
 0x168   :  { %3704 = vmatpush2.bf16.msra.mxu1 %v5394_v52  ;;  %3664 = vmatprep.subr.bf16.mxu0 %v5399_v53  ;;  %v5409_v3 = vld [vmem:[%s7513_s1 + $0x568] ss:$16 sps:$4 sm:$0xff]   ;;  %v5417_v5 = vld [vmem:[%s7513_s1 + $0x54c] ss:$16 sps:$4 sm:$0xff]  }
 0x169   :  { %3705 = vmatprep.subr.bf16.mxu1 %v5402_v55  ;;  %v5412_v4 = vld [vmem:[%s7513_s1 + $0x768] ss:$16 sps:$4 sm:$0xff]   ;;  %v5420_v7 = vld [vmem:[%s7513_s1 + $0x74c] ss:$16 sps:$4 sm:$0xff]  }
 0x16a   :  { %v5415_v8 = vld [vmem:[%s7513_s1 + $0x548] ss:$16 sps:$4 sm:$0xff]   ;;  %v5423_v13 = vld [vmem:[%s7513_s1 + $0x52c] ss:$16 sps:$4 sm:$0xff]  }
 0x16b   :  { %3665 = vmatpush2.bf16.msra.mxu0 %v5397_v56  ;;  %v5418_v9 = vld [vmem:[%s7513_s1 + $0x748] ss:$16 sps:$4 sm:$0xff]   ;;  %v5426_v18 = vld [vmem:[%s7513_s1 + $0x72c] ss:$16 sps:$4 sm:$0xff]  }
 0x16c   :  { %3706 = vmatpush2.bf16.msra.mxu1 %v5400_v57  ;;  %3666 = vmatprep.subr.bf16.mxu0 %v5405_v58  ;;  %v5421_v37 = vld [vmem:[%s7513_s1 + $0x528] ss:$16 sps:$4 sm:$0xff]   ;;  %v5429_v14 = vld [vmem:[%s7513_s1 + $0x50c] ss:$16 sps:$4 sm:$0xff]  }
 0x16d   :  { %3707 = vmatprep.subr.bf16.mxu1 %v5408_v61  ;;  %v5424_v12 = vld [vmem:[%s7513_s1 + $0x728] ss:$16 sps:$4 sm:$0xff]   ;;  %v5432_v49 = vld [vmem:[%s7513_s1 + $0x70c] ss:$16 sps:$4 sm:$0xff]  }
 0x16e   :  { %v5427_v46 = vld [vmem:[%s7513_s1 + $0x508] ss:$16 sps:$4 sm:$0xff]   ;;  %v5435_v17 = vld [vmem:[%s7513_s1 + $0x8ec] ss:$16 sps:$4 sm:$0xff]  }
 0x16f   :  { %3667 = vmatpush2.bf16.msra.mxu0 %v5403_v62  ;;  %v5430_v16 = vld [vmem:[%s7513_s1 + $0x708] ss:$16 sps:$4 sm:$0xff]   ;;  %v5438_v23 = vld [vmem:[%s7513_s1 + $0xaec] ss:$16 sps:$4 sm:$0xff]  }
 0x170   :  { %3708 = vmatpush2.bf16.msra.mxu1 %v5406_v63  ;;  %3668 = vmatprep.subr.bf16.mxu0 %v5411_v1  ;;  %v5433_v19 = vld [vmem:[%s7513_s1 + $0x8e8] ss:$16 sps:$4 sm:$0xff]   ;;  %v5441_v21 = vld [vmem:[%s7513_s1 + $0x8cc] ss:$16 sps:$4 sm:$0xff]  }
 0x171   :  { %3709 = vmatprep.subr.bf16.mxu1 %v5414_v2  ;;  %v5436_v20 = vld [vmem:[%s7513_s1 + $0xae8] ss:$16 sps:$4 sm:$0xff]   ;;  %v5444_v22 = vld [vmem:[%s7513_s1 + $0xacc] ss:$16 sps:$4 sm:$0xff]  }
 0x172   :  { %v5439_v28 = vld [vmem:[%s7513_s1 + $0x8c8] ss:$16 sps:$4 sm:$0xff]   ;;  %v5459_v48 = vld [vmem:[%s7513_s1 + $0x86c] ss:$16 sps:$4 sm:$0xff]  }
 0x173   :  { %3669 = vmatpush2.bf16.msra.mxu0 %v5409_v3  ;;  %v5442_v29 = vld [vmem:[%s7513_s1 + $0xac8] ss:$16 sps:$4 sm:$0xff]   ;;  %v5462_v51 = vld [vmem:[%s7513_s1 + $0xa6c] ss:$16 sps:$4 sm:$0xff]  }
 0x174   :  { %3710 = vmatpush2.bf16.msra.mxu1 %v5412_v4  ;;  %3670 = vmatprep.subr.bf16.mxu0 %v5417_v5  ;;  %v5445_v32 = vld [vmem:[%s7513_s1 + $0x8a8] ss:$16 sps:$4 sm:$0xff]   ;;  %v5465_v52 = vld [vmem:[%s7513_s1 + $0x84c] ss:$16 sps:$4 sm:$0xff]  }
 0x175   :  { %3711 = vmatprep.subr.bf16.mxu1 %v5420_v7  ;;  %v5448_v40 = vld [vmem:[%s7513_s1 + $0xaa8] ss:$16 sps:$4 sm:$0xff]   ;;  %v5468_v53 = vld [vmem:[%s7513_s1 + $0xa4c] ss:$16 sps:$4 sm:$0xff]  }
 0x176   :  { %v5451_v45 = vld [vmem:[%s7513_s1 + $0x888] ss:$16 sps:$4 sm:$0xff]   ;;  %v5471_v57 = vld [vmem:[%s7513_s1 + $0x82c] ss:$16 sps:$4 sm:$0xff]  }
 0x177   :  { %3671 = vmatpush2.bf16.msra.mxu0 %v5415_v8  ;;  %v5454_v47 = vld [vmem:[%s7513_s1 + $0xa88] ss:$16 sps:$4 sm:$0xff]   ;;  %v5474_v58 = vld [vmem:[%s7513_s1 + $0xa2c] ss:$16 sps:$4 sm:$0xff]  }
 0x178   :  { %3712 = vmatpush2.bf16.msra.mxu1 %v5418_v9  ;;  %3672 = vmatprep.subr.bf16.mxu0 %v5423_v13  ;;  %v5457_v60 = vld [vmem:[%s7513_s1 + $0x868] ss:$16 sps:$4 sm:$0xff]   ;;  %v5477_v63 = vld [vmem:[%s7513_s1 + $0x80c] ss:$16 sps:$4 sm:$0xff]  }
 0x179   :  { %3713 = vmatprep.subr.bf16.mxu1 %v5426_v18  ;;  %v5460_v0 = vld [vmem:[%s7513_s1 + $0xa68] ss:$16 sps:$4 sm:$0xff]   ;;  %v5480_v1 = vld [vmem:[%s7513_s1 + $0xa0c] ss:$16 sps:$4 sm:$0xff]  }
 0x17a   :  { %v5463_v55 = vld [vmem:[%s7513_s1 + $0x848] ss:$16 sps:$4 sm:$0xff]   ;;  %v5483_v4 = vld [vmem:[%s7513_s1 + $0x9ec] ss:$16 sps:$4 sm:$0xff]  }
 0x17b   :  { %3673 = vmatpush2.bf16.msra.mxu0 %v5421_v37  ;;  %v5466_v56 = vld [vmem:[%s7513_s1 + $0xa48] ss:$16 sps:$4 sm:$0xff]   ;;  %v5486_v5 = vld [vmem:[%s7513_s1 + $0xbec] ss:$16 sps:$4 sm:$0xff]  }
 0x17c   :  { %3714 = vmatpush2.bf16.msra.mxu1 %v5424_v12  ;;  %3674 = vmatprep.subr.bf16.mxu0 %v5429_v14  ;;  %v5469_v61 = vld [vmem:[%s7513_s1 + $0x828] ss:$16 sps:$4 sm:$0xff]   ;;  %v5489_v9 = vld [vmem:[%s7513_s1 + $0x9cc] ss:$16 sps:$4 sm:$0xff]  }
 0x17d   :  { %3715 = vmatprep.subr.bf16.mxu1 %v5432_v49  ;;  %v5472_v62 = vld [vmem:[%s7513_s1 + $0xa28] ss:$16 sps:$4 sm:$0xff]   ;;  %v5492_v13 = vld [vmem:[%s7513_s1 + $0xbcc] ss:$16 sps:$4 sm:$0xff]  }
 0x17e   :  { %v5475_v2 = vld [vmem:[%s7513_s1 + $0x808] ss:$16 sps:$4 sm:$0xff]   ;;  %v5495_v12 = vld [vmem:[%s7513_s1 + $0x9ac] ss:$16 sps:$4 sm:$0xff]  }
 0x17f   :  { %3675 = vmatpush2.bf16.msra.mxu0 %v5427_v46  ;;  %v5478_v3 = vld [vmem:[%s7513_s1 + $0xa08] ss:$16 sps:$4 sm:$0xff]   ;;  %v5498_v14 = vld [vmem:[%s7513_s1 + $0xbac] ss:$16 sps:$4 sm:$0xff]  }
 0x180   :  { %3716 = vmatpush2.bf16.msra.mxu1 %v5430_v16  ;;  %3726 = vmatprep.subr.bf16.mxu0 %v5435_v17  ;;  %v5481_v7 = vld [vmem:[%s7513_s1 + $0x9e8] ss:$16 sps:$4 sm:$0xff]   ;;  %v5501_v16 = vld [vmem:[%s7513_s1 + $0x98c] ss:$16 sps:$4 sm:$0xff]  }
 0x181   :  { %3767 = vmatprep.subr.bf16.mxu1 %v5438_v23  ;;  %v5484_v8 = vld [vmem:[%s7513_s1 + $0xbe8] ss:$16 sps:$4 sm:$0xff]   ;;  %v5504_v17 = vld [vmem:[%s7513_s1 + $0xb8c] ss:$16 sps:$4 sm:$0xff]  }
 0x182   :  { %v3432_v24 = vpop.f32.mrf.mxu0  ;;  %3677 = vmatmul.mubr.bf16.vlgmr.msra.gmra.mxu0 %v6138_v26  ;;  %v5447_v26 = vld [vmem:[%s7513_s1 + $0x8ac] ss:$16 sps:$4 sm:$0xff]   ;;  %v5487_v18 = vld [vmem:[%s7513_s1 + $0x9c8] ss:$16 sps:$4 sm:$0xff]  }
 0x183   :  { %v3473_v25 = vpop.f32.mrf.mxu1  ;;  %3718 = vmatmul.mubr.bf16.vlgmr.msra.gmra.mxu1 %v6151_v6  ;;  %v3433_v27 = vadd.f32 %v3432_v24, %v6825_v11  ;;  %3727 = vmatpush1.bf16.msra.mxu0 %v5433_v19  ;;  %v5450_v6 = vld [vmem:[%s7513_s1 + $0xaac] ss:$16 sps:$4 sm:$0xff]   ;;  %v5490_v37 = vld [vmem:[%s7513_s1 + $0xbc8] ss:$16 sps:$4 sm:$0xff]  }
 0x184   :  { %3768 = vmatpush1.bf16.msra.mxu1 %v5436_v20  ;;  %v3434_v30 = vpop.f32.mrf.mxu0  ;;  %3728 = vmatprep.subr.bf16.mxu0 %v5441_v21  ;;  %v5493_v49 = vld [vmem:[%s7513_s1 + $0x9a8] ss:$16 sps:$4 sm:$0xff]   ;;  %v5507_v20 = vld [vmem:[%s7513_s1 + $0x96c] ss:$16 sps:$4 sm:$0xff]  }
 0x185   :  { %v3475_v31 = vpop.f32.mrf.mxu1  ;;  %3769 = vmatprep.subr.bf16.mxu1 %v5444_v22  ;;  %v7027_v11 = vadd.f32 %v3473_v25, %v3433_v27  ;;  %v3435_v33 = vadd.f32 %v3434_v30, %v6836_v15  ;;  %3758 = vmatprep.mubr.bf16.mxu0 %v6191_v41  ;;  %v5453_v41 = vld [vmem:[%s7513_s1 + $0x88c] ss:$16 sps:$4 sm:$0xff]   ;;  %v5496_v46 = vld [vmem:[%s7513_s1 + $0xba8] ss:$16 sps:$4 sm:$0xff]  }
 0x186   :  { %3799 = vmatprep.mubr.bf16.mxu1 %v6196_v43  ;;  %v3436_v34 = vpop.f32.mrf.mxu0  ;;  %v5456_v43 = vld [vmem:[%s7513_s1 + $0xa8c] ss:$16 sps:$4 sm:$0xff]   ;;  %v5499_v23 = vld [vmem:[%s7513_s1 + $0x988] ss:$16 sps:$4 sm:$0xff]  }
 0x187   :  { %v3477_v36 = vpop.f32.mrf.mxu1  ;;  %v7032_v38 = vadd.f32 %v3475_v31, %v3435_v33  ;;  %3729 = vmatpush1.bf16.msra.mxu0 %v5439_v28  ;;  %v5502_v19 = vld [vmem:[%s7513_s1 + $0xb88] ss:$16 sps:$4 sm:$0xff]   ;;  %v5510_v21 = vld [vmem:[%s7513_s1 + $0xb6c] ss:$16 sps:$4 sm:$0xff]  }
 0x188   :  { %3770 = vmatpush1.bf16.msra.mxu1 %v5442_v29  ;;  %v3437_v44 = vpop.f32.mrf.mxu0  ;;  %3730 = vmatprep.subr.bf16.mxu0 %v5447_v26  ;;  %v5505_v22 = vld [vmem:[%s7513_s1 + $0x968] ss:$16 sps:$4 sm:$0xff]   ;;  %v5513_v25 = vld [vmem:[%s7513_s1 + $0x94c] ss:$16 sps:$4 sm:$0xff]  }
 0x189   :  { %v3478_v15 = vpop.f32.mrf.mxu1  ;;  %3771 = vmatprep.subr.bf16.mxu1 %v5450_v6  ;;  %v5508_v24 = vld [vmem:[%s7513_s1 + $0xb68] ss:$16 sps:$4 sm:$0xff]   ;;  %v5516_v27 = vld [vmem:[%s7513_s1 + $0xb4c] ss:$16 sps:$4 sm:$0xff]  }
 0x18a   :  { %v5511_v28 = vld [vmem:[%s7513_s1 + $0x948] ss:$16 sps:$4 sm:$0xff]   ;;  %v5519_v30 = vld [vmem:[%s7513_s1 + $0x92c] ss:$16 sps:$4 sm:$0xff]  }
 0x18b   :  { %3731 = vmatpush1.bf16.msra.mxu0 %v5445_v32  ;;  %v5514_v29 = vld [vmem:[%s7513_s1 + $0xb48] ss:$16 sps:$4 sm:$0xff]   ;;  %v5522_v31 = vld [vmem:[%s7513_s1 + $0xb2c] ss:$16 sps:$4 sm:$0xff]  }
 0x18c   :  { %3772 = vmatpush1.bf16.msra.mxu1 %v5448_v40  ;;  %3732 = vmatprep.subr.bf16.mxu0 %v5453_v41  ;;  %v5517_v26 = vld [vmem:[%s7513_s1 + $0x928] ss:$16 sps:$4 sm:$0xff]   ;;  %v5525_v33 = vld [vmem:[%s7513_s1 + $0x90c] ss:$16 sps:$4 sm:$0xff]  }
 0x18d   :  { %3773 = vmatprep.subr.bf16.mxu1 %v5456_v43  ;;  %v5520_v6 = vld [vmem:[%s7513_s1 + $0xb28] ss:$16 sps:$4 sm:$0xff]   ;;  %v5528_v34 = vld [vmem:[%s7513_s1 + $0xb0c] ss:$16 sps:$4 sm:$0xff]  }
 0x18e   :  { %v5523_v36 = vld [vmem:[%s7513_s1 + $0x908] ss:$16 sps:$4 sm:$0xff]   ;;  %v5531_v40 = vld [vmem:[%s7513_s1 + $0xcec] ss:$16 sps:$4 sm:$0xff]  }
 0x18f   :  { %3733 = vmatpush1.bf16.msra.mxu0 %v5451_v45  ;;  %v5526_v32 = vld [vmem:[%s7513_s1 + $0xb08] ss:$16 sps:$4 sm:$0xff]   ;;  %v5534_v44 = vld [vmem:[%s7513_s1 + $0xeec] ss:$16 sps:$4 sm:$0xff]  }
 0x190   :  { %3774 = vmatpush1.bf16.msra.mxu1 %v5454_v47  ;;  %3734 = vmatprep.subr.bf16.mxu0 %v5459_v48  ;;  %v5529_v15 = vld [vmem:[%s7513_s1 + $0xce8] ss:$16 sps:$4 sm:$0xff]   ;;  %v5537_v43 = vld [vmem:[%s7513_s1 + $0xccc] ss:$16 sps:$4 sm:$0xff]  }
 0x191   :  { %3775 = vmatprep.subr.bf16.mxu1 %v5462_v51  ;;  %v5532_v41 = vld [vmem:[%s7513_s1 + $0xee8] ss:$16 sps:$4 sm:$0xff]   ;;  %v5540_v45 = vld [vmem:[%s7513_s1 + $0xecc] ss:$16 sps:$4 sm:$0xff]  }
 0x193   :  { %3735 = vmatpush1.bf16.msra.mxu0 %v5457_v60  ;;  %v5535_v60 = vld [vmem:[%s7513_s1 + $0xcc8] ss:$16 sps:$4 sm:$0xff]  }
 0x194   :  { %3776 = vmatpush1.bf16.msra.mxu1 %v5460_v0  ;;  %3736 = vmatprep.subr.bf16.mxu0 %v5465_v52  ;;  %v5538_v0 = vld [vmem:[%s7513_s1 + $0xec8] ss:$16 sps:$4 sm:$0xff]  }
 0x195   :  { %3777 = vmatprep.subr.bf16.mxu1 %v5468_v53 }
 0x197   :  { %3737 = vmatpush1.bf16.msra.mxu0 %v5463_v55 }
 0x198   :  { %3778 = vmatpush1.bf16.msra.mxu1 %v5466_v56  ;;  %3738 = vmatprep.subr.bf16.mxu0 %v5471_v57  ;;  %v5541_v57 = vld [vmem:[%s7513_s1 + $0xca8] ss:$16 sps:$4 sm:$0xff]  }
 0x199   :  { %3779 = vmatprep.subr.bf16.mxu1 %v5474_v58  ;;  %v5544_v58 = vld [vmem:[%s7513_s1 + $0xea8] ss:$16 sps:$4 sm:$0xff]  }
 0x19b   :  { %3739 = vmatpush1.bf16.msra.mxu0 %v5469_v61 }
 0x19c   :  { %3780 = vmatpush1.bf16.msra.mxu1 %v5472_v62  ;;  %3740 = vmatprep.subr.bf16.mxu0 %v5477_v63  ;;  %v5547_v63 = vld [vmem:[%s7513_s1 + $0xc88] ss:$16 sps:$4 sm:$0xff]  }
 0x19d   :  { %3781 = vmatprep.subr.bf16.mxu1 %v5480_v1  ;;  %v5550_v1 = vld [vmem:[%s7513_s1 + $0xe88] ss:$16 sps:$4 sm:$0xff]  }
 0x19f   :  { %3741 = vmatpush1.bf16.msra.mxu0 %v5475_v2  ;;  %v5555_v2 = vld [vmem:[%s7513_s1 + $0xc6c] ss:$16 sps:$4 sm:$0xff]  }
 0x1a0   :  { %3782 = vmatpush1.bf16.msra.mxu1 %v5478_v3  ;;  %3742 = vmatprep.subr.bf16.mxu0 %v5483_v4  ;;  %v5558_v3 = vld [vmem:[%s7513_s1 + $0xe6c] ss:$16 sps:$4 sm:$0xff]   ;;  %v5553_v4 = vld [vmem:[%s7513_s1 + $0xc68] ss:$16 sps:$4 sm:$0xff]  }
 0x1a1   :  { %3783 = vmatprep.subr.bf16.mxu1 %v5486_v5  ;;  %v5556_v5 = vld [vmem:[%s7513_s1 + $0xe68] ss:$16 sps:$4 sm:$0xff]  }
 0x1a3   :  { %3743 = vmatpush2.bf16.msra.mxu0 %v5481_v7  ;;  %v5561_v7 = vld [vmem:[%s7513_s1 + $0xc4c] ss:$16 sps:$4 sm:$0xff]  }
 0x1a4   :  { %3784 = vmatpush2.bf16.msra.mxu1 %v5484_v8  ;;  %3744 = vmatprep.subr.bf16.mxu0 %v5489_v9  ;;  %v5564_v8 = vld [vmem:[%s7513_s1 + $0xe4c] ss:$16 sps:$4 sm:$0xff]   ;;  %v5559_v9 = vld [vmem:[%s7513_s1 + $0xc48] ss:$16 sps:$4 sm:$0xff]  }
 0x1a5   :  { %3785 = vmatprep.subr.bf16.mxu1 %v5492_v13  ;;  %v5562_v13 = vld [vmem:[%s7513_s1 + $0xe48] ss:$16 sps:$4 sm:$0xff]  }
 0x1a7   :  { %3745 = vmatpush2.bf16.msra.mxu0 %v5487_v18  ;;  %v5567_v18 = vld [vmem:[%s7513_s1 + $0xc2c] ss:$16 sps:$4 sm:$0xff]  }
 0x1a8   :  { %3786 = vmatpush2.bf16.msra.mxu1 %v5490_v37  ;;  %3746 = vmatprep.subr.bf16.mxu0 %v5495_v12  ;;  %v5570_v37 = vld [vmem:[%s7513_s1 + $0xe2c] ss:$16 sps:$4 sm:$0xff]   ;;  %v5565_v12 = vld [vmem:[%s7513_s1 + $0xc28] ss:$16 sps:$4 sm:$0xff]  }
 0x1a9   :  { %3787 = vmatprep.subr.bf16.mxu1 %v5498_v14  ;;  %v5568_v14 = vld [vmem:[%s7513_s1 + $0xe28] ss:$16 sps:$4 sm:$0xff]  }
 0x1ab   :  { %3747 = vmatpush2.bf16.msra.mxu0 %v5493_v49  ;;  %v5573_v49 = vld [vmem:[%s7513_s1 + $0xc0c] ss:$16 sps:$4 sm:$0xff]  }
 0x1ac   :  { %3788 = vmatpush2.bf16.msra.mxu1 %v5496_v46  ;;  %3748 = vmatprep.subr.bf16.mxu0 %v5501_v16  ;;  %v5576_v46 = vld [vmem:[%s7513_s1 + $0xe0c] ss:$16 sps:$4 sm:$0xff]   ;;  %v5571_v16 = vld [vmem:[%s7513_s1 + $0xc08] ss:$16 sps:$4 sm:$0xff]  }
 0x1ad   :  { %3789 = vmatprep.subr.bf16.mxu1 %v5504_v17  ;;  %v5574_v17 = vld [vmem:[%s7513_s1 + $0xe08] ss:$16 sps:$4 sm:$0xff]  }
 0x1af   :  { %3749 = vmatpush2.bf16.msra.mxu0 %v5499_v23  ;;  %v5579_v23 = vld [vmem:[%s7513_s1 + $0xdec] ss:$16 sps:$4 sm:$0xff]  }
 0x1b0   :  { %3790 = vmatpush2.bf16.msra.mxu1 %v5502_v19  ;;  %3750 = vmatprep.subr.bf16.mxu0 %v5507_v20  ;;  %v5582_v19 = vld [vmem:[%s7513_s1 + $0xfec] ss:$16 sps:$4 sm:$0xff]   ;;  %v5577_v20 = vld [vmem:[%s7513_s1 + $0xde8] ss:$16 sps:$4 sm:$0xff]  }
 0x1b1   :  { %3791 = vmatprep.subr.bf16.mxu1 %v5510_v21  ;;  %v5580_v21 = vld [vmem:[%s7513_s1 + $0xfe8] ss:$16 sps:$4 sm:$0xff]  }
 0x1b3   :  { %3751 = vmatpush2.bf16.msra.mxu0 %v5505_v22  ;;  %v5585_v22 = vld [vmem:[%s7513_s1 + $0xdcc] ss:$16 sps:$4 sm:$0xff]  }
 0x1b4   :  { %3792 = vmatpush2.bf16.msra.mxu1 %v5508_v24  ;;  %3752 = vmatprep.subr.bf16.mxu0 %v5513_v25  ;;  %v5588_v24 = vld [vmem:[%s7513_s1 + $0xfcc] ss:$16 sps:$4 sm:$0xff]   ;;  %v5583_v25 = vld [vmem:[%s7513_s1 + $0xdc8] ss:$16 sps:$4 sm:$0xff]  }
 0x1b5   :  { %3793 = vmatprep.subr.bf16.mxu1 %v5516_v27  ;;  %v5586_v27 = vld [vmem:[%s7513_s1 + $0xfc8] ss:$16 sps:$4 sm:$0xff]  }
 0x1b7   :  { %3753 = vmatpush2.bf16.msra.mxu0 %v5511_v28  ;;  %v5591_v28 = vld [vmem:[%s7513_s1 + $0xdac] ss:$16 sps:$4 sm:$0xff]  }
 0x1b8   :  { %3794 = vmatpush2.bf16.msra.mxu1 %v5514_v29  ;;  %3754 = vmatprep.subr.bf16.mxu0 %v5519_v30  ;;  %v5594_v29 = vld [vmem:[%s7513_s1 + $0xfac] ss:$16 sps:$4 sm:$0xff]   ;;  %v5589_v30 = vld [vmem:[%s7513_s1 + $0xda8] ss:$16 sps:$4 sm:$0xff]  }
 0x1b9   :  { %3795 = vmatprep.subr.bf16.mxu1 %v5522_v31  ;;  %v5592_v31 = vld [vmem:[%s7513_s1 + $0xfa8] ss:$16 sps:$4 sm:$0xff]  }
 0x1bb   :  { %3755 = vmatpush2.bf16.msra.mxu0 %v5517_v26  ;;  %v5597_v26 = vld [vmem:[%s7513_s1 + $0xd8c] ss:$16 sps:$4 sm:$0xff]  }
 0x1bc   :  { %3796 = vmatpush2.bf16.msra.mxu1 %v5520_v6  ;;  %3756 = vmatprep.subr.bf16.mxu0 %v5525_v33  ;;  %v5600_v6 = vld [vmem:[%s7513_s1 + $0xf8c] ss:$16 sps:$4 sm:$0xff]   ;;  %v5595_v33 = vld [vmem:[%s7513_s1 + $0xd88] ss:$16 sps:$4 sm:$0xff]  }
 0x1bd   :  { %3797 = vmatprep.subr.bf16.mxu1 %v5528_v34  ;;  %v5598_v34 = vld [vmem:[%s7513_s1 + $0xf88] ss:$16 sps:$4 sm:$0xff]  }
 0x1bf   :  { %3757 = vmatpush2.bf16.msra.mxu0 %v5523_v36  ;;  %v5603_v36 = vld [vmem:[%s7513_s1 + $0xd6c] ss:$16 sps:$4 sm:$0xff]  }
 0x1c0   :  { %3798 = vmatpush2.bf16.msra.mxu1 %v5526_v32  ;;  %3808 = vmatprep.subr.bf16.mxu0 %v5531_v40  ;;  %v5606_v32 = vld [vmem:[%s7513_s1 + $0xf6c] ss:$16 sps:$4 sm:$0xff]   ;;  %v5601_v40 = vld [vmem:[%s7513_s1 + $0xd68] ss:$16 sps:$4 sm:$0xff]  }
 0x1c1   :  { %3849 = vmatprep.subr.bf16.mxu1 %v5534_v44  ;;  %v5604_v44 = vld [vmem:[%s7513_s1 + $0xf68] ss:$16 sps:$4 sm:$0xff]  }
 0x1c2   :  { %v3514_v47 = vpop.f32.mrf.mxu0  ;;  %3759 = vmatmul.mubr.bf16.vlgmr.msra.gmra.mxu0 %v6367_v50  ;;  %v5543_v50 = vld [vmem:[%s7513_s1 + $0xcac] ss:$16 sps:$4 sm:$0xff]  }
 0x1c3   :  { %v3555_v48 = vpop.f32.mrf.mxu1  ;;  %3800 = vmatmul.mubr.bf16.vlgmr.msra.gmra.mxu1 %v6383_v35  ;;  %v3515_v51 = vadd.f32 %v3514_v47, %v7027_v11  ;;  %3809 = vmatpush1.bf16.msra.mxu0 %v5529_v15  ;;  %v5546_v35 = vld [vmem:[%s7513_s1 + $0xeac] ss:$16 sps:$4 sm:$0xff]  }
 0x1c4   :  { %3850 = vmatpush1.bf16.msra.mxu1 %v5532_v41  ;;  %v7223_v52 = vpop.f32.mrf.mxu0  ;;  %3810 = vmatprep.subr.bf16.mxu0 %v5537_v43  ;;  %v5609_v15 = vld [vmem:[%s7513_s1 + $0xd4c] ss:$16 sps:$4 sm:$0xff]   ;;  %v5607_v43 = vld [vmem:[%s7513_s1 + $0xd48] ss:$16 sps:$4 sm:$0xff]  }
 0x1c5   :  { %v7225_v53 = vpop.f32.mrf.mxu1  ;;  %3851 = vmatprep.subr.bf16.mxu1 %v5540_v45  ;;  %v7233_v11 = vadd.f32 %v3555_v48, %v3515_v51  ;;  %3840 = vmatprep.mubr.bf16.mxu0 %v6379_v54  ;;  %v5549_v54 = vld [vmem:[%s7513_s1 + $0xc8c] ss:$16 sps:$4 sm:$0xff]   ;;  %v5610_v45 = vld [vmem:[%s7513_s1 + $0xf48] ss:$16 sps:$4 sm:$0xff]   ;;  %v3517_v51 = vadd.f32 %v7223_v52, %v7032_v38 }
 0x1c6   :  { %3881 = vmatprep.mubr.bf16.mxu1 %v6399_v59  ;;  %v3518_v55 = vpop.f32.mrf.mxu0  ;;  %v5552_v59 = vld [vmem:[%s7513_s1 + $0xe8c] ss:$16 sps:$4 sm:$0xff]  }
 0x1c7   :  { %v3559_v56 = vpop.f32.mrf.mxu1  ;;  %3811 = vmatpush1.bf16.msra.mxu0 %v5535_v60  ;;  %v5612_v41 = vld [vmem:[%s7513_s1 + $0xf4c] ss:$16 sps:$4 sm:$0xff]   ;;  %v5613_v60 = vld [vmem:[%s7513_s1 + $0xd28] ss:$16 sps:$4 sm:$0xff]   ;;  %v3558_v52 = vadd.f32 %v7225_v53, %v3517_v51  ;;  %v552_v53 = vsub.s32 3, %v5831_v42 }
 0x1c8   :  { %3852 = vmatpush1.bf16.msra.mxu1 %v5538_v0  ;;  %v3519_v61 = vpop.f32.mrf.mxu0  ;;  %3812 = vmatprep.subr.bf16.mxu0 %v5543_v50  ;;  %v5615_v47 = vld [vmem:[%s7513_s1 + $0xd2c] ss:$16 sps:$4 sm:$0xff]   ;;  %v5616_v0 = vld [vmem:[%s7513_s1 + $0xf28] ss:$16 sps:$4 sm:$0xff]   ;;  %v548_v56 = vsub.s32 2, %v5831_v42 }
 0x1c9   :  { %v3560_v62 = vpop.f32.mrf.mxu1  ;;  %3853 = vmatprep.subr.bf16.mxu1 %v5546_v35  ;;  %v5618_v48 = vld [vmem:[%s7513_s1 + $0xf2c] ss:$16 sps:$4 sm:$0xff]   ;;  %v5619_v35 = vld [vmem:[%s7513_s1 + $0xd08] ss:$16 sps:$4 sm:$0xff]   ;;  %v5659_v61 = vld [vmem:[%s7514_s2] sm:$0xf] }
 0x1ca   :  { %v5621_v50 = vld [vmem:[%s7513_s1 + $0xd0c] ss:$16 sps:$4 sm:$0xff]   ;;  %v5622_v55 = vld [vmem:[%s7513_s1 + $0xf08] ss:$16 sps:$4 sm:$0xff]   ;;  %v549_v62 = vrot.slane %v5659_v61, %v548_v56  ;;  %v5656_v56 = vld [vmem:[%s7515_s3 + $0x80] sm:$0xff]  }
 0x1cb   :  { %3813 = vmatpush1.bf16.msra.mxu0 %v5541_v57  ;;  %v5624_v38 = vld [vmem:[%s7513_s1 + $0xf0c] ss:$16 sps:$4 sm:$0xff]  }
 0x1cc   :  { %3854 = vmatpush1.bf16.msra.mxu1 %v5544_v58  ;;  %3814 = vmatprep.subr.bf16.mxu0 %v5549_v54  ;;  %v5625_v57 = vld [vmem:[%s7515_s3 + $0x78] sm:$0xff]   ;;  %v3891_v58 = vmax.f32 %v3558_v52, 0.0 }
 0x1cd   :  { %3855 = vmatprep.subr.bf16.mxu1 %v5552_v59  ;;  %v5626_v54 = vld [vmem:[%s7515_s3 + $0x38] sm:$0xff]   ;;  %v5627_v59 = vld [vmem:[%s7515_s3 + $0x70] sm:$0xff]  }
 0x1cf   :  { %3815 = vmatpush1.bf16.msra.mxu0 %v5547_v63  ;;  %v3895_v63 = vpack.c.bf16 %v3891_v58, %v3891_v58 }
 0x1d0   :  { %3856 = vmatpush1.bf16.msra.mxu1 %v5550_v1  ;;  %3816 = vmatprep.subr.bf16.mxu0 %v5555_v2  ;;  %v553_v1 = vrot.slane %v5659_v61, %v552_v53 }
 0x1d1   :  { %3857 = vmatprep.subr.bf16.mxu1 %v5558_v3 }
 0x1d3   :  { %3817 = vmatpush1.bf16.msra.mxu0 %v5553_v4  ;;  %v5628_v4 = vld [vmem:[%s7515_s3 + $0x30] sm:$0xff]  }
 0x1d4   :  { %3858 = vmatpush1.bf16.msra.mxu1 %v5556_v5  ;;  %3818 = vmatprep.subr.bf16.mxu0 %v5561_v7 }
 0x1d5   :  { %3859 = vmatprep.subr.bf16.mxu1 %v5564_v8  ;;  %v5629_v8 = vld [vmem:[%s7515_s3 + $0x68] sm:$0xff]  }
 0x1d7   :  { %3819 = vmatpush1.bf16.msra.mxu0 %v5559_v9 }
 0x1d8   :  { %3860 = vmatpush1.bf16.msra.mxu1 %v5562_v13  ;;  %3820 = vmatprep.subr.bf16.mxu0 %v5567_v18 }
 0x1d9   :  { %3861 = vmatprep.subr.bf16.mxu1 %v5570_v37 }
 0x1db   :  { %3821 = vmatpush1.bf16.msra.mxu0 %v5565_v12  ;;  %v5631_v12 = vld [vmem:[%s7515_s3 + $0x60] sm:$0xff]  }
 0x1dc   :  { %3862 = vmatpush1.bf16.msra.mxu1 %v5568_v14  ;;  %3822 = vmatprep.subr.bf16.mxu0 %v5573_v49 }
 0x1dd   :  { %3863 = vmatprep.subr.bf16.mxu1 %v5576_v46  ;;  %v5641_v46 = vld [vmem:[%s7515_s3 + $0xf8] sm:$0xff]  }
 0x1df   :  { %3823 = vmatpush1.bf16.msra.mxu0 %v5571_v16  ;;  %v5642_v16 = vld [vmem:[%s7515_s3 + $0xb8] sm:$0xff]  }
 0x1e0   :  { %3864 = vmatpush1.bf16.msra.mxu1 %v5574_v17  ;;  %3824 = vmatprep.subr.bf16.mxu0 %v5579_v23  ;;  %v5643_v17 = vld [vmem:[%s7515_s3 + $0xf0] sm:$0xff]   ;;  %v5632_v23 = vld [vmem:[%s7515_s3 + $0x20] sm:$0xff]  }
 0x1e1   :  { %3865 = vmatprep.subr.bf16.mxu1 %v5582_v19  ;;  %v5644_v19 = vld [vmem:[%s7515_s3 + $0xb0] sm:$0xff]  }
 0x1e3   :  { %3825 = vmatpush2.bf16.msra.mxu0 %v5577_v20  ;;  %v5633_v20 = vld [vmem:[%s7515_s3 + $0x58] sm:$0xff]  }
 0x1e4   :  { %3866 = vmatpush2.bf16.msra.mxu1 %v5580_v21  ;;  %3826 = vmatprep.subr.bf16.mxu0 %v5585_v22  ;;  %v5645_v21 = vld [vmem:[%s7515_s3 + $0xe8] sm:$0xff]   ;;  %v5634_v22 = vld [vmem:[%s7515_s3 + $0x18] sm:$0xff]  }
 0x1e5   :  { %3867 = vmatprep.subr.bf16.mxu1 %v5588_v24  ;;  %v5646_v24 = vld [vmem:[%s7515_s3 + $0xa8] sm:$0xff]  }
 0x1e7   :  { %3827 = vmatpush2.bf16.msra.mxu0 %v5583_v25  ;;  %v5635_v25 = vld [vmem:[%s7515_s3 + $0x50] sm:$0xff]  }
 0x1e8   :  { %3868 = vmatpush2.bf16.msra.mxu1 %v5586_v27  ;;  %3828 = vmatprep.subr.bf16.mxu0 %v5591_v28  ;;  %v5647_v27 = vld [vmem:[%s7515_s3 + $0xe0] sm:$0xff]   ;;  %v5636_v28 = vld [vmem:[%s7515_s3 + $0x10] sm:$0xff]  }
 0x1e9   :  { %3869 = vmatprep.subr.bf16.mxu1 %v5594_v29  ;;  %v5648_v29 = vld [vmem:[%s7515_s3 + $0xa0] sm:$0xff]  }
 0x1eb   :  { %3829 = vmatpush2.bf16.msra.mxu0 %v5589_v30  ;;  %v5637_v30 = vld [vmem:[%s7515_s3 + $0x48] sm:$0xff]  }
 0x1ec   :  { %3870 = vmatpush2.bf16.msra.mxu1 %v5592_v31  ;;  %3830 = vmatprep.subr.bf16.mxu0 %v5597_v26  ;;  %v5649_v31 = vld [vmem:[%s7515_s3 + $0xd8] sm:$0xff]   ;;  %v5638_v26 = vld [vmem:[%s7515_s3 + $0x8] sm:$0xff]  }
 0x1ed   :  { %3871 = vmatprep.subr.bf16.mxu1 %v5600_v6  ;;  %v5650_v6 = vld [vmem:[%s7515_s3 + $0x98] sm:$0xff]  }
 0x1ef   :  { %3831 = vmatpush2.bf16.msra.mxu0 %v5595_v33  ;;  %v5639_v33 = vld [vmem:[%s7515_s3 + $0x40] sm:$0xff]  }
 0x1f0   :  { %3872 = vmatpush2.bf16.msra.mxu1 %v5598_v34  ;;  %3832 = vmatprep.subr.bf16.mxu0 %v5603_v36  ;;  %v5640_v34 = vld [vmem:[%s7515_s3] sm:$0xff]   ;;  %v3890_v36 = vmax.f32 %v7233_v11, 0.0  ;;  %v5653_v11 = vld [vmem:[%s7515_s3 + $0xc8] sm:$0xff]  }
 0x1f1   :  { %3873 = vmatprep.subr.bf16.mxu1 %v5606_v32 }
 0x1f2   :  { %v3894_v32 = vpack.c.bf16 %v3890_v36, %v3890_v36 }
 0x1f3   :  { %3833 = vmatpush2.bf16.msra.mxu0 %v5601_v40  ;;  %v5651_v40 = vld [vmem:[%s7515_s3 + $0xd0] sm:$0xff]  }
 0x1f4   :  { %3874 = vmatpush2.bf16.msra.mxu1 %v5604_v44  ;;  %3834 = vmatprep.subr.bf16.mxu0 %v5609_v15  ;;  %v5652_v44 = vld [vmem:[%s7515_s3 + $0x90] sm:$0xff]  }
 0x1f5   :  { %3875 = vmatprep.subr.bf16.mxu1 %v5612_v41 }
 0x1f7   :  { %3835 = vmatpush2.bf16.msra.mxu0 %v5607_v43 }
 0x1f8   :  { %3876 = vmatpush2.bf16.msra.mxu1 %v5610_v45  ;;  %3836 = vmatprep.subr.bf16.mxu0 %v5615_v47 }
 0x1f9   :  { %3877 = vmatprep.subr.bf16.mxu1 %v5618_v48 }
 0x1fb   :  { %3837 = vmatpush2.bf16.msra.mxu0 %v5613_v60  ;;  %v5654_v60 = vld [vmem:[%s7515_s3 + $0x88] sm:$0xff]  }
 0x1fc   :  { %3878 = vmatpush2.bf16.msra.mxu1 %v5616_v0  ;;  %3838 = vmatprep.subr.bf16.mxu0 %v5621_v50 }
 0x1fd   :  { %3879 = vmatprep.subr.bf16.mxu1 %v5624_v38 }
 0x1ff   :  { %3839 = vmatpush2.bf16.msra.mxu0 %v5619_v35 }
 0x200   :  { %3880 = vmatpush2.bf16.msra.mxu1 %v5622_v55  ;;  %4809 = vmatprep.subr.bf16.mxu0 %v5625_v57  ;;  %v5655_v55 = vld [vmem:[%s7515_s3 + $0xc0] sm:$0xff]  }
 0x201   :  { %4831 = vmatprep.subr.bf16.mxu1 %v5641_v46 }
 0x202   :  { %v3596_v2 = vpop.f32.mrf.mxu0  ;;  %3841 = vmatmul.mubr.bf16.vlgmr.msra.gmra.mxu0 %v6581_v10 }
 0x203   :  { %v3637_v42 = vpop.f32.mrf.mxu1  ;;  %3882 = vmatmul.mubr.bf16.vlgmr.msra.gmra.mxu1 %v6596_v39  ;;  %v3597_v3 = vadd.f32 %v3596_v2, %v549_v62  ;;  %4810 = vmatpush3.bf16.msra.mxu0 %v5626_v54  ;;  %v5630_v39 = vld [vmem:[%s7515_s3 + $0x28] sm:$0xff]  }
 0x204   :  { %4193 = vmatprep.mubr.bf16.mxu0 %v3895_v63  ;;  %v3598_v5 = vpop.f32.mrf.mxu0  ;;  %4811 = vmatprep.subr.bf16.mxu0 %v5627_v59 }
 0x205   :  { %v3639_v7 = vpop.f32.mrf.mxu1  ;;  %v3638_v9 = vadd.f32 %v3637_v42, %v3597_v3  ;;  %v3599_v13 = vadd.f32 %v3598_v5, %v553_v1  ;;  %4832 = vmatpush3.bf16.msra.mxu1 %v5642_v16 }
 0x206   :  { %v3600_v18 = vpop.f32.mrf.mxu0  ;;  %4833 = vmatprep.subr.bf16.mxu1 %v5643_v17 }
 0x207   :  { %v3641_v10 = vpop.f32.mrf.mxu1  ;;  %v3640_v37 = vadd.f32 %v3639_v7, %v3599_v13  ;;  %4812 = vmatpush3.bf16.msra.mxu0 %v5628_v4 }
 0x208   :  { %v3601_v14 = vpop.f32.mrf.mxu0  ;;  %4813 = vmatprep.subr.bf16.mxu0 %v5629_v8 }
 0x209   :  { %v3642_v49 = vpop.f32.mrf.mxu1  ;;  %4834 = vmatpush3.bf16.msra.mxu1 %v5644_v19 }
 0x20a   :  { %4835 = vmatprep.subr.bf16.mxu1 %v5645_v21 }
 0x20b   :  { %4814 = vmatpush3.bf16.msra.mxu0 %v5630_v39 }
 0x20c   :  { %4815 = vmatprep.subr.bf16.mxu0 %v5631_v12 }
 0x20d   :  { %4836 = vmatpush3.bf16.msra.mxu1 %v5646_v24  ;;  %v4776_v24 = vld [vmem:[%s7516_s4] ss:$0 sm:$0xff]  ;;  %s5660_s4 = scalar_lea.vmem %s4257_s28, 32 }
 0x20e   :  { %4837 = vmatprep.subr.bf16.mxu1 %v5647_v27  ;;  %p5661_p0 = scmp.ne.s32.totalorder %s4257_s28, %s5660_s4  ;;  %p5666_p2 = scmp.lt.s32.totalorder %s5660_s4, %s5660_s4 }
 0x20f   :  { %4816 = vmatpush3.bf16.msra.mxu0 %v5632_v23 }
 0x210   :  { %4817 = vmatprep.subr.bf16.mxu0 %v5633_v20  ;;  %p5667_p3 = por %p5666_p2, %p5665_p1 }
 0x211   :  { %4838 = vmatpush3.bf16.msra.mxu1 %v5648_v29 }
 0x212   :  { %4839 = vmatprep.subr.bf16.mxu1 %v5649_v31  ;;  %p5668_p4 = pnand %p5667_p3, %p5661_p0 }
 0x213   :  { %4818 = vmatpush3.bf16.msra.mxu0 %v5634_v22 }
 0x214   :  { %4819 = vmatprep.subr.bf16.mxu0 %v5635_v25 }
 0x215   :  { %4840 = vmatpush3.bf16.msra.mxu1 %v5650_v6 }
 0x216   :  { %4841 = vmatprep.subr.bf16.mxu1 %v5651_v40 }
 0x217   :  { %4820 = vmatpush3.bf16.msra.mxu0 %v5636_v28 }
 0x218   :  { %4821 = vmatprep.subr.bf16.mxu0 %v5637_v30 }
 0x219   :  { %4842 = vmatpush3.bf16.msra.mxu1 %v5652_v44 }
 0x21a   :  { %4843 = vmatprep.subr.bf16.mxu1 %v5653_v11 }
 0x21b   :  { %4822 = vmatpush3.bf16.msra.mxu0 %v5638_v26 }
 0x21c   :  { %4823 = vmatprep.subr.bf16.mxu0 %v5639_v33 }
 0x21d   :  { %4844 = vmatpush3.bf16.msra.mxu1 %v5654_v60 }
 0x21e   :  { %4845 = vmatprep.subr.bf16.mxu1 %v5655_v55 }
 0x21f   :  { %4824 = vmatpush3.bf16.msra.mxu0 %v5640_v34 }
 0x221   :  { %4846 = vmatpush3.bf16.msra.mxu1 %v5656_v56 }
 0x222   :  { %4194 = vmatmul.mubr.bf16.vlgmr.msra.gmra.mxu0 %v3894_v32 }
 0x242   :  { %v3678_v15 = vpop.f32.mrf.mxu0 }
 0x243   :  { %v3719_v41 = vpop.f32.mrf.mxu1  ;;  %v3679_v43 = vadd.f32 %v3678_v15, %v3638_v9 }
 0x244   :  { %v3680_v45 = vpop.f32.mrf.mxu0 }
 0x245   :  { %v3721_v47 = vpop.f32.mrf.mxu1  ;;  %v3720_v48 = vadd.f32 %v3719_v41, %v3679_v43  ;;  %v3681_v51 = vadd.f32 %v3680_v45, %v3640_v37 }
 0x246   :  { %v3682_v0 = vpop.f32.mrf.mxu0 }
 0x247   :  { %v3723_v50 = vpop.f32.mrf.mxu1  ;;  %v3722_v38 = vadd.f32 %v3721_v47, %v3681_v51 }
 0x248   :  { %v3683_v52 = vpop.f32.mrf.mxu0 }
 0x249   :  { %v3724_v35 = vpop.f32.mrf.mxu1 }
 0x282   :  { %v3760_v57 = vpop.f32.mrf.mxu0 }
 0x283   :  { %v3801_v58 = vpop.f32.mrf.mxu1  ;;  %v3761_v53 = vadd.f32 %v3760_v57, %v3720_v48 }
 0x284   :  { %v3762_v61 = vpop.f32.mrf.mxu0 }
 0x285   :  { %v3803_v62 = vpop.f32.mrf.mxu1  ;;  %v3802_v54 = vadd.f32 %v3801_v58, %v3761_v53  ;;  %v3763_v42 = vadd.f32 %v3762_v61, %v3722_v38 }
 0x286   :  { %v3764_v59 = vpop.f32.mrf.mxu0 }
 0x287   :  { %v3805_v63 = vpop.f32.mrf.mxu1  ;;  %v3804_v5 = vadd.f32 %v3803_v62, %v3763_v42 }
 0x288   :  { %v3765_v1 = vpop.f32.mrf.mxu0 }
 0x289   :  { %v3806_v2 = vpop.f32.mrf.mxu1 }
 0x2c2   :  { %v3842_v3 = vpop.f32.mrf.mxu0 }
 0x2c3   :  { %v3883_v4 = vpop.f32.mrf.mxu1  ;;  %v3843_v7 = vadd.f32 %v3842_v3, %v3802_v54 }
 0x2c4   :  { %v3844_v8 = vpop.f32.mrf.mxu0 }
 0x2c5   :  { %v3885_v9 = vpop.f32.mrf.mxu1  ;;  %v3884_v13 = vadd.f32 %v3883_v4, %v3843_v7  ;;  %v3845_v18 = vadd.f32 %v3844_v8, %v3804_v5 }
 0x2c6   :  { %v3846_v10 = vpop.f32.mrf.mxu0 }
 0x2c7   :  { %v3887_v37 = vpop.f32.mrf.mxu1  ;;  %v3886_v39 = vadd.f32 %v3885_v9, %v3845_v18  ;;  %v3892_v12 = vmax.f32 %v3884_v13, 0.0 }
 0x2c8   :  { %v3847_v14 = vpop.f32.mrf.mxu0 }
 0x2c9   :  { %v3888_v49 = vpop.f32.mrf.mxu1  ;;  %v3893_v46 = vmax.f32 %v3886_v39, 0.0  ;;  %v3896_v17 = vpack.c.bf16 %v3892_v12, %v3892_v12 }
 0x2cb   :  { %v3897_v16 = vpack.c.bf16 %v3893_v46, %v3893_v46 }
 0x2cd   :  { %4233 = vmatprep.mubr.bf16.mxu1 %v3897_v16 }
 0x2ce   :  { %4234 = vmatmul.mubr.bf16.vlgmr.msra.gmra.mxu1 %v3896_v17 }
 0x2e2   :  { %v4825_v23 = vpop.f32.mrf.mxu0 }
 0x2e4   :  { %v4826_v19 = vpop.f32.mrf.mxu0 }
 0x2e5   :  { %v4827_v20 = vadd.f32 %v4826_v19, %v4825_v23 }
 0x2e6   :  { %v4828_v21 = vpop.f32.mrf.mxu0 }
 0x2e7   :  { %v4196_v28 = vadd.f32 %v4827_v20, %v4776_v24 }
 0x2e8   :  { %v4829_v22 = vpop.f32.mrf.mxu0 }
 0x38e   :  { %v4847_v25 = vpop.f32.mrf.mxu1 }
 0x390   :  { %v4848_v27 = vpop.f32.mrf.mxu1 }
 0x391   :  { %v4849_v29 = vadd.f32 %v4848_v27, %v4847_v25 }
 0x392   :  { %v4850_v30 = vpop.f32.mrf.mxu1 }
 0x393   :  { %v4236_v31 = vadd.f32 %v4849_v29, %v4196_v28 }
 0x394   :  { %v4851_v26 = vpop.f32.mrf.mxu1 }
 0x395   :  { %v4241_v6 = vmul.f32 %v4236_v31, %v4236_v31 }
 0x397   :  { %v4243_v33 = vsel %vm4242_vm0, %v4241_v6, 0.0 }
 0x398   :  { %4244 = vadd.xlane.f32.xlu0 %v4243_v33 }
 0x421   :  { %v4245_v34 = vpop.xlane.xlu0 %4244 }
 0x422   :  { %v4246_v36 = vmax.f32 %v4245_v34, 1e-24 }
 0x424   :  { %5657 = vrsqrt.f32 %v4246_v36 }
 0x431   :  { %v5658_v32 = vpop.eup %5657 }
 0x432   :  { %v4248_v40 = vmul.f32 %v5658_v32, %v4236_v31 }
 0x434   :  { %4249 = vst [vmem:[#allocation2] sm:$0x3] %v4248_v40 }
 0x435   :  { %5671 = shalt.err (!%p5668_p4)
}
 0x436   :  { %4259 = dma.vmem_to_hbm [thread:$0]  %s4257_s28, 32, %s7517_s5, [#allocation3]  }
 0x437   :  { %5680 = dma.done.wait [#allocation3], 32  }
 0x438   :  { %5681 = vsyncadd [#allocation3], 4294967264 }
 0x439   :  { %4263 = vsyncpa [#allocation3], 1 }

</bundles_post_ra>
